<compile_context>
chip_gen: v7x
topology: tpu7x:2x2x1
jax: 0.10.0
libtpu: 0.0.40
codegen_flags: <defaults>
</compile_context>

<pallas_src>
import functools
import math

import numpy as np
import jax
import jax.numpy as jnp
from jax.experimental import pallas as pl
from jax.experimental.pallas import tpu as pltpu


# ----------------------------- in-kernel math helpers -----------------------------

def _erf(x):
    # Float32-accurate erf (Abramowitz & Stegun 7.1.26, max abs err ~1.5e-7 with an exact
    # divide).  The 1/(1 + p*z) term uses the approximate EUP reciprocal per the perf
    # review; the added error stays well inside the test tolerance.
    a1, a2, a3, a4, a5 = (0.254829592, -0.284496736, 1.421413741,
                          -1.453152027, 1.061405429)
    p = 0.3275911
    z = jnp.abs(x)
    t = pl.reciprocal(1.0 + p * z, approx=True)
    poly = ((((a5 * t + a4) * t + a3) * t + a2) * t + a1) * t
    y = 1.0 - poly * jnp.exp(-z * z)
    return jnp.where(x >= 0, y, -y)


def _gelu_exact(x):
    # matches torch.nn.GELU() (approximate='none'): 0.5*x*(1+erf(x/sqrt(2)))
    return 0.5 * x * (1.0 + _erf(x * (1.0 / math.sqrt(2.0))))


def _layernorm(y, g, b, eps=1e-5):
    mu = jnp.mean(y, axis=-1, keepdims=True)
    var = jnp.mean(jnp.square(y - mu), axis=-1, keepdims=True)
    return (y - mu) * jax.lax.rsqrt(var + eps) * g + b


# ----------------------------- fused Pallas kernel -----------------------------

def _attention_block(xs, vbuf_ref, slab_ref, *, b_blk, L, D, H, d_k, d_v, d_ff):
    """One {Time,Feat}AttentionLayer applied to a whole batch block.

    xs: (b_blk*L, D) — the b_blk samples' (L, D) inputs stacked along sublanes.
    slab_ref: packed per-block weights (row layout documented in pack_block_slab).
    Returns (b_blk*L, D).
    """
    BL = b_blk * L
    qkv_w = H * (2 * d_k + d_v)
    scale = 1.0 / math.sqrt(d_k)

    # static row offsets inside the packed weight slab (must match pack_block_slab)
    r_qkvw, r_w1, r_ow = 0, D, 2 * D
    r_w2 = 2 * D + H * d_v
    rv = r_w2 + d_ff                      # first of the 8 single-row bias/scale vectors

    # fused Q/K/V projection for the whole batch block: one (BL, D) @ (D, qkv_w) matmul
    qkv = (jnp.dot(xs, slab_ref[r_qkvw:r_qkvw + D, 0:qkv_w],
                   preferred_element_type=jnp.float32)
           + slab_ref[rv + 0:rv + 1, 0:qkv_w])
    q_off, k_off, v_off = 0, H * d_k, 2 * H * d_k

    # per-(sample, head) attention; head h of sample b MUST land in vbuf rows
    # [(b*H + h)*L, (b*H + h)*L + L) — the strided mix-read below relies on it.
    for b in range(b_blk):
        r0 = b * L
        for h in range(H):
            qh = qkv[r0:r0 + L, q_off + h * d_k: q_off + (h + 1) * d_k]
            kh = qkv[r0:r0 + L, k_off + h * d_k: k_off + (h + 1) * d_k]
            vh = qkv[r0:r0 + L, v_off + h * d_v: v_off + (h + 1) * d_v]
            s = jax.lax.dot_general(qh, kh, (((1,), (1,)), ((), ())),
                                    preferred_element_type=jnp.float32) * scale
            m = jnp.max(s, axis=-1, keepdims=True)
            e = jnp.exp(s - m)
            a = e * pl.reciprocal(jnp.sum(e, axis=-1, keepdims=True), approx=True)
            vbuf_ref[pl.ds((b * H + h) * L, L), :] = jnp.dot(
                a, vh, preferred_element_type=jnp.float32)

    # mix=True shuffle fused with the output projection, for the whole batch block:
    # mixed[:, hp*d_v:(hp+1)*d_v] == vbuf rows {hp, hp+H, hp+2H, ...}, so
    # attn = ob + sum_hp strided_rows(hp) @ ow[hp*d_v:(hp+1)*d_v, :]
    attn = slab_ref[rv + 2:rv + 3, 0:D]                       # ob bias (broadcasts)
    for hp in range(H):
        attn = attn + jnp.dot(
            vbuf_ref[pl.ds(hp, BL, stride=H), :],
            slab_ref[r_ow + hp * d_v: r_ow + (hp + 1) * d_v, 0:D],
            preferred_element_type=jnp.float32)

    # residual + LayerNorm + MLP(GELU) + residual + LayerNorm (dropout == identity),
    # all on the stacked (BL, D) block
    y = _layernorm(xs + attn,
                   slab_ref[rv + 3:rv + 4, 0:D], slab_ref[rv + 4:rv + 5, 0:D])
    hid = _gelu_exact(jnp.dot(y, slab_ref[r_w1:r_w1 + D, 0:d_ff],
                              preferred_element_type=jnp.float32)
                      + slab_ref[rv + 1:rv + 2, 0:d_ff])
    z = (y + jnp.dot(hid, slab_ref[r_w2:r_w2 + d_ff, 0:D],
                     preferred_element_type=jnp.float32)
         + slab_ref[rv + 5:rv + 6, 0:D])
    return _layernorm(z, slab_ref[rv + 6:rv + 7, 0:D], slab_ref[rv + 7:rv + 8, 0:D])


def fused_forward_kernel(x_ref, t_slab_ref, f_slab_ref, cls_ref, out_ref,
                         vbuf_ref, tbuf_ref, fbuf_ref,
                         *, b_blk, n_heads, d_k, d_v, d_ff):
    """Whole TimeSeriesClassifier forward for one batch block (grid = (B // b_blk,))."""
    _, T, F = x_ref.shape
    H = n_heads

    # ---- time-attention branch on (T, F) rows, all samples in the block stacked ----
    x_time = jnp.concatenate([x_ref[b] for b in range(b_blk)], axis=0)      # (Bblk*T, F)
    tbuf_ref[...] = _attention_block(x_time, vbuf_ref, t_slab_ref, b_blk=b_blk,
                                     L=T, D=F, H=H, d_k=d_k, d_v=d_v, d_ff=d_ff)

    # ---- feature-attention branch on x.permute(0,2,1): (F, T) rows, stacked ----
    x_feat = jnp.concatenate([x_ref[b].T for b in range(b_blk)], axis=0)    # (Bblk*F, T)
    fbuf_ref[...] = _attention_block(x_feat, vbuf_ref, f_slab_ref, b_blk=b_blk,
                                     L=F, D=T, H=H, d_k=d_k, d_v=d_v, d_ff=d_ff)

    # ---- classifier with the flatten folded into static cls_w row-slices ----
    # out[b] = cls_b + sum_i t_out[b,i,:] @ cls_w[i*F:(i+1)*F]
    #                + sum_j f_out[b,j,:] @ cls_w[T*F + j*T : T*F + (j+1)*T]
    acc = cls_ref[2 * T * F: 2 * T * F + 1, :]                 # bias row (1, C)
    for i in range(T):
        acc = acc + jnp.dot(tbuf_ref[pl.ds(i, b_blk, stride=T), :],
                            cls_ref[i * F:(i + 1) * F, :],
                            preferred_element_type=jnp.float32)
    for j in range(F):
        acc = acc + jnp.dot(fbuf_ref[pl.ds(j, b_blk, stride=F), :],
                            cls_ref[T * F + j * T: T * F + (j + 1) * T, :],
                            preferred_element_type=jnp.float32)
    out_ref[0] = acc.astype(out_ref.dtype)


# ----------------------------- wrapper -----------------------------

def timeseries_classifier_forward(x, t_slab, f_slab, cls_slab, *,
                                  n_heads, d_k, d_v, d_ff, num_classes,
                                  grid_steps=None):
    B, T, F = x.shape
    C = num_classes
    if grid_steps is None:
        # <=2 grid steps: 2 keeps both v7x TensorCores busy (batch axis is "parallel")
        # and is a near no-op on single-TC v5e/v6e; fall back to 1 if B can't be split.
        grid_steps = 2 if (B >= 2 and B % 2 == 0) else 1
    assert B % grid_steps == 0
    b_blk = B // grid_steps

    def whole(a):
        zeros = (0,) * a.ndim
        return pl.BlockSpec(a.shape, lambda g, _z=zeros: _z)

    kern = functools.partial(fused_forward_kernel, b_blk=b_blk, n_heads=n_heads,
                             d_k=d_k, d_v=d_v, d_ff=d_ff)
    out3 = pl.pallas_call(
        kern,
        out_shape=jax.ShapeDtypeStruct((grid_steps, b_blk, C), jnp.float32),
        grid=(grid_steps,),
        in_specs=[pl.BlockSpec((b_blk, T, F), lambda g: (g, 0, 0)),
                  whole(t_slab), whole(f_slab), whole(cls_slab)],
        out_specs=pl.BlockSpec((1, b_blk, C), lambda g: (g, 0, 0)),
        scratch_shapes=[
            pltpu.VMEM((b_blk * n_heads * max(T, F), d_v), jnp.float32),  # head outputs
            pltpu.VMEM((b_blk * T, F), jnp.float32),                      # time-branch out
            pltpu.VMEM((b_blk * F, T), jnp.float32),                      # feat-branch out
        ],
        compiler_params=pltpu.CompilerParams(
            dimension_semantics=("parallel",)),   # batch blocks across v7x's 2 TCs
    )(x, t_slab, f_slab, cls_slab)
    return out3.reshape(B, C)


# ----------------------------- parameter init (deterministic) -----------------------------

def linear_params(key, fan_in, fan_out):
    kw, kb = jax.random.split(key)
    bound = 1.0 / math.sqrt(fan_in)
    w_t = jax.random.uniform(kw, (fan_in, fan_out), jnp.float32, -bound, bound)
    b = jax.random.uniform(kb, (1, fan_out), jnp.float32, -bound, bound)
    return w_t, b


def make_block_params(key, feat_dim, n_heads, d_k, d_v, d_ff):
    keys = jax.random.split(key, 6)
    qwT, qb = linear_params(keys[0], feat_dim, n_heads * d_k)
    kwT, kb = linear_params(keys[1], feat_dim, n_heads * d_k)
    vwT, vb = linear_params(keys[2], feat_dim, n_heads * d_v)
    owT, ob = linear_params(keys[3], n_heads * d_v, feat_dim)
    w1T, c1 = linear_params(keys[4], feat_dim, d_ff)
    w2T, c2 = linear_params(keys[5], d_ff, feat_dim)
    g1 = jnp.ones((1, feat_dim), jnp.float32)
    beta1 = jnp.zeros((1, feat_dim), jnp.float32)
    g2 = jnp.ones((1, feat_dim), jnp.float32)
    beta2 = jnp.zeros((1, feat_dim), jnp.float32)
    return [qwT, qb, kwT, kb, vwT, vb, owT, ob,
            g1, beta1, w1T, c1, w2T, c2, g2, beta2]


def pack_block_slab(p, feat_dim, n_heads, d_k, d_v, d_ff):
    """Pack all 16 per-block tensors into ONE lane-aligned weight slab (host side, once).

    Row layout (D = feat_dim), lane width = H*(2*d_k+d_v):
      [0, D)               fused Q|K|V weight  (D, H*(2*d_k+d_v))
      [D, 2D)              MLP w1              (D, d_ff)
      [2D, 2D+H*d_v)       out-projection      (H*d_v, D)
      [2D+H*d_v, +d_ff)    MLP w2              (d_ff, D)
      then 8 single rows:  qkv bias, c1, ob, ln1 gamma, ln1 beta, c2, ln2 gamma, ln2 beta
    """
    D = feat_dim
    qkv_w = jnp.concatenate([p[0], p[2], p[4]], axis=1)   # (D, H*(2*d_k+d_v))
    qkv_b = jnp.concatenate([p[1], p[3], p[5]], axis=1)   # (1, H*(2*d_k+d_v))
    lane = max(qkv_w.shape[1], d_ff, D)

    def pad(a):
        return jnp.pad(a, ((0, 0), (0, lane - a.shape[1])))

    rows = [pad(qkv_w), pad(p[10]), pad(p[6]), pad(p[12]),
            pad(qkv_b), pad(p[11]), pad(p[7]), pad(p[8]), pad(p[9]),
            pad(p[13]), pad(p[14]), pad(p[15])]
    return jnp.concatenate(rows, axis=0)


# ----------------------------- pure-JAX reference (mirrors the PyTorch forward) --------------

def _attention_layer_ref(x, p, H, dk, dv):
    B, L, _ = x.shape
    q = (x @ p[0] + p[1]).reshape(B, L, H, dk)
    k = (x @ p[2] + p[3]).reshape(B, L, H, dk)
    v = (x @ p[4] + p[5]).reshape(B, L, H, dv)
    scale = 1.0 / math.sqrt(dk)
    scores = jnp.einsum('blhe,bshe->bhls', q, k)
    A = jax.nn.softmax(scale * scores, axis=-1)
    V = jnp.einsum('bhls,bshd->blhd', A, v)
    out = jnp.transpose(V, (0, 2, 1, 3)).reshape(B, L, H * dv)   # mix=True
    return out @ p[6] + p[7]


def _block_ref(x, p, H, dk, dv):
    attn = _attention_layer_ref(x, p, H, dk, dv)
    y = _layernorm(x + attn, p[8], p[9])
    h = jax.nn.gelu(y @ p[10] + p[11], approximate=False)
    return _layernorm(y + (h @ p[12] + p[13]), p[14], p[15])


def model_ref(x, tp, fp, cwT, cb, H, dk, dv):
    B = x.shape[0]
    t = _block_ref(x, tp, H, dk, dv).reshape(B, -1)
    f = _block_ref(jnp.transpose(x, (0, 2, 1)), fp, H, dk, dv).reshape(B, -1)
    z = jnp.concatenate([t, f], axis=1)
    return z @ cwT + cb


# ----------------------------- main -----------------------------

if __name__ == "__main__":
    # model config (matches TimeSeriesClassifier(num_features=16, num_classes=4,
    #                                            time_steps=8, n_heads=2, d_ff=32))
    B, T, F = 4, 8, 16          # batch, time_steps, num_features
    H, DK, DV = 2, 16, 16       # n_heads, d_keys, d_values (AttentionLayer defaults)
    DFF, C = 32, 4              # d_ff, num_classes

    key = jax.random.PRNGKey(0)
    kx, kt, kf, kc = jax.random.split(key, 4)

    x = jax.random.normal(kx, (B, T, F), jnp.float32)
    time_params = make_block_params(kt, F, H, DK, DV, DFF)   # TimeAttentionLayer params
    feat_params = make_block_params(kf, T, H, DK, DV, DFF)   # FeatAttentionLayer params
    cls_wT, cls_b = linear_params(kc, 2 * T * F, C)          # classifier Linear

    # one-time host-side packing: one weight slab per block + one classifier slab
    t_slab = pack_block_slab(time_params, F, H, DK, DV, DFF)
    f_slab = pack_block_slab(feat_params, T, H, DK, DV, DFF)
    cls_slab = jnp.concatenate([cls_wT, cls_b], axis=0)      # (2*T*F + 1, C)

    out = timeseries_classifier_forward(x, t_slab, f_slab, cls_slab,
                                        n_heads=H, d_k=DK, d_v=DV, d_ff=DFF,
                                        num_classes=C)
    out = jax.block_until_ready(out)
    assert out.shape == (B, C)

    ref = jax.block_until_ready(model_ref(x, time_params, feat_params,
                                          cls_wT, cls_b, H, DK, DV))
    # tolerance relaxed vs exact f32 because the softmax denominator and the erf divide
    # use the approximate EUP reciprocal (pl.reciprocal(approx=True)).
    np.testing.assert_allclose(np.asarray(out), np.asarray(ref), rtol=5e-3, atol=5e-3)

    print("KERNEL_OK")
</pallas_src>

<mosaic_0001>
module attributes {stable_mosaic.version = 11 : i64} {
  func.func @fused_forward_kernel(%arg0: i32, %arg1: memref<2x8x16xf32, #tpu.memory_space<vmem>>, %arg2: memref<104x96xf32, #tpu.memory_space<vmem>>, %arg3: memref<88x96xf32, #tpu.memory_space<vmem>>, %arg4: memref<257x4xf32, #tpu.memory_space<vmem>>, %arg5: memref<1x2x4xf32, #tpu.memory_space<vmem>>, %arg6: memref<64x16xf32, #tpu.memory_space<vmem>>, %arg7: memref<16x16xf32, #tpu.memory_space<vmem>>, %arg8: memref<32x8xf32, #tpu.memory_space<vmem>>) attributes {dimension_semantics = [#tpu.dimension_semantics<parallel>], iteration_bounds = array<i64: 2>, scalar_prefetch = 0 : i64, scratch_operands = 3 : i64, tpu.core_type = #tpu.core_type<tc>, window_params = [{transform_indices = @transform_0, window_bounds = array<i64: 2, 8, 16>}, {pipeline_mode = #tpu.pipeline_mode<synchronous>, transform_indices = @transform_1, window_bounds = array<i64: 104, 96>}, {pipeline_mode = #tpu.pipeline_mode<synchronous>, transform_indices = @transform_2, window_bounds = array<i64: 88, 96>}, {pipeline_mode = #tpu.pipeline_mode<synchronous>, transform_indices = @transform_3, window_bounds = array<i64: 257, 4>}, {transform_indices = @transform_4, window_bounds = array<i64: 1, 2, 4>}]} {
    %c0 = arith.constant 0 : index
    %c0_0 = arith.constant 0 : index
    %c0_1 = arith.constant 0 : index
    %0 = vector.load %arg1[%c0, %c0_0, %c0_1] : memref<2x8x16xf32, #tpu.memory_space<vmem>>, vector<1x8x16xf32>
    %1 = vector.shape_cast %0 : vector<1x8x16xf32> to vector<8x16xf32>
    %c1 = arith.constant 1 : index
    %c0_2 = arith.constant 0 : index
    %c0_3 = arith.constant 0 : index
    %2 = vector.load %arg1[%c1, %c0_2, %c0_3] : memref<2x8x16xf32, #tpu.memory_space<vmem>>, vector<1x8x16xf32>
    %3 = vector.shape_cast %2 : vector<1x8x16xf32> to vector<8x16xf32>
    %4 = tpu.concatenate %1, %3 in 0 : vector<8x16xf32>, vector<8x16xf32> -> vector<16x16xf32>
    %c0_4 = arith.constant 0 : index
    %c0_5 = arith.constant 0 : index
    %5 = vector.load %arg2[%c0_4, %c0_5] : memref<104x96xf32, #tpu.memory_space<vmem>>, vector<16x96xf32>
    %cst = arith.constant dense<0.000000e+00> : vector<16x96xf32>
    %6 = tpu.matmul %4, %5, %cst {dimension_numbers = #tpu.dot_dimension_numbers<[1], [0], [0], [1], [0, 0, 1, 1], [], []>} : vector<16x16xf32>, vector<16x96xf32>, vector<16x96xf32> -> vector<16x96xf32>
    %c96 = arith.constant 96 : index
    %c0_6 = arith.constant 0 : index
    %7 = vector.load %arg2[%c96, %c0_6] : memref<104x96xf32, #tpu.memory_space<vmem>>, vector<1x96xf32>
    %8 = vector.broadcast %7 : vector<1x96xf32> to vector<16x96xf32>
    %9 = arith.addf %6, %8 : vector<16x96xf32>
    %10 = vector.extract_strided_slice %9 {offsets = [0, 0], sizes = [8, 16], strides = [1, 1]} : vector<16x96xf32> to vector<8x16xf32>
    %11 = vector.extract_strided_slice %9 {offsets = [0, 32], sizes = [8, 16], strides = [1, 1]} : vector<16x96xf32> to vector<8x16xf32>
    %12 = vector.extract_strided_slice %9 {offsets = [0, 64], sizes = [8, 16], strides = [1, 1]} : vector<16x96xf32> to vector<8x16xf32>
    %cst_7 = arith.constant dense<0.000000e+00> : vector<8x8xf32>
    %13 = tpu.matmul %10, %11, %cst_7 {dimension_numbers = #tpu.dot_dimension_numbers<[1], [1], [0], [0], [0, 0, 1, 0], [], []>} : vector<8x16xf32>, vector<8x16xf32>, vector<8x8xf32> -> vector<8x8xf32>
    %cst_8 = arith.constant 2.500000e-01 : f32
    %14 = vector.broadcast %cst_8 : f32 to vector<8x8xf32>
    %15 = arith.mulf %13, %14 : vector<8x8xf32>
    %cst_9 = arith.constant dense<0xFF800000> : vector<8xf32>
    %16 = vector.multi_reduction <maximumf>, %15, %cst_9 [1] : vector<8x8xf32> to vector<8xf32>
    %17 = vector.shape_cast %16 : vector<8xf32> to vector<8x1xf32>
    %18 = vector.broadcast %17 : vector<8x1xf32> to vector<8x8xf32>
    %19 = arith.subf %15, %18 : vector<8x8xf32>
    %20 = math.exp %19 : vector<8x8xf32>
    %cst_10 = arith.constant dense<0.000000e+00> : vector<8xf32>
    %21 = vector.multi_reduction <add>, %20, %cst_10 [1] : vector<8x8xf32> to vector<8xf32>
    %22 = vector.shape_cast %21 : vector<8xf32> to vector<8x1xf32>
    %23 = tpu.reciprocal %22 {approx = true} : vector<8x1xf32> -> vector<8x1xf32>
    %24 = vector.broadcast %23 : vector<8x1xf32> to vector<8x8xf32>
    %25 = arith.mulf %20, %24 : vector<8x8xf32>
    %cst_11 = arith.constant dense<0.000000e+00> : vector<8x16xf32>
    %26 = tpu.matmul %25, %12, %cst_11 {dimension_numbers = #tpu.dot_dimension_numbers<[1], [0], [0], [1], [0, 0, 1, 1], [], []>} : vector<8x8xf32>, vector<8x16xf32>, vector<8x16xf32> -> vector<8x16xf32>
    %c0_12 = arith.constant 0 : index
    %c0_13 = arith.constant 0 : index
    %27 = vector.load %arg6[%c0_12, %c0_13] : memref<64x16xf32, #tpu.memory_space<vmem>>, vector<8x16xf32>
    tpu.vector_store %arg6[%c0_12, %c0_13], %26 {strides = array<i32>} : memref<64x16xf32, #tpu.memory_space<vmem>>, vector<8x16xf32>,
    %28 = vector.extract_strided_slice %9 {offsets = [0, 16], sizes = [8, 16], strides = [1, 1]} : vector<16x96xf32> to vector<8x16xf32>
    %29 = vector.extract_strided_slice %9 {offsets = [0, 48], sizes = [8, 16], strides = [1, 1]} : vector<16x96xf32> to vector<8x16xf32>
    %30 = vector.extract_strided_slice %9 {offsets = [0, 80], sizes = [8, 16], strides = [1, 1]} : vector<16x96xf32> to vector<8x16xf32>
    %cst_14 = arith.constant dense<0.000000e+00> : vector<8x8xf32>
    %31 = tpu.matmul %28, %29, %cst_14 {dimension_numbers = #tpu.dot_dimension_numbers<[1], [1], [0], [0], [0, 0, 1, 0], [], []>} : vector<8x16xf32>, vector<8x16xf32>, vector<8x8xf32> -> vector<8x8xf32>
    %cst_15 = arith.constant 2.500000e-01 : f32
    %32 = vector.broadcast %cst_15 : f32 to vector<8x8xf32>
    %33 = arith.mulf %31, %32 : vector<8x8xf32>
    %cst_16 = arith.constant dense<0xFF800000> : vector<8xf32>
    %34 = vector.multi_reduction <maximumf>, %33, %cst_16 [1] : vector<8x8xf32> to vector<8xf32>
    %35 = vector.shape_cast %34 : vector<8xf32> to vector<8x1xf32>
    %36 = vector.broadcast %35 : vector<8x1xf32> to vector<8x8xf32>
    %37 = arith.subf %33, %36 : vector<8x8xf32>
    %38 = math.exp %37 : vector<8x8xf32>
    %cst_17 = arith.constant dense<0.000000e+00> : vector<8xf32>
    %39 = vector.multi_reduction <add>, %38, %cst_17 [1] : vector<8x8xf32> to vector<8xf32>
    %40 = vector.shape_cast %39 : vector<8xf32> to vector<8x1xf32>
    %41 = tpu.reciprocal %40 {approx = true} : vector<8x1xf32> -> vector<8x1xf32>
    %42 = vector.broadcast %41 : vector<8x1xf32> to vector<8x8xf32>
    %43 = arith.mulf %38, %42 : vector<8x8xf32>
    %cst_18 = arith.constant dense<0.000000e+00> : vector<8x16xf32>
    %44 = tpu.matmul %43, %30, %cst_18 {dimension_numbers = #tpu.dot_dimension_numbers<[1], [0], [0], [1], [0, 0, 1, 1], [], []>} : vector<8x8xf32>, vector<8x16xf32>, vector<8x16xf32> -> vector<8x16xf32>
    %c8 = arith.constant 8 : index
    %c0_19 = arith.constant 0 : index
    %45 = vector.load %arg6[%c8, %c0_19] : memref<64x16xf32, #tpu.memory_space<vmem>>, vector<8x16xf32>
    tpu.vector_store %arg6[%c8, %c0_19], %44 {strides = array<i32>} : memref<64x16xf32, #tpu.memory_space<vmem>>, vector<8x16xf32>,
    %46 = vector.extract_strided_slice %9 {offsets = [8, 0], sizes = [8, 16], strides = [1, 1]} : vector<16x96xf32> to vector<8x16xf32>
    %47 = vector.extract_strided_slice %9 {offsets = [8, 32], sizes = [8, 16], strides = [1, 1]} : vector<16x96xf32> to vector<8x16xf32>
    %48 = vector.extract_strided_slice %9 {offsets = [8, 64], sizes = [8, 16], strides = [1, 1]} : vector<16x96xf32> to vector<8x16xf32>
    %cst_20 = arith.constant dense<0.000000e+00> : vector<8x8xf32>
    %49 = tpu.matmul %46, %47, %cst_20 {dimension_numbers = #tpu.dot_dimension_numbers<[1], [1], [0], [0], [0, 0, 1, 0], [], []>} : vector<8x16xf32>, vector<8x16xf32>, vector<8x8xf32> -> vector<8x8xf32>
    %cst_21 = arith.constant 2.500000e-01 : f32
    %50 = vector.broadcast %cst_21 : f32 to vector<8x8xf32>
    %51 = arith.mulf %49, %50 : vector<8x8xf32>
    %cst_22 = arith.constant dense<0xFF800000> : vector<8xf32>
    %52 = vector.multi_reduction <maximumf>, %51, %cst_22 [1] : vector<8x8xf32> to vector<8xf32>
    %53 = vector.shape_cast %52 : vector<8xf32> to vector<8x1xf32>
    %54 = vector.broadcast %53 : vector<8x1xf32> to vector<8x8xf32>
    %55 = arith.subf %51, %54 : vector<8x8xf32>
    %56 = math.exp %55 : vector<8x8xf32>
    %cst_23 = arith.constant dense<0.000000e+00> : vector<8xf32>
    %57 = vector.multi_reduction <add>, %56, %cst_23 [1] : vector<8x8xf32> to vector<8xf32>
    %58 = vector.shape_cast %57 : vector<8xf32> to vector<8x1xf32>
    %59 = tpu.reciprocal %58 {approx = true} : vector<8x1xf32> -> vector<8x1xf32>
    %60 = vector.broadcast %59 : vector<8x1xf32> to vector<8x8xf32>
    %61 = arith.mulf %56, %60 : vector<8x8xf32>
    %cst_24 = arith.constant dense<0.000000e+00> : vector<8x16xf32>
    %62 = tpu.matmul %61, %48, %cst_24 {dimension_numbers = #tpu.dot_dimension_numbers<[1], [0], [0], [1], [0, 0, 1, 1], [], []>} : vector<8x8xf32>, vector<8x16xf32>, vector<8x16xf32> -> vector<8x16xf32>
    %c16 = arith.constant 16 : index
    %c0_25 = arith.constant 0 : index
    %63 = vector.load %arg6[%c16, %c0_25] : memref<64x16xf32, #tpu.memory_space<vmem>>, vector<8x16xf32>
    tpu.vector_store %arg6[%c16, %c0_25], %62 {strides = array<i32>} : memref<64x16xf32, #tpu.memory_space<vmem>>, vector<8x16xf32>,
    %64 = vector.extract_strided_slice %9 {offsets = [8, 16], sizes = [8, 16], strides = [1, 1]} : vector<16x96xf32> to vector<8x16xf32>
    %65 = vector.extract_strided_slice %9 {offsets = [8, 48], sizes = [8, 16], strides = [1, 1]} : vector<16x96xf32> to vector<8x16xf32>
    %66 = vector.extract_strided_slice %9 {offsets = [8, 80], sizes = [8, 16], strides = [1, 1]} : vector<16x96xf32> to vector<8x16xf32>
    %cst_26 = arith.constant dense<0.000000e+00> : vector<8x8xf32>
    %67 = tpu.matmul %64, %65, %cst_26 {dimension_numbers = #tpu.dot_dimension_numbers<[1], [1], [0], [0], [0, 0, 1, 0], [], []>} : vector<8x16xf32>, vector<8x16xf32>, vector<8x8xf32> -> vector<8x8xf32>
    %cst_27 = arith.constant 2.500000e-01 : f32
    %68 = vector.broadcast %cst_27 : f32 to vector<8x8xf32>
    %69 = arith.mulf %67, %68 : vector<8x8xf32>
    %cst_28 = arith.constant dense<0xFF800000> : vector<8xf32>
    %70 = vector.multi_reduction <maximumf>, %69, %cst_28 [1] : vector<8x8xf32> to vector<8xf32>
    %71 = vector.shape_cast %70 : vector<8xf32> to vector<8x1xf32>
    %72 = vector.broadcast %71 : vector<8x1xf32> to vector<8x8xf32>
    %73 = arith.subf %69, %72 : vector<8x8xf32>
    %74 = math.exp %73 : vector<8x8xf32>
    %cst_29 = arith.constant dense<0.000000e+00> : vector<8xf32>
    %75 = vector.multi_reduction <add>, %74, %cst_29 [1] : vector<8x8xf32> to vector<8xf32>
    %76 = vector.shape_cast %75 : vector<8xf32> to vector<8x1xf32>
    %77 = tpu.reciprocal %76 {approx = true} : vector<8x1xf32> -> vector<8x1xf32>
    %78 = vector.broadcast %77 : vector<8x1xf32> to vector<8x8xf32>
    %79 = arith.mulf %74, %78 : vector<8x8xf32>
    %cst_30 = arith.constant dense<0.000000e+00> : vector<8x16xf32>
    %80 = tpu.matmul %79, %66, %cst_30 {dimension_numbers = #tpu.dot_dimension_numbers<[1], [0], [0], [1], [0, 0, 1, 1], [], []>} : vector<8x8xf32>, vector<8x16xf32>, vector<8x16xf32> -> vector<8x16xf32>
    %c24 = arith.constant 24 : index
    %c0_31 = arith.constant 0 : index
    %81 = vector.load %arg6[%c24, %c0_31] : memref<64x16xf32, #tpu.memory_space<vmem>>, vector<8x16xf32>
    tpu.vector_store %arg6[%c24, %c0_31], %80 {strides = array<i32>} : memref<64x16xf32, #tpu.memory_space<vmem>>, vector<8x16xf32>,
    %c98 = arith.constant 98 : index
    %c0_32 = arith.constant 0 : index
    %82 = vector.load %arg2[%c98, %c0_32] : memref<104x96xf32, #tpu.memory_space<vmem>>, vector<1x16xf32>
    %c0_33 = arith.constant 0 : index
    %c0_34 = arith.constant 0 : index
    %83 = tpu.strided_load %arg6[%c0_33, %c0_34] {strides = array<i32: 2, 1>} : memref<64x16xf32, #tpu.memory_space<vmem>>, vector<16x16xf32>
    %c32 = arith.constant 32 : index
    %c0_35 = arith.constant 0 : index
    %84 = vector.load %arg2[%c32, %c0_35] : memref<104x96xf32, #tpu.memory_space<vmem>>, vector<16x16xf32>
    %cst_36 = arith.constant dense<0.000000e+00> : vector<16x16xf32>
    %85 = tpu.matmul %83, %84, %cst_36 {dimension_numbers = #tpu.dot_dimension_numbers<[1], [0], [0], [1], [0, 0, 1, 1], [], []>} : vector<16x16xf32>, vector<16x16xf32>, vector<16x16xf32> -> vector<16x16xf32>
    %86 = vector.broadcast %82 : vector<1x16xf32> to vector<16x16xf32>
    %87 = arith.addf %86, %85 : vector<16x16xf32>
    %c1_37 = arith.constant 1 : index
    %c0_38 = arith.constant 0 : index
    %88 = tpu.strided_load %arg6[%c1_37, %c0_38] {strides = array<i32: 2, 1>} : memref<64x16xf32, #tpu.memory_space<vmem>>, vector<16x16xf32>
    %c48 = arith.constant 48 : index
    %c0_39 = arith.constant 0 : index
    %89 = vector.load %arg2[%c48, %c0_39] : memref<104x96xf32, #tpu.memory_space<vmem>>, vector<16x16xf32>
    %cst_40 = arith.constant dense<0.000000e+00> : vector<16x16xf32>
    %90 = tpu.matmul %88, %89, %cst_40 {dimension_numbers = #tpu.dot_dimension_numbers<[1], [0], [0], [1], [0, 0, 1, 1], [], []>} : vector<16x16xf32>, vector<16x16xf32>, vector<16x16xf32> -> vector<16x16xf32>
    %91 = arith.addf %87, %90 : vector<16x16xf32>
    %92 = arith.addf %4, %91 : vector<16x16xf32>
    %c99 = arith.constant 99 : index
    %c0_41 = arith.constant 0 : index
    %93 = vector.load %arg2[%c99, %c0_41] : memref<104x96xf32, #tpu.memory_space<vmem>>, vector<1x16xf32>
    %c100 = arith.constant 100 : index
    %c0_42 = arith.constant 0 : index
    %94 = vector.load %arg2[%c100, %c0_42] : memref<104x96xf32, #tpu.memory_space<vmem>>, vector<1x16xf32>
    %cst_43 = arith.constant dense<0.000000e+00> : vector<16xf32>
    %95 = vector.multi_reduction <add>, %92, %cst_43 [1] : vector<16x16xf32> to vector<16xf32>
    %96 = vector.shape_cast %95 : vector<16xf32> to vector<16x1xf32>
    %cst_44 = arith.constant 1.600000e+01 : f32
    %97 = vector.broadcast %cst_44 : f32 to vector<16x1xf32>
    %98 = arith.divf %96, %97 : vector<16x1xf32>
    %99 = vector.broadcast %98 : vector<16x1xf32> to vector<16x16xf32>
    %100 = arith.subf %92, %99 : vector<16x16xf32>
    %101 = arith.mulf %100, %100 : vector<16x16xf32>
    %cst_45 = arith.constant dense<0.000000e+00> : vector<16xf32>
    %102 = vector.multi_reduction <add>, %101, %cst_45 [1] : vector<16x16xf32> to vector<16xf32>
    %103 = vector.shape_cast %102 : vector<16xf32> to vector<16x1xf32>
    %cst_46 = arith.constant 1.600000e+01 : f32
    %104 = vector.broadcast %cst_46 : f32 to vector<16x1xf32>
    %105 = arith.divf %103, %104 : vector<16x1xf32>
    %106 = vector.broadcast %98 : vector<16x1xf32> to vector<16x16xf32>
    %107 = arith.subf %92, %106 : vector<16x16xf32>
    %cst_47 = arith.constant 9.99999974E-6 : f32
    %108 = vector.broadcast %cst_47 : f32 to vector<16x1xf32>
    %109 = arith.addf %105, %108 : vector<16x1xf32>
    %110 = math.rsqrt %109 : vector<16x1xf32>
    %111 = vector.broadcast %110 : vector<16x1xf32> to vector<16x16xf32>
    %112 = arith.mulf %107, %111 : vector<16x16xf32>
    %113 = vector.broadcast %93 : vector<1x16xf32> to vector<16x16xf32>
    %114 = arith.mulf %112, %113 : vector<16x16xf32>
    %115 = vector.broadcast %94 : vector<1x16xf32> to vector<16x16xf32>
    %116 = arith.addf %114, %115 : vector<16x16xf32>
    %c16_48 = arith.constant 16 : index
    %c0_49 = arith.constant 0 : index
    %117 = vector.load %arg2[%c16_48, %c0_49] : memref<104x96xf32, #tpu.memory_space<vmem>>, vector<16x32xf32>
    %cst_50 = arith.constant dense<0.000000e+00> : vector<16x32xf32>
    %118 = tpu.matmul %116, %117, %cst_50 {dimension_numbers = #tpu.dot_dimension_numbers<[1], [0], [0], [1], [0, 0, 1, 1], [], []>} : vector<16x16xf32>, vector<16x32xf32>, vector<16x32xf32> -> vector<16x32xf32>
    %c97 = arith.constant 97 : index
    %c0_51 = arith.constant 0 : index
    %119 = vector.load %arg2[%c97, %c0_51] : memref<104x96xf32, #tpu.memory_space<vmem>>, vector<1x32xf32>
    %120 = vector.broadcast %119 : vector<1x32xf32> to vector<16x32xf32>
    %121 = arith.addf %118, %120 : vector<16x32xf32>
    %cst_52 = arith.constant 5.000000e-01 : f32
    %122 = vector.broadcast %cst_52 : f32 to vector<16x32xf32>
    %123 = arith.mulf %122, %121 : vector<16x32xf32>
    %cst_53 = arith.constant 0.707106769 : f32
    %124 = vector.broadcast %cst_53 : f32 to vector<16x32xf32>
    %125 = arith.mulf %121, %124 : vector<16x32xf32>
    %126 = math.absf %125 : vector<16x32xf32>
    %cst_54 = arith.constant 0.327591091 : f32
    %127 = vector.broadcast %cst_54 : f32 to vector<16x32xf32>
    %128 = arith.mulf %127, %126 : vector<16x32xf32>
    %cst_55 = arith.constant 1.000000e+00 : f32
    %129 = vector.broadcast %cst_55 : f32 to vector<16x32xf32>
    %130 = arith.addf %129, %128 : vector<16x32xf32>
    %131 = tpu.reciprocal %130 {approx = true} : vector<16x32xf32> -> vector<16x32xf32>
    %cst_56 = arith.constant 1.06140542 : f32
    %132 = vector.broadcast %cst_56 : f32 to vector<16x32xf32>
    %133 = arith.mulf %132, %131 : vector<16x32xf32>
    %cst_57 = arith.constant -1.45315206 : f32
    %134 = vector.broadcast %cst_57 : f32 to vector<16x32xf32>
    %135 = arith.addf %133, %134 : vector<16x32xf32>
    %136 = arith.mulf %135, %131 : vector<16x32xf32>
    %cst_58 = arith.constant 1.42141378 : f32
    %137 = vector.broadcast %cst_58 : f32 to vector<16x32xf32>
    %138 = arith.addf %136, %137 : vector<16x32xf32>
    %139 = arith.mulf %138, %131 : vector<16x32xf32>
    %cst_59 = arith.constant -0.284496725 : f32
    %140 = vector.broadcast %cst_59 : f32 to vector<16x32xf32>
    %141 = arith.addf %139, %140 : vector<16x32xf32>
    %142 = arith.mulf %141, %131 : vector<16x32xf32>
    %cst_60 = arith.constant 0.254829586 : f32
    %143 = vector.broadcast %cst_60 : f32 to vector<16x32xf32>
    %144 = arith.addf %142, %143 : vector<16x32xf32>
    %145 = arith.mulf %144, %131 : vector<16x32xf32>
    %cst_61 = arith.constant 0.000000e+00 : f32
    %146 = vector.broadcast %cst_61 : f32 to vector<16x32xf32>
    %147 = arith.subf %146, %126 : vector<16x32xf32>
    %148 = arith.mulf %147, %126 : vector<16x32xf32>
    %149 = math.exp %148 : vector<16x32xf32>
    %150 = arith.mulf %145, %149 : vector<16x32xf32>
    %cst_62 = arith.constant 1.000000e+00 : f32
    %151 = vector.broadcast %cst_62 : f32 to vector<16x32xf32>
    %152 = arith.subf %151, %150 : vector<16x32xf32>
    %cst_63 = arith.constant 0.000000e+00 : f32
    %153 = vector.broadcast %cst_63 : f32 to vector<16x32xf32>
    %154 = arith.cmpf oge, %125, %153 : vector<16x32xf32>
    %cst_64 = arith.constant 0.000000e+00 : f32
    %155 = vector.broadcast %cst_64 : f32 to vector<16x32xf32>
    %156 = arith.subf %155, %152 : vector<16x32xf32>
    %157 = arith.select %154, %152, %156 : vector<16x32xi1>, vector<16x32xf32>
    %cst_65 = arith.constant 1.000000e+00 : f32
    %158 = vector.broadcast %cst_65 : f32 to vector<16x32xf32>
    %159 = arith.addf %158, %157 : vector<16x32xf32>
    %160 = arith.mulf %123, %159 : vector<16x32xf32>
    %c64 = arith.constant 64 : index
    %c0_66 = arith.constant 0 : index
    %161 = vector.load %arg2[%c64, %c0_66] : memref<104x96xf32, #tpu.memory_space<vmem>>, vector<32x16xf32>
    %cst_67 = arith.constant dense<0.000000e+00> : vector<16x16xf32>
    %162 = tpu.matmul %160, %161, %cst_67 {dimension_numbers = #tpu.dot_dimension_numbers<[1], [0], [0], [1], [0, 0, 1, 1], [], []>} : vector<16x32xf32>, vector<32x16xf32>, vector<16x16xf32> -> vector<16x16xf32>
    %163 = arith.addf %116, %162 : vector<16x16xf32>
    %c101 = arith.constant 101 : index
    %c0_68 = arith.constant 0 : index
    %164 = vector.load %arg2[%c101, %c0_68] : memref<104x96xf32, #tpu.memory_space<vmem>>, vector<1x16xf32>
    %165 = vector.broadcast %164 : vector<1x16xf32> to vector<16x16xf32>
    %166 = arith.addf %163, %165 : vector<16x16xf32>
    %c102 = arith.constant 102 : index
    %c0_69 = arith.constant 0 : index
    %167 = vector.load %arg2[%c102, %c0_69] : memref<104x96xf32, #tpu.memory_space<vmem>>, vector<1x16xf32>
    %c103 = arith.constant 103 : index
    %c0_70 = arith.constant 0 : index
    %168 = vector.load %arg2[%c103, %c0_70] : memref<104x96xf32, #tpu.memory_space<vmem>>, vector<1x16xf32>
    %cst_71 = arith.constant dense<0.000000e+00> : vector<16xf32>
    %169 = vector.multi_reduction <add>, %166, %cst_71 [1] : vector<16x16xf32> to vector<16xf32>
    %170 = vector.shape_cast %169 : vector<16xf32> to vector<16x1xf32>
    %cst_72 = arith.constant 1.600000e+01 : f32
    %171 = vector.broadcast %cst_72 : f32 to vector<16x1xf32>
    %172 = arith.divf %170, %171 : vector<16x1xf32>
    %173 = vector.broadcast %172 : vector<16x1xf32> to vector<16x16xf32>
    %174 = arith.subf %166, %173 : vector<16x16xf32>
    %175 = arith.mulf %174, %174 : vector<16x16xf32>
    %cst_73 = arith.constant dense<0.000000e+00> : vector<16xf32>
    %176 = vector.multi_reduction <add>, %175, %cst_73 [1] : vector<16x16xf32> to vector<16xf32>
    %177 = vector.shape_cast %176 : vector<16xf32> to vector<16x1xf32>
    %cst_74 = arith.constant 1.600000e+01 : f32
    %178 = vector.broadcast %cst_74 : f32 to vector<16x1xf32>
    %179 = arith.divf %177, %178 : vector<16x1xf32>
    %180 = vector.broadcast %172 : vector<16x1xf32> to vector<16x16xf32>
    %181 = arith.subf %166, %180 : vector<16x16xf32>
    %cst_75 = arith.constant 9.99999974E-6 : f32
    %182 = vector.broadcast %cst_75 : f32 to vector<16x1xf32>
    %183 = arith.addf %179, %182 : vector<16x1xf32>
    %184 = math.rsqrt %183 : vector<16x1xf32>
    %185 = vector.broadcast %184 : vector<16x1xf32> to vector<16x16xf32>
    %186 = arith.mulf %181, %185 : vector<16x16xf32>
    %187 = vector.broadcast %167 : vector<1x16xf32> to vector<16x16xf32>
    %188 = arith.mulf %186, %187 : vector<16x16xf32>
    %189 = vector.broadcast %168 : vector<1x16xf32> to vector<16x16xf32>
    %190 = arith.addf %188, %189 : vector<16x16xf32>
    %c0_76 = arith.constant 0 : index
    %c0_77 = arith.constant 0 : index
    %191 = vector.load %arg7[%c0_76, %c0_77] : memref<16x16xf32, #tpu.memory_space<vmem>>, vector<16x16xf32>
    tpu.vector_store %arg7[%c0_76, %c0_77], %190 {strides = array<i32>} : memref<16x16xf32, #tpu.memory_space<vmem>>, vector<16x16xf32>,
    %c0_78 = arith.constant 0 : index
    %c0_79 = arith.constant 0 : index
    %c0_80 = arith.constant 0 : index
    %192 = vector.load %arg1[%c0_78, %c0_79, %c0_80] : memref<2x8x16xf32, #tpu.memory_space<vmem>>, vector<1x8x16xf32>
    %193 = vector.shape_cast %192 : vector<1x8x16xf32> to vector<8x16xf32>
    %194 = tpu.transpose %193, [1, 0] : vector<8x16xf32> -> vector<16x8xf32>
    %c1_81 = arith.constant 1 : index
    %c0_82 = arith.constant 0 : index
    %c0_83 = arith.constant 0 : index
    %195 = vector.load %arg1[%c1_81, %c0_82, %c0_83] : memref<2x8x16xf32, #tpu.memory_space<vmem>>, vector<1x8x16xf32>
    %196 = vector.shape_cast %195 : vector<1x8x16xf32> to vector<8x16xf32>
    %197 = tpu.transpose %196, [1, 0] : vector<8x16xf32> -> vector<16x8xf32>
    %198 = tpu.concatenate %194, %197 in 0 : vector<16x8xf32>, vector<16x8xf32> -> vector<32x8xf32>
    %c0_84 = arith.constant 0 : index
    %c0_85 = arith.constant 0 : index
    %199 = vector.load %arg3[%c0_84, %c0_85] : memref<88x96xf32, #tpu.memory_space<vmem>>, vector<8x96xf32>
    %cst_86 = arith.constant dense<0.000000e+00> : vector<32x96xf32>
    %200 = tpu.matmul %198, %199, %cst_86 {dimension_numbers = #tpu.dot_dimension_numbers<[1], [0], [0], [1], [0, 0, 1, 1], [], []>} : vector<32x8xf32>, vector<8x96xf32>, vector<32x96xf32> -> vector<32x96xf32>
    %c80 = arith.constant 80 : index
    %c0_87 = arith.constant 0 : index
    %201 = vector.load %arg3[%c80, %c0_87] : memref<88x96xf32, #tpu.memory_space<vmem>>, vector<1x96xf32>
    %202 = vector.broadcast %201 : vector<1x96xf32> to vector<32x96xf32>
    %203 = arith.addf %200, %202 : vector<32x96xf32>
    %204 = vector.extract_strided_slice %203 {offsets = [0, 0], sizes = [16, 16], strides = [1, 1]} : vector<32x96xf32> to vector<16x16xf32>
    %205 = vector.extract_strided_slice %203 {offsets = [0, 32], sizes = [16, 16], strides = [1, 1]} : vector<32x96xf32> to vector<16x16xf32>
    %206 = vector.extract_strided_slice %203 {offsets = [0, 64], sizes = [16, 16], strides = [1, 1]} : vector<32x96xf32> to vector<16x16xf32>
    %cst_88 = arith.constant dense<0.000000e+00> : vector<16x16xf32>
    %207 = tpu.matmul %204, %205, %cst_88 {dimension_numbers = #tpu.dot_dimension_numbers<[1], [1], [0], [0], [0, 0, 1, 0], [], []>} : vector<16x16xf32>, vector<16x16xf32>, vector<16x16xf32> -> vector<16x16xf32>
    %cst_89 = arith.constant 2.500000e-01 : f32
    %208 = vector.broadcast %cst_89 : f32 to vector<16x16xf32>
    %209 = arith.mulf %207, %208 : vector<16x16xf32>
    %cst_90 = arith.constant dense<0xFF800000> : vector<16xf32>
    %210 = vector.multi_reduction <maximumf>, %209, %cst_90 [1] : vector<16x16xf32> to vector<16xf32>
    %211 = vector.shape_cast %210 : vector<16xf32> to vector<16x1xf32>
    %212 = vector.broadcast %211 : vector<16x1xf32> to vector<16x16xf32>
    %213 = arith.subf %209, %212 : vector<16x16xf32>
    %214 = math.exp %213 : vector<16x16xf32>
    %cst_91 = arith.constant dense<0.000000e+00> : vector<16xf32>
    %215 = vector.multi_reduction <add>, %214, %cst_91 [1] : vector<16x16xf32> to vector<16xf32>
    %216 = vector.shape_cast %215 : vector<16xf32> to vector<16x1xf32>
    %217 = tpu.reciprocal %216 {approx = true} : vector<16x1xf32> -> vector<16x1xf32>
    %218 = vector.broadcast %217 : vector<16x1xf32> to vector<16x16xf32>
    %219 = arith.mulf %214, %218 : vector<16x16xf32>
    %cst_92 = arith.constant dense<0.000000e+00> : vector<16x16xf32>
    %220 = tpu.matmul %219, %206, %cst_92 {dimension_numbers = #tpu.dot_dimension_numbers<[1], [0], [0], [1], [0, 0, 1, 1], [], []>} : vector<16x16xf32>, vector<16x16xf32>, vector<16x16xf32> -> vector<16x16xf32>
    %c0_93 = arith.constant 0 : index
    %c0_94 = arith.constant 0 : index
    %221 = vector.load %arg6[%c0_93, %c0_94] : memref<64x16xf32, #tpu.memory_space<vmem>>, vector<16x16xf32>
    tpu.vector_store %arg6[%c0_93, %c0_94], %220 {strides = array<i32>} : memref<64x16xf32, #tpu.memory_space<vmem>>, vector<16x16xf32>,
    %222 = vector.extract_strided_slice %203 {offsets = [0, 16], sizes = [16, 16], strides = [1, 1]} : vector<32x96xf32> to vector<16x16xf32>
    %223 = vector.extract_strided_slice %203 {offsets = [0, 48], sizes = [16, 16], strides = [1, 1]} : vector<32x96xf32> to vector<16x16xf32>
    %224 = vector.extract_strided_slice %203 {offsets = [0, 80], sizes = [16, 16], strides = [1, 1]} : vector<32x96xf32> to vector<16x16xf32>
    %cst_95 = arith.constant dense<0.000000e+00> : vector<16x16xf32>
    %225 = tpu.matmul %222, %223, %cst_95 {dimension_numbers = #tpu.dot_dimension_numbers<[1], [1], [0], [0], [0, 0, 1, 0], [], []>} : vector<16x16xf32>, vector<16x16xf32>, vector<16x16xf32> -> vector<16x16xf32>
    %cst_96 = arith.constant 2.500000e-01 : f32
    %226 = vector.broadcast %cst_96 : f32 to vector<16x16xf32>
    %227 = arith.mulf %225, %226 : vector<16x16xf32>
    %cst_97 = arith.constant dense<0xFF800000> : vector<16xf32>
    %228 = vector.multi_reduction <maximumf>, %227, %cst_97 [1] : vector<16x16xf32> to vector<16xf32>
    %229 = vector.shape_cast %228 : vector<16xf32> to vector<16x1xf32>
    %230 = vector.broadcast %229 : vector<16x1xf32> to vector<16x16xf32>
    %231 = arith.subf %227, %230 : vector<16x16xf32>
    %232 = math.exp %231 : vector<16x16xf32>
    %cst_98 = arith.constant dense<0.000000e+00> : vector<16xf32>
    %233 = vector.multi_reduction <add>, %232, %cst_98 [1] : vector<16x16xf32> to vector<16xf32>
    %234 = vector.shape_cast %233 : vector<16xf32> to vector<16x1xf32>
    %235 = tpu.reciprocal %234 {approx = true} : vector<16x1xf32> -> vector<16x1xf32>
    %236 = vector.broadcast %235 : vector<16x1xf32> to vector<16x16xf32>
    %237 = arith.mulf %232, %236 : vector<16x16xf32>
    %cst_99 = arith.constant dense<0.000000e+00> : vector<16x16xf32>
    %238 = tpu.matmul %237, %224, %cst_99 {dimension_numbers = #tpu.dot_dimension_numbers<[1], [0], [0], [1], [0, 0, 1, 1], [], []>} : vector<16x16xf32>, vector<16x16xf32>, vector<16x16xf32> -> vector<16x16xf32>
    %c16_100 = arith.constant 16 : index
    %c0_101 = arith.constant 0 : index
    %239 = vector.load %arg6[%c16_100, %c0_101] : memref<64x16xf32, #tpu.memory_space<vmem>>, vector<16x16xf32>
    tpu.vector_store %arg6[%c16_100, %c0_101], %238 {strides = array<i32>} : memref<64x16xf32, #tpu.memory_space<vmem>>, vector<16x16xf32>,
    %240 = vector.extract_strided_slice %203 {offsets = [16, 0], sizes = [16, 16], strides = [1, 1]} : vector<32x96xf32> to vector<16x16xf32>
    %241 = vector.extract_strided_slice %203 {offsets = [16, 32], sizes = [16, 16], strides = [1, 1]} : vector<32x96xf32> to vector<16x16xf32>
    %242 = vector.extract_strided_slice %203 {offsets = [16, 64], sizes = [16, 16], strides = [1, 1]} : vector<32x96xf32> to vector<16x16xf32>
    %cst_102 = arith.constant dense<0.000000e+00> : vector<16x16xf32>
    %243 = tpu.matmul %240, %241, %cst_102 {dimension_numbers = #tpu.dot_dimension_numbers<[1], [1], [0], [0], [0, 0, 1, 0], [], []>} : vector<16x16xf32>, vector<16x16xf32>, vector<16x16xf32> -> vector<16x16xf32>
    %cst_103 = arith.constant 2.500000e-01 : f32
    %244 = vector.broadcast %cst_103 : f32 to vector<16x16xf32>
    %245 = arith.mulf %243, %244 : vector<16x16xf32>
    %cst_104 = arith.constant dense<0xFF800000> : vector<16xf32>
    %246 = vector.multi_reduction <maximumf>, %245, %cst_104 [1] : vector<16x16xf32> to vector<16xf32>
    %247 = vector.shape_cast %246 : vector<16xf32> to vector<16x1xf32>
    %248 = vector.broadcast %247 : vector<16x1xf32> to vector<16x16xf32>
    %249 = arith.subf %245, %248 : vector<16x16xf32>
    %250 = math.exp %249 : vector<16x16xf32>
    %cst_105 = arith.constant dense<0.000000e+00> : vector<16xf32>
    %251 = vector.multi_reduction <add>, %250, %cst_105 [1] : vector<16x16xf32> to vector<16xf32>
    %252 = vector.shape_cast %251 : vector<16xf32> to vector<16x1xf32>
    %253 = tpu.reciprocal %252 {approx = true} : vector<16x1xf32> -> vector<16x1xf32>
    %254 = vector.broadcast %253 : vector<16x1xf32> to vector<16x16xf32>
    %255 = arith.mulf %250, %254 : vector<16x16xf32>
    %cst_106 = arith.constant dense<0.000000e+00> : vector<16x16xf32>
    %256 = tpu.matmul %255, %242, %cst_106 {dimension_numbers = #tpu.dot_dimension_numbers<[1], [0], [0], [1], [0, 0, 1, 1], [], []>} : vector<16x16xf32>, vector<16x16xf32>, vector<16x16xf32> -> vector<16x16xf32>
    %c32_107 = arith.constant 32 : index
    %c0_108 = arith.constant 0 : index
    %257 = vector.load %arg6[%c32_107, %c0_108] : memref<64x16xf32, #tpu.memory_space<vmem>>, vector<16x16xf32>
    tpu.vector_store %arg6[%c32_107, %c0_108], %256 {strides = array<i32>} : memref<64x16xf32, #tpu.memory_space<vmem>>, vector<16x16xf32>,
    %258 = vector.extract_strided_slice %203 {offsets = [16, 16], sizes = [16, 16], strides = [1, 1]} : vector<32x96xf32> to vector<16x16xf32>
    %259 = vector.extract_strided_slice %203 {offsets = [16, 48], sizes = [16, 16], strides = [1, 1]} : vector<32x96xf32> to vector<16x16xf32>
    %260 = vector.extract_strided_slice %203 {offsets = [16, 80], sizes = [16, 16], strides = [1, 1]} : vector<32x96xf32> to vector<16x16xf32>
    %cst_109 = arith.constant dense<0.000000e+00> : vector<16x16xf32>
    %261 = tpu.matmul %258, %259, %cst_109 {dimension_numbers = #tpu.dot_dimension_numbers<[1], [1], [0], [0], [0, 0, 1, 0], [], []>} : vector<16x16xf32>, vector<16x16xf32>, vector<16x16xf32> -> vector<16x16xf32>
    %cst_110 = arith.constant 2.500000e-01 : f32
    %262 = vector.broadcast %cst_110 : f32 to vector<16x16xf32>
    %263 = arith.mulf %261, %262 : vector<16x16xf32>
    %cst_111 = arith.constant dense<0xFF800000> : vector<16xf32>
    %264 = vector.multi_reduction <maximumf>, %263, %cst_111 [1] : vector<16x16xf32> to vector<16xf32>
    %265 = vector.shape_cast %264 : vector<16xf32> to vector<16x1xf32>
    %266 = vector.broadcast %265 : vector<16x1xf32> to vector<16x16xf32>
    %267 = arith.subf %263, %266 : vector<16x16xf32>
    %268 = math.exp %267 : vector<16x16xf32>
    %cst_112 = arith.constant dense<0.000000e+00> : vector<16xf32>
    %269 = vector.multi_reduction <add>, %268, %cst_112 [1] : vector<16x16xf32> to vector<16xf32>
    %270 = vector.shape_cast %269 : vector<16xf32> to vector<16x1xf32>
    %271 = tpu.reciprocal %270 {approx = true} : vector<16x1xf32> -> vector<16x1xf32>
    %272 = vector.broadcast %271 : vector<16x1xf32> to vector<16x16xf32>
    %273 = arith.mulf %268, %272 : vector<16x16xf32>
    %cst_113 = arith.constant dense<0.000000e+00> : vector<16x16xf32>
    %274 = tpu.matmul %273, %260, %cst_113 {dimension_numbers = #tpu.dot_dimension_numbers<[1], [0], [0], [1], [0, 0, 1, 1], [], []>} : vector<16x16xf32>, vector<16x16xf32>, vector<16x16xf32> -> vector<16x16xf32>
    %c48_114 = arith.constant 48 : index
    %c0_115 = arith.constant 0 : index
    %275 = vector.load %arg6[%c48_114, %c0_115] : memref<64x16xf32, #tpu.memory_space<vmem>>, vector<16x16xf32>
    tpu.vector_store %arg6[%c48_114, %c0_115], %274 {strides = array<i32>} : memref<64x16xf32, #tpu.memory_space<vmem>>, vector<16x16xf32>,
    %c82 = arith.constant 82 : index
    %c0_116 = arith.constant 0 : index
    %276 = vector.load %arg3[%c82, %c0_116] : memref<88x96xf32, #tpu.memory_space<vmem>>, vector<1x8xf32>
    %c0_117 = arith.constant 0 : index
    %c0_118 = arith.constant 0 : index
    %277 = tpu.strided_load %arg6[%c0_117, %c0_118] {strides = array<i32: 2, 1>} : memref<64x16xf32, #tpu.memory_space<vmem>>, vector<32x16xf32>
    %c16_119 = arith.constant 16 : index
    %c0_120 = arith.constant 0 : index
    %278 = vector.load %arg3[%c16_119, %c0_120] : memref<88x96xf32, #tpu.memory_space<vmem>>, vector<16x8xf32>
    %cst_121 = arith.constant dense<0.000000e+00> : vector<32x8xf32>
    %279 = tpu.matmul %277, %278, %cst_121 {dimension_numbers = #tpu.dot_dimension_numbers<[1], [0], [0], [1], [0, 0, 1, 1], [], []>} : vector<32x16xf32>, vector<16x8xf32>, vector<32x8xf32> -> vector<32x8xf32>
    %280 = vector.broadcast %276 : vector<1x8xf32> to vector<32x8xf32>
    %281 = arith.addf %280, %279 : vector<32x8xf32>
    %c1_122 = arith.constant 1 : index
    %c0_123 = arith.constant 0 : index
    %282 = tpu.strided_load %arg6[%c1_122, %c0_123] {strides = array<i32: 2, 1>} : memref<64x16xf32, #tpu.memory_space<vmem>>, vector<32x16xf32>
    %c32_124 = arith.constant 32 : index
    %c0_125 = arith.constant 0 : index
    %283 = vector.load %arg3[%c32_124, %c0_125] : memref<88x96xf32, #tpu.memory_space<vmem>>, vector<16x8xf32>
    %cst_126 = arith.constant dense<0.000000e+00> : vector<32x8xf32>
    %284 = tpu.matmul %282, %283, %cst_126 {dimension_numbers = #tpu.dot_dimension_numbers<[1], [0], [0], [1], [0, 0, 1, 1], [], []>} : vector<32x16xf32>, vector<16x8xf32>, vector<32x8xf32> -> vector<32x8xf32>
    %285 = arith.addf %281, %284 : vector<32x8xf32>
    %286 = arith.addf %198, %285 : vector<32x8xf32>
    %c83 = arith.constant 83 : index
    %c0_127 = arith.constant 0 : index
    %287 = vector.load %arg3[%c83, %c0_127] : memref<88x96xf32, #tpu.memory_space<vmem>>, vector<1x8xf32>
    %c84 = arith.constant 84 : index
    %c0_128 = arith.constant 0 : index
    %288 = vector.load %arg3[%c84, %c0_128] : memref<88x96xf32, #tpu.memory_space<vmem>>, vector<1x8xf32>
    %cst_129 = arith.constant dense<0.000000e+00> : vector<32xf32>
    %289 = vector.multi_reduction <add>, %286, %cst_129 [1] : vector<32x8xf32> to vector<32xf32>
    %290 = vector.shape_cast %289 : vector<32xf32> to vector<32x1xf32>
    %cst_130 = arith.constant 8.000000e+00 : f32
    %291 = vector.broadcast %cst_130 : f32 to vector<32x1xf32>
    %292 = arith.divf %290, %291 : vector<32x1xf32>
    %293 = vector.broadcast %292 : vector<32x1xf32> to vector<32x8xf32>
    %294 = arith.subf %286, %293 : vector<32x8xf32>
    %295 = arith.mulf %294, %294 : vector<32x8xf32>
    %cst_131 = arith.constant dense<0.000000e+00> : vector<32xf32>
    %296 = vector.multi_reduction <add>, %295, %cst_131 [1] : vector<32x8xf32> to vector<32xf32>
    %297 = vector.shape_cast %296 : vector<32xf32> to vector<32x1xf32>
    %cst_132 = arith.constant 8.000000e+00 : f32
    %298 = vector.broadcast %cst_132 : f32 to vector<32x1xf32>
    %299 = arith.divf %297, %298 : vector<32x1xf32>
    %300 = vector.broadcast %292 : vector<32x1xf32> to vector<32x8xf32>
    %301 = arith.subf %286, %300 : vector<32x8xf32>
    %cst_133 = arith.constant 9.99999974E-6 : f32
    %302 = vector.broadcast %cst_133 : f32 to vector<32x1xf32>
    %303 = arith.addf %299, %302 : vector<32x1xf32>
    %304 = math.rsqrt %303 : vector<32x1xf32>
    %305 = vector.broadcast %304 : vector<32x1xf32> to vector<32x8xf32>
    %306 = arith.mulf %301, %305 : vector<32x8xf32>
    %307 = vector.broadcast %287 : vector<1x8xf32> to vector<32x8xf32>
    %308 = arith.mulf %306, %307 : vector<32x8xf32>
    %309 = vector.broadcast %288 : vector<1x8xf32> to vector<32x8xf32>
    %310 = arith.addf %308, %309 : vector<32x8xf32>
    %c8_134 = arith.constant 8 : index
    %c0_135 = arith.constant 0 : index
    %311 = vector.load %arg3[%c8_134, %c0_135] : memref<88x96xf32, #tpu.memory_space<vmem>>, vector<8x32xf32>
    %cst_136 = arith.constant dense<0.000000e+00> : vector<32x32xf32>
    %312 = tpu.matmul %310, %311, %cst_136 {dimension_numbers = #tpu.dot_dimension_numbers<[1], [0], [0], [1], [0, 0, 1, 1], [], []>} : vector<32x8xf32>, vector<8x32xf32>, vector<32x32xf32> -> vector<32x32xf32>
    %c81 = arith.constant 81 : index
    %c0_137 = arith.constant 0 : index
    %313 = vector.load %arg3[%c81, %c0_137] : memref<88x96xf32, #tpu.memory_space<vmem>>, vector<1x32xf32>
    %314 = vector.broadcast %313 : vector<1x32xf32> to vector<32x32xf32>
    %315 = arith.addf %312, %314 : vector<32x32xf32>
    %cst_138 = arith.constant 5.000000e-01 : f32
    %316 = vector.broadcast %cst_138 : f32 to vector<32x32xf32>
    %317 = arith.mulf %316, %315 : vector<32x32xf32>
    %cst_139 = arith.constant 0.707106769 : f32
    %318 = vector.broadcast %cst_139 : f32 to vector<32x32xf32>
    %319 = arith.mulf %315, %318 : vector<32x32xf32>
    %320 = math.absf %319 : vector<32x32xf32>
    %cst_140 = arith.constant 0.327591091 : f32
    %321 = vector.broadcast %cst_140 : f32 to vector<32x32xf32>
    %322 = arith.mulf %321, %320 : vector<32x32xf32>
    %cst_141 = arith.constant 1.000000e+00 : f32
    %323 = vector.broadcast %cst_141 : f32 to vector<32x32xf32>
    %324 = arith.addf %323, %322 : vector<32x32xf32>
    %325 = tpu.reciprocal %324 {approx = true} : vector<32x32xf32> -> vector<32x32xf32>
    %cst_142 = arith.constant 1.06140542 : f32
    %326 = vector.broadcast %cst_142 : f32 to vector<32x32xf32>
    %327 = arith.mulf %326, %325 : vector<32x32xf32>
    %cst_143 = arith.constant -1.45315206 : f32
    %328 = vector.broadcast %cst_143 : f32 to vector<32x32xf32>
    %329 = arith.addf %327, %328 : vector<32x32xf32>
    %330 = arith.mulf %329, %325 : vector<32x32xf32>
    %cst_144 = arith.constant 1.42141378 : f32
    %331 = vector.broadcast %cst_144 : f32 to vector<32x32xf32>
    %332 = arith.addf %330, %331 : vector<32x32xf32>
    %333 = arith.mulf %332, %325 : vector<32x32xf32>
    %cst_145 = arith.constant -0.284496725 : f32
    %334 = vector.broadcast %cst_145 : f32 to vector<32x32xf32>
    %335 = arith.addf %333, %334 : vector<32x32xf32>
    %336 = arith.mulf %335, %325 : vector<32x32xf32>
    %cst_146 = arith.constant 0.254829586 : f32
    %337 = vector.broadcast %cst_146 : f32 to vector<32x32xf32>
    %338 = arith.addf %336, %337 : vector<32x32xf32>
    %339 = arith.mulf %338, %325 : vector<32x32xf32>
    %cst_147 = arith.constant 0.000000e+00 : f32
    %340 = vector.broadcast %cst_147 : f32 to vector<32x32xf32>
    %341 = arith.subf %340, %320 : vector<32x32xf32>
    %342 = arith.mulf %341, %320 : vector<32x32xf32>
    %343 = math.exp %342 : vector<32x32xf32>
    %344 = arith.mulf %339, %343 : vector<32x32xf32>
    %cst_148 = arith.constant 1.000000e+00 : f32
    %345 = vector.broadcast %cst_148 : f32 to vector<32x32xf32>
    %346 = arith.subf %345, %344 : vector<32x32xf32>
    %cst_149 = arith.constant 0.000000e+00 : f32
    %347 = vector.broadcast %cst_149 : f32 to vector<32x32xf32>
    %348 = arith.cmpf oge, %319, %347 : vector<32x32xf32>
    %cst_150 = arith.constant 0.000000e+00 : f32
    %349 = vector.broadcast %cst_150 : f32 to vector<32x32xf32>
    %350 = arith.subf %349, %346 : vector<32x32xf32>
    %351 = arith.select %348, %346, %350 : vector<32x32xi1>, vector<32x32xf32>
    %cst_151 = arith.constant 1.000000e+00 : f32
    %352 = vector.broadcast %cst_151 : f32 to vector<32x32xf32>
    %353 = arith.addf %352, %351 : vector<32x32xf32>
    %354 = arith.mulf %317, %353 : vector<32x32xf32>
    %c48_152 = arith.constant 48 : index
    %c0_153 = arith.constant 0 : index
    %355 = vector.load %arg3[%c48_152, %c0_153] : memref<88x96xf32, #tpu.memory_space<vmem>>, vector<32x8xf32>
    %cst_154 = arith.constant dense<0.000000e+00> : vector<32x8xf32>
    %356 = tpu.matmul %354, %355, %cst_154 {dimension_numbers = #tpu.dot_dimension_numbers<[1], [0], [0], [1], [0, 0, 1, 1], [], []>} : vector<32x32xf32>, vector<32x8xf32>, vector<32x8xf32> -> vector<32x8xf32>
    %357 = arith.addf %310, %356 : vector<32x8xf32>
    %c85 = arith.constant 85 : index
    %c0_155 = arith.constant 0 : index
    %358 = vector.load %arg3[%c85, %c0_155] : memref<88x96xf32, #tpu.memory_space<vmem>>, vector<1x8xf32>
    %359 = vector.broadcast %358 : vector<1x8xf32> to vector<32x8xf32>
    %360 = arith.addf %357, %359 : vector<32x8xf32>
    %c86 = arith.constant 86 : index
    %c0_156 = arith.constant 0 : index
    %361 = vector.load %arg3[%c86, %c0_156] : memref<88x96xf32, #tpu.memory_space<vmem>>, vector<1x8xf32>
    %c87 = arith.constant 87 : index
    %c0_157 = arith.constant 0 : index
    %362 = vector.load %arg3[%c87, %c0_157] : memref<88x96xf32, #tpu.memory_space<vmem>>, vector<1x8xf32>
    %cst_158 = arith.constant dense<0.000000e+00> : vector<32xf32>
    %363 = vector.multi_reduction <add>, %360, %cst_158 [1] : vector<32x8xf32> to vector<32xf32>
    %364 = vector.shape_cast %363 : vector<32xf32> to vector<32x1xf32>
    %cst_159 = arith.constant 8.000000e+00 : f32
    %365 = vector.broadcast %cst_159 : f32 to vector<32x1xf32>
    %366 = arith.divf %364, %365 : vector<32x1xf32>
    %367 = vector.broadcast %366 : vector<32x1xf32> to vector<32x8xf32>
    %368 = arith.subf %360, %367 : vector<32x8xf32>
    %369 = arith.mulf %368, %368 : vector<32x8xf32>
    %cst_160 = arith.constant dense<0.000000e+00> : vector<32xf32>
    %370 = vector.multi_reduction <add>, %369, %cst_160 [1] : vector<32x8xf32> to vector<32xf32>
    %371 = vector.shape_cast %370 : vector<32xf32> to vector<32x1xf32>
    %cst_161 = arith.constant 8.000000e+00 : f32
    %372 = vector.broadcast %cst_161 : f32 to vector<32x1xf32>
    %373 = arith.divf %371, %372 : vector<32x1xf32>
    %374 = vector.broadcast %366 : vector<32x1xf32> to vector<32x8xf32>
    %375 = arith.subf %360, %374 : vector<32x8xf32>
    %cst_162 = arith.constant 9.99999974E-6 : f32
    %376 = vector.broadcast %cst_162 : f32 to vector<32x1xf32>
    %377 = arith.addf %373, %376 : vector<32x1xf32>
    %378 = math.rsqrt %377 : vector<32x1xf32>
    %379 = vector.broadcast %378 : vector<32x1xf32> to vector<32x8xf32>
    %380 = arith.mulf %375, %379 : vector<32x8xf32>
    %381 = vector.broadcast %361 : vector<1x8xf32> to vector<32x8xf32>
    %382 = arith.mulf %380, %381 : vector<32x8xf32>
    %383 = vector.broadcast %362 : vector<1x8xf32> to vector<32x8xf32>
    %384 = arith.addf %382, %383 : vector<32x8xf32>
    %c0_163 = arith.constant 0 : index
    %c0_164 = arith.constant 0 : index
    %385 = vector.load %arg8[%c0_163, %c0_164] : memref<32x8xf32, #tpu.memory_space<vmem>>, vector<32x8xf32>
    tpu.vector_store %arg8[%c0_163, %c0_164], %384 {strides = array<i32>} : memref<32x8xf32, #tpu.memory_space<vmem>>, vector<32x8xf32>,
    %c256 = arith.constant 256 : index
    %c0_165 = arith.constant 0 : index
    %386 = vector.load %arg4[%c256, %c0_165] : memref<257x4xf32, #tpu.memory_space<vmem>>, vector<1x4xf32>
    %c0_166 = arith.constant 0 : index
    %c0_167 = arith.constant 0 : index
    %387 = tpu.strided_load %arg7[%c0_166, %c0_167] {strides = array<i32: 8, 1>} : memref<16x16xf32, #tpu.memory_space<vmem>>, vector<2x16xf32>
    %c0_168 = arith.constant 0 : index
    %c0_169 = arith.constant 0 : index
    %388 = vector.load %arg4[%c0_168, %c0_169] : memref<257x4xf32, #tpu.memory_space<vmem>>, vector<16x4xf32>
    %cst_170 = arith.constant dense<0.000000e+00> : vector<2x4xf32>
    %389 = tpu.matmul %387, %388, %cst_170 {dimension_numbers = #tpu.dot_dimension_numbers<[1], [0], [0], [1], [0, 0, 1, 1], [], []>} : vector<2x16xf32>, vector<16x4xf32>, vector<2x4xf32> -> vector<2x4xf32>
    %390 = vector.broadcast %386 : vector<1x4xf32> to vector<2x4xf32>
    %391 = arith.addf %390, %389 : vector<2x4xf32>
    %c1_171 = arith.constant 1 : index
    %c0_172 = arith.constant 0 : index
    %392 = tpu.strided_load %arg7[%c1_171, %c0_172] {strides = array<i32: 8, 1>} : memref<16x16xf32, #tpu.memory_space<vmem>>, vector<2x16xf32>
    %c16_173 = arith.constant 16 : index
    %c0_174 = arith.constant 0 : index
    %393 = vector.load %arg4[%c16_173, %c0_174] : memref<257x4xf32, #tpu.memory_space<vmem>>, vector<16x4xf32>
    %cst_175 = arith.constant dense<0.000000e+00> : vector<2x4xf32>
    %394 = tpu.matmul %392, %393, %cst_175 {dimension_numbers = #tpu.dot_dimension_numbers<[1], [0], [0], [1], [0, 0, 1, 1], [], []>} : vector<2x16xf32>, vector<16x4xf32>, vector<2x4xf32> -> vector<2x4xf32>
    %395 = arith.addf %391, %394 : vector<2x4xf32>
    %c2 = arith.constant 2 : index
    %c0_176 = arith.constant 0 : index
    %396 = tpu.strided_load %arg7[%c2, %c0_176] {strides = array<i32: 8, 1>} : memref<16x16xf32, #tpu.memory_space<vmem>>, vector<2x16xf32>
    %c32_177 = arith.constant 32 : index
    %c0_178 = arith.constant 0 : index
    %397 = vector.load %arg4[%c32_177, %c0_178] : memref<257x4xf32, #tpu.memory_space<vmem>>, vector<16x4xf32>
    %cst_179 = arith.constant dense<0.000000e+00> : vector<2x4xf32>
    %398 = tpu.matmul %396, %397, %cst_179 {dimension_numbers = #tpu.dot_dimension_numbers<[1], [0], [0], [1], [0, 0, 1, 1], [], []>} : vector<2x16xf32>, vector<16x4xf32>, vector<2x4xf32> -> vector<2x4xf32>
    %399 = arith.addf %395, %398 : vector<2x4xf32>
    %c3 = arith.constant 3 : index
    %c0_180 = arith.constant 0 : index
    %400 = tpu.strided_load %arg7[%c3, %c0_180] {strides = array<i32: 8, 1>} : memref<16x16xf32, #tpu.memory_space<vmem>>, vector<2x16xf32>
    %c48_181 = arith.constant 48 : index
    %c0_182 = arith.constant 0 : index
    %401 = vector.load %arg4[%c48_181, %c0_182] : memref<257x4xf32, #tpu.memory_space<vmem>>, vector<16x4xf32>
    %cst_183 = arith.constant dense<0.000000e+00> : vector<2x4xf32>
    %402 = tpu.matmul %400, %401, %cst_183 {dimension_numbers = #tpu.dot_dimension_numbers<[1], [0], [0], [1], [0, 0, 1, 1], [], []>} : vector<2x16xf32>, vector<16x4xf32>, vector<2x4xf32> -> vector<2x4xf32>
    %403 = arith.addf %399, %402 : vector<2x4xf32>
    %c4 = arith.constant 4 : index
    %c0_184 = arith.constant 0 : index
    %404 = tpu.strided_load %arg7[%c4, %c0_184] {strides = array<i32: 8, 1>} : memref<16x16xf32, #tpu.memory_space<vmem>>, vector<2x16xf32>
    %c64_185 = arith.constant 64 : index
    %c0_186 = arith.constant 0 : index
    %405 = vector.load %arg4[%c64_185, %c0_186] : memref<257x4xf32, #tpu.memory_space<vmem>>, vector<16x4xf32>
    %cst_187 = arith.constant dense<0.000000e+00> : vector<2x4xf32>
    %406 = tpu.matmul %404, %405, %cst_187 {dimension_numbers = #tpu.dot_dimension_numbers<[1], [0], [0], [1], [0, 0, 1, 1], [], []>} : vector<2x16xf32>, vector<16x4xf32>, vector<2x4xf32> -> vector<2x4xf32>
    %407 = arith.addf %403, %406 : vector<2x4xf32>
    %c5 = arith.constant 5 : index
    %c0_188 = arith.constant 0 : index
    %408 = tpu.strided_load %arg7[%c5, %c0_188] {strides = array<i32: 8, 1>} : memref<16x16xf32, #tpu.memory_space<vmem>>, vector<2x16xf32>
    %c80_189 = arith.constant 80 : index
    %c0_190 = arith.constant 0 : index
    %409 = vector.load %arg4[%c80_189, %c0_190] : memref<257x4xf32, #tpu.memory_space<vmem>>, vector<16x4xf32>
    %cst_191 = arith.constant dense<0.000000e+00> : vector<2x4xf32>
    %410 = tpu.matmul %408, %409, %cst_191 {dimension_numbers = #tpu.dot_dimension_numbers<[1], [0], [0], [1], [0, 0, 1, 1], [], []>} : vector<2x16xf32>, vector<16x4xf32>, vector<2x4xf32> -> vector<2x4xf32>
    %411 = arith.addf %407, %410 : vector<2x4xf32>
    %c6 = arith.constant 6 : index
    %c0_192 = arith.constant 0 : index
    %412 = tpu.strided_load %arg7[%c6, %c0_192] {strides = array<i32: 8, 1>} : memref<16x16xf32, #tpu.memory_space<vmem>>, vector<2x16xf32>
    %c96_193 = arith.constant 96 : index
    %c0_194 = arith.constant 0 : index
    %413 = vector.load %arg4[%c96_193, %c0_194] : memref<257x4xf32, #tpu.memory_space<vmem>>, vector<16x4xf32>
    %cst_195 = arith.constant dense<0.000000e+00> : vector<2x4xf32>
    %414 = tpu.matmul %412, %413, %cst_195 {dimension_numbers = #tpu.dot_dimension_numbers<[1], [0], [0], [1], [0, 0, 1, 1], [], []>} : vector<2x16xf32>, vector<16x4xf32>, vector<2x4xf32> -> vector<2x4xf32>
    %415 = arith.addf %411, %414 : vector<2x4xf32>
    %c7 = arith.constant 7 : index
    %c0_196 = arith.constant 0 : index
    %416 = tpu.strided_load %arg7[%c7, %c0_196] {strides = array<i32: 8, 1>} : memref<16x16xf32, #tpu.memory_space<vmem>>, vector<2x16xf32>
    %c112 = arith.constant 112 : index
    %c0_197 = arith.constant 0 : index
    %417 = vector.load %arg4[%c112, %c0_197] : memref<257x4xf32, #tpu.memory_space<vmem>>, vector<16x4xf32>
    %cst_198 = arith.constant dense<0.000000e+00> : vector<2x4xf32>
    %418 = tpu.matmul %416, %417, %cst_198 {dimension_numbers = #tpu.dot_dimension_numbers<[1], [0], [0], [1], [0, 0, 1, 1], [], []>} : vector<2x16xf32>, vector<16x4xf32>, vector<2x4xf32> -> vector<2x4xf32>
    %419 = arith.addf %415, %418 : vector<2x4xf32>
    %c0_199 = arith.constant 0 : index
    %c0_200 = arith.constant 0 : index
    %420 = tpu.strided_load %arg8[%c0_199, %c0_200] {strides = array<i32: 16, 1>} : memref<32x8xf32, #tpu.memory_space<vmem>>, vector<2x8xf32>
    %c128 = arith.constant 128 : index
    %c0_201 = arith.constant 0 : index
    %421 = vector.load %arg4[%c128, %c0_201] : memref<257x4xf32, #tpu.memory_space<vmem>>, vector<8x4xf32>
    %cst_202 = arith.constant dense<0.000000e+00> : vector<2x4xf32>
    %422 = tpu.matmul %420, %421, %cst_202 {dimension_numbers = #tpu.dot_dimension_numbers<[1], [0], [0], [1], [0, 0, 1, 1], [], []>} : vector<2x8xf32>, vector<8x4xf32>, vector<2x4xf32> -> vector<2x4xf32>
    %423 = arith.addf %419, %422 : vector<2x4xf32>
    %c1_203 = arith.constant 1 : index
    %c0_204 = arith.constant 0 : index
    %424 = tpu.strided_load %arg8[%c1_203, %c0_204] {strides = array<i32: 16, 1>} : memref<32x8xf32, #tpu.memory_space<vmem>>, vector<2x8xf32>
    %c136 = arith.constant 136 : index
    %c0_205 = arith.constant 0 : index
    %425 = vector.load %arg4[%c136, %c0_205] : memref<257x4xf32, #tpu.memory_space<vmem>>, vector<8x4xf32>
    %cst_206 = arith.constant dense<0.000000e+00> : vector<2x4xf32>
    %426 = tpu.matmul %424, %425, %cst_206 {dimension_numbers = #tpu.dot_dimension_numbers<[1], [0], [0], [1], [0, 0, 1, 1], [], []>} : vector<2x8xf32>, vector<8x4xf32>, vector<2x4xf32> -> vector<2x4xf32>
    %427 = arith.addf %423, %426 : vector<2x4xf32>
    %c2_207 = arith.constant 2 : index
    %c0_208 = arith.constant 0 : index
    %428 = tpu.strided_load %arg8[%c2_207, %c0_208] {strides = array<i32: 16, 1>} : memref<32x8xf32, #tpu.memory_space<vmem>>, vector<2x8xf32>
    %c144 = arith.constant 144 : index
    %c0_209 = arith.constant 0 : index
    %429 = vector.load %arg4[%c144, %c0_209] : memref<257x4xf32, #tpu.memory_space<vmem>>, vector<8x4xf32>
    %cst_210 = arith.constant dense<0.000000e+00> : vector<2x4xf32>
    %430 = tpu.matmul %428, %429, %cst_210 {dimension_numbers = #tpu.dot_dimension_numbers<[1], [0], [0], [1], [0, 0, 1, 1], [], []>} : vector<2x8xf32>, vector<8x4xf32>, vector<2x4xf32> -> vector<2x4xf32>
    %431 = arith.addf %427, %430 : vector<2x4xf32>
    %c3_211 = arith.constant 3 : index
    %c0_212 = arith.constant 0 : index
    %432 = tpu.strided_load %arg8[%c3_211, %c0_212] {strides = array<i32: 16, 1>} : memref<32x8xf32, #tpu.memory_space<vmem>>, vector<2x8xf32>
    %c152 = arith.constant 152 : index
    %c0_213 = arith.constant 0 : index
    %433 = vector.load %arg4[%c152, %c0_213] : memref<257x4xf32, #tpu.memory_space<vmem>>, vector<8x4xf32>
    %cst_214 = arith.constant dense<0.000000e+00> : vector<2x4xf32>
    %434 = tpu.matmul %432, %433, %cst_214 {dimension_numbers = #tpu.dot_dimension_numbers<[1], [0], [0], [1], [0, 0, 1, 1], [], []>} : vector<2x8xf32>, vector<8x4xf32>, vector<2x4xf32> -> vector<2x4xf32>
    %435 = arith.addf %431, %434 : vector<2x4xf32>
    %c4_215 = arith.constant 4 : index
    %c0_216 = arith.constant 0 : index
    %436 = tpu.strided_load %arg8[%c4_215, %c0_216] {strides = array<i32: 16, 1>} : memref<32x8xf32, #tpu.memory_space<vmem>>, vector<2x8xf32>
    %c160 = arith.constant 160 : index
    %c0_217 = arith.constant 0 : index
    %437 = vector.load %arg4[%c160, %c0_217] : memref<257x4xf32, #tpu.memory_space<vmem>>, vector<8x4xf32>
    %cst_218 = arith.constant dense<0.000000e+00> : vector<2x4xf32>
    %438 = tpu.matmul %436, %437, %cst_218 {dimension_numbers = #tpu.dot_dimension_numbers<[1], [0], [0], [1], [0, 0, 1, 1], [], []>} : vector<2x8xf32>, vector<8x4xf32>, vector<2x4xf32> -> vector<2x4xf32>
    %439 = arith.addf %435, %438 : vector<2x4xf32>
    %c5_219 = arith.constant 5 : index
    %c0_220 = arith.constant 0 : index
    %440 = tpu.strided_load %arg8[%c5_219, %c0_220] {strides = array<i32: 16, 1>} : memref<32x8xf32, #tpu.memory_space<vmem>>, vector<2x8xf32>
    %c168 = arith.constant 168 : index
    %c0_221 = arith.constant 0 : index
    %441 = vector.load %arg4[%c168, %c0_221] : memref<257x4xf32, #tpu.memory_space<vmem>>, vector<8x4xf32>
    %cst_222 = arith.constant dense<0.000000e+00> : vector<2x4xf32>
    %442 = tpu.matmul %440, %441, %cst_222 {dimension_numbers = #tpu.dot_dimension_numbers<[1], [0], [0], [1], [0, 0, 1, 1], [], []>} : vector<2x8xf32>, vector<8x4xf32>, vector<2x4xf32> -> vector<2x4xf32>
    %443 = arith.addf %439, %442 : vector<2x4xf32>
    %c6_223 = arith.constant 6 : index
    %c0_224 = arith.constant 0 : index
    %444 = tpu.strided_load %arg8[%c6_223, %c0_224] {strides = array<i32: 16, 1>} : memref<32x8xf32, #tpu.memory_space<vmem>>, vector<2x8xf32>
    %c176 = arith.constant 176 : index
    %c0_225 = arith.constant 0 : index
    %445 = vector.load %arg4[%c176, %c0_225] : memref<257x4xf32, #tpu.memory_space<vmem>>, vector<8x4xf32>
    %cst_226 = arith.constant dense<0.000000e+00> : vector<2x4xf32>
    %446 = tpu.matmul %444, %445, %cst_226 {dimension_numbers = #tpu.dot_dimension_numbers<[1], [0], [0], [1], [0, 0, 1, 1], [], []>} : vector<2x8xf32>, vector<8x4xf32>, vector<2x4xf32> -> vector<2x4xf32>
    %447 = arith.addf %443, %446 : vector<2x4xf32>
    %c7_227 = arith.constant 7 : index
    %c0_228 = arith.constant 0 : index
    %448 = tpu.strided_load %arg8[%c7_227, %c0_228] {strides = array<i32: 16, 1>} : memref<32x8xf32, #tpu.memory_space<vmem>>, vector<2x8xf32>
    %c184 = arith.constant 184 : index
    %c0_229 = arith.constant 0 : index
    %449 = vector.load %arg4[%c184, %c0_229] : memref<257x4xf32, #tpu.memory_space<vmem>>, vector<8x4xf32>
    %cst_230 = arith.constant dense<0.000000e+00> : vector<2x4xf32>
    %450 = tpu.matmul %448, %449, %cst_230 {dimension_numbers = #tpu.dot_dimension_numbers<[1], [0], [0], [1], [0, 0, 1, 1], [], []>} : vector<2x8xf32>, vector<8x4xf32>, vector<2x4xf32> -> vector<2x4xf32>
    %451 = arith.addf %447, %450 : vector<2x4xf32>
    %c8_231 = arith.constant 8 : index
    %c0_232 = arith.constant 0 : index
    %452 = tpu.strided_load %arg8[%c8_231, %c0_232] {strides = array<i32: 16, 1>} : memref<32x8xf32, #tpu.memory_space<vmem>>, vector<2x8xf32>
    %c192 = arith.constant 192 : index
    %c0_233 = arith.constant 0 : index
    %453 = vector.load %arg4[%c192, %c0_233] : memref<257x4xf32, #tpu.memory_space<vmem>>, vector<8x4xf32>
    %cst_234 = arith.constant dense<0.000000e+00> : vector<2x4xf32>
    %454 = tpu.matmul %452, %453, %cst_234 {dimension_numbers = #tpu.dot_dimension_numbers<[1], [0], [0], [1], [0, 0, 1, 1], [], []>} : vector<2x8xf32>, vector<8x4xf32>, vector<2x4xf32> -> vector<2x4xf32>
    %455 = arith.addf %451, %454 : vector<2x4xf32>
    %c9 = arith.constant 9 : index
    %c0_235 = arith.constant 0 : index
    %456 = tpu.strided_load %arg8[%c9, %c0_235] {strides = array<i32: 16, 1>} : memref<32x8xf32, #tpu.memory_space<vmem>>, vector<2x8xf32>
    %c200 = arith.constant 200 : index
    %c0_236 = arith.constant 0 : index
    %457 = vector.load %arg4[%c200, %c0_236] : memref<257x4xf32, #tpu.memory_space<vmem>>, vector<8x4xf32>
    %cst_237 = arith.constant dense<0.000000e+00> : vector<2x4xf32>
    %458 = tpu.matmul %456, %457, %cst_237 {dimension_numbers = #tpu.dot_dimension_numbers<[1], [0], [0], [1], [0, 0, 1, 1], [], []>} : vector<2x8xf32>, vector<8x4xf32>, vector<2x4xf32> -> vector<2x4xf32>
    %459 = arith.addf %455, %458 : vector<2x4xf32>
    %c10 = arith.constant 10 : index
    %c0_238 = arith.constant 0 : index
    %460 = tpu.strided_load %arg8[%c10, %c0_238] {strides = array<i32: 16, 1>} : memref<32x8xf32, #tpu.memory_space<vmem>>, vector<2x8xf32>
    %c208 = arith.constant 208 : index
    %c0_239 = arith.constant 0 : index
    %461 = vector.load %arg4[%c208, %c0_239] : memref<257x4xf32, #tpu.memory_space<vmem>>, vector<8x4xf32>
    %cst_240 = arith.constant dense<0.000000e+00> : vector<2x4xf32>
    %462 = tpu.matmul %460, %461, %cst_240 {dimension_numbers = #tpu.dot_dimension_numbers<[1], [0], [0], [1], [0, 0, 1, 1], [], []>} : vector<2x8xf32>, vector<8x4xf32>, vector<2x4xf32> -> vector<2x4xf32>
    %463 = arith.addf %459, %462 : vector<2x4xf32>
    %c11 = arith.constant 11 : index
    %c0_241 = arith.constant 0 : index
    %464 = tpu.strided_load %arg8[%c11, %c0_241] {strides = array<i32: 16, 1>} : memref<32x8xf32, #tpu.memory_space<vmem>>, vector<2x8xf32>
    %c216 = arith.constant 216 : index
    %c0_242 = arith.constant 0 : index
    %465 = vector.load %arg4[%c216, %c0_242] : memref<257x4xf32, #tpu.memory_space<vmem>>, vector<8x4xf32>
    %cst_243 = arith.constant dense<0.000000e+00> : vector<2x4xf32>
    %466 = tpu.matmul %464, %465, %cst_243 {dimension_numbers = #tpu.dot_dimension_numbers<[1], [0], [0], [1], [0, 0, 1, 1], [], []>} : vector<2x8xf32>, vector<8x4xf32>, vector<2x4xf32> -> vector<2x4xf32>
    %467 = arith.addf %463, %466 : vector<2x4xf32>
    %c12 = arith.constant 12 : index
    %c0_244 = arith.constant 0 : index
    %468 = tpu.strided_load %arg8[%c12, %c0_244] {strides = array<i32: 16, 1>} : memref<32x8xf32, #tpu.memory_space<vmem>>, vector<2x8xf32>
    %c224 = arith.constant 224 : index
    %c0_245 = arith.constant 0 : index
    %469 = vector.load %arg4[%c224, %c0_245] : memref<257x4xf32, #tpu.memory_space<vmem>>, vector<8x4xf32>
    %cst_246 = arith.constant dense<0.000000e+00> : vector<2x4xf32>
    %470 = tpu.matmul %468, %469, %cst_246 {dimension_numbers = #tpu.dot_dimension_numbers<[1], [0], [0], [1], [0, 0, 1, 1], [], []>} : vector<2x8xf32>, vector<8x4xf32>, vector<2x4xf32> -> vector<2x4xf32>
    %471 = arith.addf %467, %470 : vector<2x4xf32>
    %c13 = arith.constant 13 : index
    %c0_247 = arith.constant 0 : index
    %472 = tpu.strided_load %arg8[%c13, %c0_247] {strides = array<i32: 16, 1>} : memref<32x8xf32, #tpu.memory_space<vmem>>, vector<2x8xf32>
    %c232 = arith.constant 232 : index
    %c0_248 = arith.constant 0 : index
    %473 = vector.load %arg4[%c232, %c0_248] : memref<257x4xf32, #tpu.memory_space<vmem>>, vector<8x4xf32>
    %cst_249 = arith.constant dense<0.000000e+00> : vector<2x4xf32>
    %474 = tpu.matmul %472, %473, %cst_249 {dimension_numbers = #tpu.dot_dimension_numbers<[1], [0], [0], [1], [0, 0, 1, 1], [], []>} : vector<2x8xf32>, vector<8x4xf32>, vector<2x4xf32> -> vector<2x4xf32>
    %475 = arith.addf %471, %474 : vector<2x4xf32>
    %c14 = arith.constant 14 : index
    %c0_250 = arith.constant 0 : index
    %476 = tpu.strided_load %arg8[%c14, %c0_250] {strides = array<i32: 16, 1>} : memref<32x8xf32, #tpu.memory_space<vmem>>, vector<2x8xf32>
    %c240 = arith.constant 240 : index
    %c0_251 = arith.constant 0 : index
    %477 = vector.load %arg4[%c240, %c0_251] : memref<257x4xf32, #tpu.memory_space<vmem>>, vector<8x4xf32>
    %cst_252 = arith.constant dense<0.000000e+00> : vector<2x4xf32>
    %478 = tpu.matmul %476, %477, %cst_252 {dimension_numbers = #tpu.dot_dimension_numbers<[1], [0], [0], [1], [0, 0, 1, 1], [], []>} : vector<2x8xf32>, vector<8x4xf32>, vector<2x4xf32> -> vector<2x4xf32>
    %479 = arith.addf %475, %478 : vector<2x4xf32>
    %c15 = arith.constant 15 : index
    %c0_253 = arith.constant 0 : index
    %480 = tpu.strided_load %arg8[%c15, %c0_253] {strides = array<i32: 16, 1>} : memref<32x8xf32, #tpu.memory_space<vmem>>, vector<2x8xf32>
    %c248 = arith.constant 248 : index
    %c0_254 = arith.constant 0 : index
    %481 = vector.load %arg4[%c248, %c0_254] : memref<257x4xf32, #tpu.memory_space<vmem>>, vector<8x4xf32>
    %cst_255 = arith.constant dense<0.000000e+00> : vector<2x4xf32>
    %482 = tpu.matmul %480, %481, %cst_255 {dimension_numbers = #tpu.dot_dimension_numbers<[1], [0], [0], [1], [0, 0, 1, 1], [], []>} : vector<2x8xf32>, vector<8x4xf32>, vector<2x4xf32> -> vector<2x4xf32>
    %483 = arith.addf %479, %482 : vector<2x4xf32>
    %c0_256 = arith.constant 0 : index
    %c0_257 = arith.constant 0 : index
    %c0_258 = arith.constant 0 : index
    %484 = vector.load %arg5[%c0_256, %c0_257, %c0_258] : memref<1x2x4xf32, #tpu.memory_space<vmem>>, vector<1x2x4xf32>
    %485 = vector.shape_cast %484 : vector<1x2x4xf32> to vector<2x4xf32>
    %486 = vector.shape_cast %483 : vector<2x4xf32> to vector<1x2x4xf32>
    tpu.vector_store %arg5[%c0_256, %c0_257, %c0_258], %486 {strides = array<i32>} : memref<1x2x4xf32, #tpu.memory_space<vmem>>, vector<1x2x4xf32>,
    return
  }
  func.func @transform_0(%arg0: i32) -> (i32, i32, i32) {
    %c0_i32 = arith.constant 0 : i32
    %c0_i32_0 = arith.constant 0 : i32
    %c0_i32_1 = arith.constant 0 : i32
    return %arg0, %c0_i32, %c0_i32_0 : i32, i32, i32
  }
  func.func @transform_1(%arg0: i32) -> (i32, i32) {
    %c0_i32 = arith.constant 0 : i32
    %c0_i32_0 = arith.constant 0 : i32
    %c0_i32_1 = arith.constant 0 : i32
    return %c0_i32, %c0_i32_0 : i32, i32
  }
  func.func @transform_2(%arg0: i32) -> (i32, i32) {
    %c0_i32 = arith.constant 0 : i32
    %c0_i32_0 = arith.constant 0 : i32
    %c0_i32_1 = arith.constant 0 : i32
    return %c0_i32, %c0_i32_0 : i32, i32
  }
  func.func @transform_3(%arg0: i32) -> (i32, i32) {
    %c0_i32 = arith.constant 0 : i32
    %c0_i32_0 = arith.constant 0 : i32
    %c0_i32_1 = arith.constant 0 : i32
    return %c0_i32, %c0_i32_0 : i32, i32
  }
  func.func @transform_4(%arg0: i32) -> (i32, i32, i32) {
    %c0_i32 = arith.constant 0 : i32
    %c0_i32_0 = arith.constant 0 : i32
    %c0_i32_1 = arith.constant 0 : i32
    return %arg0, %c0_i32, %c0_i32_0 : i32, i32, i32
  }
}

</mosaic_0001>

<bundles_post_ra>
// kernel: tpu_custom_call.1
= control target key start
LH: loop header
LB: loop body
LE: loop exit
PB: predicated region body
PF: predicated region fallthrough
CT: control target
= control target key end

     0   :  { %9 = vsyncpa [#allocation6], 0  ;;  %s6901_s0 = inlined_call_operand.vmem [shape: f32[4,8,16], index: 0, kind: input, shape index: {}]   ;;  %s6902_s1 = inlined_call_operand.vmem [shape: f32[104,96], index: 1, kind: input, shape index: {}]   ;;  %s6903_s2 = inlined_call_operand.vmem [shape: f32[88,96], index: 2, kind: input, shape index: {}]   ;;  %s6904_s3 = inlined_call_operand.vmem [shape: f32[257,4], index: 3, kind: input, shape index: {}]   ;;  %s6905_s4 = inlined_call_operand.hbm [shape: f32[2,2,4], index: 4, kind: output, shape index: {}]  }
   0x1   :  { %11 = vsyncpa [#allocation6 + $0x1], 0  ;;  %s6108_s15 = smov 0   ;;  %s6110_s16 = smov 0  }
   0x2   :  { %s6112_s17 = smov 0   ;;  %s6114_s18 = smov 0  }
   0x3 LB: > { %s6129_s19 = sadd.s32 4294967295, %s6072_s18   ;;  %s5067_s20 = sadd.s32 4294967294, %s6072_s18   ;;  %s6072_s18 = sphi %s6114_s18, %s6913_s18   ;;  %s6068_s17 = sphi %s6112_s17, %s6912_s17   ;;  %s6064_s16 = sphi %s6110_s16, %s6911_s16   ;;  %s6060_s15 = sphi %s6108_s15, %s6910_s15  }
   0x4   : > { %s6133_s21 = sadd.s32 1, %s6072_s18   ;;  %s113_s22 = sadd.s32 1, %s6068_s17 }
   0x5   : > { %s110_s23 = ssub.s32 %s6072_s18, %s6133_s21  ;;  %p123_p0 = scmp.ne.s32.totalorder %s6068_s17, %s6064_s16 }
   0x6   : > { %p111_p1 = scmp.eq.s32.totalorder %s110_s23, 0  ;;  %p124_p2 = scmp.eq.s32.totalorder %s6129_s19, 1 }
   0x7   : > { %p129_p3 = scmp.ne.s32.totalorder %s6064_s16, %s6060_s15  ;;  %p130_p4 = scmp.eq.s32.totalorder %s5067_s20, 1 }
   0x8   : > { %s6144_s24 = scalar_select %p111_p1, %s6068_s17, %s113_s22  }
   0x9   : > { %p6146_p5 = por %p124_p2, %p123_p0  ;;  %p6150_p6 = por %p130_p4, %p129_p3 }
   0xa   : > { %p5070_p7 = scmp.ge.s32.totalorder %s6072_s18, 1  ;;  %p166_p8 = scmp.lt.s32.totalorder %s6072_s18, 3 }
   0xc   : > { %p167_p9 = pnand %p5070_p7, %p166_p8 }
   0xd   : > { %v201_v0 = vld [vmem:[%s6902_s1] sm:$0xff] (!%p167_p9)  ;;  %v202_v1 = vld [vmem:[%s6902_s1 + $0x8] sm:$0xff] (!%p167_p9)  ;;  %s5072_s5 = sshll.u32 (!%p167_p9), %s6129_s19, 1  ;;  %vm208_vm0 = vcmask (!%p167_p9), 130048   ;;  %v6074_v5 = vmov (!%p167_p9), 0.0   ;;  %vm6075_vm1 = vmmov (!%p167_p9), 0  }
   0xe   : > { %170 = sbr.rel (%p167_p9) target bundleno = 6689 (0x1a21), region = 36  ;;  %v5664_v2 = vpack.c.bf16 (!%p167_p9), %v202_v1, %v201_v0  ;;  %p193_p10 = scmp.lt.s32.totalorder (!%p167_p9), %s5072_s5, 3  ;;  %v5075_v6 = vld [vmem:[%s6902_s1 + $0x60] ss:$0 sm:$0xff] (!%p167_p9)  ;;  %vm368_vm2 = vcmask (!%p167_p9), 64512   ;;  %vm6298_vm3 = vmpackc.low (!%p167_p9), %vm208_vm0, %vm208_vm0  ;;  %vm1326_vm6 = vcmask (!%p167_p9), 261120  }
   0xf   : > { %s6076_s12 = smov (!%p167_p9), 64   ;;  %s6077_s13 = smov (!%p167_p9), 96   ;;  %vm4992_vm11 = vcmask (!%p167_p9), 25600  }
  0x10   : > { %5665 = vmatprep.subr.bf16.mxu0 (!%p167_p9), %v5664_v2  ;;  %s6078_s14 = smov (!%p167_p9), 80   ;;  %s6079_s20 = smov (!%p167_p9), 48  }
  0x11   : > { %5667 = vmatpush3.bf16.msra.mxu0 (!%p167_p9), %v5664_v2  ;;  %s6080_s22 = smov (!%p167_p9), 112  }
  0x12   : > { %5350 = vmatprep.subr.mxu0 (!%p167_p9), %v6074_v5 }
  0x15   : > { %s6915_s5 = smov (!%p193_p10, %s5072_s5), 3 }
  0x16   : > { %s5073_s6 = sshll.u32 %s6915_s5, 3 }
  0x17   : > { %s196_s9 = scalar_lea.vmem %s6901_s0, %s5073_s6 }
  0x18   : > { %v6166_v3 = vld [vmem:[%s196_s9] sm:$0xff]  ;;  %v6168_v4 = vld [vmem:[%s196_s9 + $0x8] sm:$0xff] }
  0x19   : > { %5347 = vmatprep.mubr.msk.f32.mxu0 %vm208_vm0, %v6166_v3 }
  0x1a   : > { %5348 = vmatmul.mubr.msk.f32.vlgmr.msra.gmra.mrb[0].mxu0 %vm208_vm0, %v6168_v4 }
  0x1b   : > { %5352 = vmatprep.mubr.msk.f32.mxu0 %vm6075_vm1, %v6074_v5 }
  0xed   : > { %v5349_v7 = vpop.f32.mrb[0].mxu0 }
  0xee   : > { %v6180_v8 = vadd.f32 %v5349_v7, %v5075_v6  ;;  %v281_v9 = vpop.f32.mrb[1].mxu0 }
  0xef   : > { %v282_v10 = vadd.f32 %v5075_v6, %v281_v9 }
  0xf1   : > { %380 = vrot.lane.b32.xlu1 %v282_v10, %s6076_s12  ;;  %291 = vrot.lane.b32.xlu0 %v282_v10, %s6077_s13 }
  0xf5   : > { %459 = vrot.lane.b32.xlu1 %v282_v10, %s6078_s14 }
 0x163   : > { %v292_v11 = vpop.permute.xlu0 %291  ;;  %v381_v12 = vpop.permute.xlu1 %380 }
 0x164   : > { %5351 = vmatpush3.xpose.msk.msra.mxu0 %vm208_vm0, %v292_v11 }
 0x165   : > { %5355 = vmatprep.subr.mxu0 %v6074_v5 }
 0x167   : > { %5353 = vmatmul.mubr.msk.f32.vlgmr.msra.gmra.mrb[2].mxu0 %vm208_vm0, %v282_v10  ;;  %v460_v22 = vpop.permute.xlu1 %459 }
 0x168   : > { %5356 = vmatpush3.msra.mxu0 %v381_v12  ;;  %5357 = vmatprep.mubr.msk.f32.mxu0 %vm6075_vm1, %v6074_v5 }
 0x169   : > { %5360 = vmatprep.subr.mxu0 %v6074_v5 }
 0x23a   : > { %v363_v13 = vpop.f32.mrb[2].mxu0 }
 0x23b   : > { %v367_v14 = vmul.f32 0.25, %v363_v13  ;;  %v5354_v15 = vpop.f32.mrb[3].mxu0 }
 0x23d   : > { %v369_v16 = vsel %vm368_vm2, %v367_v14, -inf }
 0x23e   : > { %370 = vmax.xlane.f32.xlu0 %v369_v16 }
 0x254   : > { %547 = vrot.lane.b32.xlu0 %v282_v10, %s6079_s20 }
 0x2cb   : > { %v371_v17 = vpop.xlane.xlu0 %370 }
 0x2cc   : > { %v372_v18 = vsub.f32 %v367_v14, %v371_v17  ;;  %v961_v17 = vld [vmem:[%s6902_s1 + $0x20] sm:$0xff] }
 0x2ce   : > { %v373_v19 = vmul.f32 1.442695, %v372_v18  ;;  %v1054_v18 = vld [vmem:[%s6902_s1 + $0x30] sm:$0xff] }
 0x2cf   : > { %v548_v27 = vpop.permute.xlu0 %547 }
 0x2d0   : > { %5914 = vpow2.f32 %v373_v19 }
 0x2da   : > { %v5915_v20 = vpop.eup %5914 }
 0x2db   : > { %v375_v21 = vsel %vm368_vm2, %v5915_v20, 0.0 }
 0x2dc   : > { %376 = vadd.xlane.f32.xlu1 %v375_v21 }
 0x2ed   : > { %457 = vrot.lane.b32.xlu1 %v282_v10, %s6080_s22 }
 0x369   : > { %v377_v23 = vpop.xlane.xlu1 %376 }
 0x36a   : > { %5916 = vrcp.f32 %v377_v23 }
 0x36d   : > { %v458_v26 = vpop.permute.xlu1 %457 }
 0x374   : > { %v5917_v24 = vpop.eup %5916 }
 0x375   : > { %v379_v25 = vmul.f32 %v5917_v24, %v5915_v20  ;;  %v1055_v20 = vld [vmem:[%s6902_s1 + $0x38] sm:$0xff] }
 0x376   : > { %v5672_v21 = vpack.c.bf16 %v1055_v20, %v1054_v18 }
 0x377   : > { %5358 = vmatmul.mubr.msk.f32.vlgmr.msra.gmra.mrb[4].mxu0 %vm368_vm2, %v379_v25 }
 0x378   : > { %5361 = vmatpush3.xpose.msk.msra.mxu0 %vm208_vm0, %v460_v22  ;;  %5362 = vmatprep.mubr.msk.f32.mxu0 %vm6075_vm1, %v6074_v5  ;;  %v1525_v22 = vld [vmem:[%s6903_s2] sm:$0xff] }
 0x379   : > { %5365 = vmatprep.subr.mxu0 %v6074_v5  ;;  %5673 = vmatprep.subr.bf16.mxu1 %v5672_v21 }
 0x37a   : > { %5675 = vmatpush3.bf16.msra.mxu1 %v5672_v21 }
 0x37b   : > { %5363 = vmatmul.mubr.msk.f32.vlgmr.msra.gmra.mrb[6].mxu0 %vm208_vm0, %v458_v26  ;;  %5422 = vmatprep.subr.mxu1 %v1525_v22 }
 0x37c   : > { %5366 = vmatpush3.msra.mxu0 %v548_v27  ;;  %5367 = vmatprep.mubr.msk.f32.mxu0 %vm6075_vm1, %v6074_v5 }
 0x37d   : > { %5370 = vmatprep.subr.mxu0 %v6074_v5 }
 0x44a   : > { %v452_v28 = vpop.f32.mrb[4].mxu0 }
 0x44b   : > { %456 = vst.msk [vmem:[#allocation2] sm:$0xff] %vm208_vm0, %v452_v28  ;;  %v5359_v29 = vpop.f32.mrb[5].mxu0 }
 0x44c   : > { %v5092_v29 = vld [vmem:[%s6902_s1 + $0x62] ss:$0 sm:$0xff] }
 0x44e   : > { %v531_v30 = vpop.f32.mrb[6].mxu0 }
 0x44f   : > { %v535_v31 = vmul.f32 0.25, %v531_v30  ;;  %v5364_v32 = vpop.f32.mrb[7].mxu0 }
 0x451   : > { %v536_v33 = vsel %vm368_vm2, %v535_v31, -inf }
 0x452   : > { %537 = vmax.xlane.f32.xlu1 %v536_v33 }
 0x463   : > { %713 = vrot.lane.b32.xlu1 %v6180_v8, %s6076_s12 }
 0x467   : > { %792 = vrot.lane.b32.xlu1 %v6180_v8, %s6078_s14 }
 0x4df   : > { %v538_v34 = vpop.xlane.xlu1 %537 }
 0x4e0   : > { %v539_v35 = vsub.f32 %v535_v31, %v538_v34 }
 0x4e2   : > { %v540_v36 = vmul.f32 1.442695, %v539_v35 }
 0x4e3   : > { %v714_v43 = vpop.permute.xlu1 %713 }
 0x4e4   : > { %5918 = vpow2.f32 %v540_v36  ;;  %v6277_v36 = vld [vmem:[%s6903_s2 + $0x50] ss:$0 sm:$0xff] }
 0x4e7   : > { %v793_v56 = vpop.permute.xlu1 %792 }
 0x4ee   : > { %v5919_v37 = vpop.eup %5918 }
 0x4ef   : > { %v542_v38 = vsel %vm368_vm2, %v5919_v37, 0.0 }
 0x4f0   : > { %543 = vadd.xlane.f32.xlu0 %v542_v38 }
 0x506   : > { %625 = vrot.lane.b32.xlu0 %v6180_v8, %s6077_s13 }
 0x57d   : > { %v544_v39 = vpop.xlane.xlu0 %543 }
 0x57e   : > { %5920 = vrcp.f32 %v544_v39 }
 0x581   : > { %v626_v42 = vpop.permute.xlu0 %625 }
 0x588   : > { %v5921_v40 = vpop.eup %5920 }
 0x589   : > { %v546_v41 = vmul.f32 %v5921_v40, %v5919_v37 }
 0x58b   : > { %5368 = vmatmul.mubr.msk.f32.vlgmr.msra.gmra.mrb[8].mxu0 %vm368_vm2, %v546_v41 }
 0x58c   : > { %5371 = vmatpush3.xpose.msk.msra.mxu0 %vm208_vm0, %v626_v42  ;;  %5372 = vmatprep.mubr.msk.f32.mxu0 %vm6075_vm1, %v6074_v5 }
 0x58d   : > { %5375 = vmatprep.subr.mxu0 %v6074_v5 }
 0x58f   : > { %5373 = vmatmul.mubr.msk.f32.vlgmr.msra.gmra.mrb[10].mxu0 %vm208_vm0, %v6180_v8 }
 0x590   : > { %5376 = vmatpush3.msra.mxu0 %v714_v43  ;;  %5377 = vmatprep.mubr.msk.f32.mxu0 %vm6075_vm1, %v6074_v5 }
 0x591   : > { %5380 = vmatprep.subr.mxu0 %v6074_v5 }
 0x65e   : > { %v619_v44 = vpop.f32.mrb[8].mxu0 }
 0x65f   : > { %623 = vst.msk [vmem:[#allocation2 + $0x8] sm:$0xff] %vm208_vm0, %v619_v44  ;;  %v5369_v45 = vpop.f32.mrb[9].mxu0 }
 0x662   : > { %v697_v46 = vpop.f32.mrb[10].mxu0 }
 0x663   : > { %v701_v47 = vmul.f32 0.25, %v697_v46  ;;  %v5374_v48 = vpop.f32.mrb[11].mxu0 }
 0x665   : > { %v702_v49 = vsel %vm368_vm2, %v701_v47, -inf }
 0x666   : > { %703 = vmax.xlane.f32.xlu0 %v702_v49  ;;  %v1051_v50 = vld [vmem:[#allocation2 + $0x1] ss:$2 sm:$0xff]  ;;  %v958_v16 = vld [vmem:[#allocation2] ss:$2 sm:$0xff] }
 0x667   : > { %5401 = vmatprep.mubr.msk.f32.mxu1 %vm208_vm0, %v1051_v50 }
 0x6f3   : > { %v704_v51 = vpop.xlane.xlu0 %703 }
 0x6f4   : > { %v705_v52 = vsub.f32 %v701_v47, %v704_v51 }
 0x6f6   : > { %v706_v53 = vmul.f32 1.442695, %v705_v52 }
 0x6f8   : > { %5922 = vpow2.f32 %v706_v53 }
 0x702   : > { %v5923_v54 = vpop.eup %5922 }
 0x703   : > { %v708_v55 = vsel %vm368_vm2, %v5923_v54, 0.0 }
 0x704   : > { %709 = vadd.xlane.f32.xlu1 %v708_v55 }
 0x715   : > { %790 = vrot.lane.b32.xlu1 %v6180_v8, %s6080_s22 }
 0x791   : > { %v710_v57 = vpop.xlane.xlu1 %709 }
 0x792   : > { %5924 = vrcp.f32 %v710_v57 }
 0x795   : > { %v791_v60 = vpop.permute.xlu1 %790 }
 0x79c   : > { %v5925_v58 = vpop.eup %5924 }
 0x79d   : > { %v712_v59 = vmul.f32 %v5925_v58, %v5923_v54 }
 0x79f   : > { %5378 = vmatmul.mubr.msk.f32.vlgmr.msra.gmra.mrb[12].mxu0 %vm368_vm2, %v712_v59 }
 0x7a0   : > { %5381 = vmatpush3.xpose.msk.msra.mxu0 %vm208_vm0, %v793_v56  ;;  %5382 = vmatprep.mubr.msk.f32.mxu0 %vm6075_vm1, %v6074_v5 }
 0x7a1   : > { %5385 = vmatprep.subr.mxu0 %v6074_v5 }
 0x7a3   : > { %5383 = vmatmul.mubr.msk.f32.vlgmr.msra.gmra.mrb[14].mxu0 %vm208_vm0, %v791_v60 }
 0x7a4   : > { %5387 = vmatprep.mubr.msk.f32.mxu0 %vm6075_vm1, %v6074_v5 }
 0x872   : > { %v785_v61 = vpop.f32.mrb[12].mxu0 }
 0x873   : > { %789 = vst.msk [vmem:[#allocation2 + $0x10] sm:$0xff] %vm208_vm0, %v785_v61  ;;  %v5379_v62 = vpop.f32.mrb[13].mxu0 }
 0x874   : > { %v1182_v62 = vld [vmem:[%s6902_s1 + $0x10] sm:$0xff] }
 0x876   : > { %v864_v63 = vpop.f32.mrb[14].mxu0 }
 0x877   : > { %v868_v0 = vmul.f32 0.25, %v864_v63  ;;  %v5384_v1 = vpop.f32.mrb[15].mxu0  ;;  %v1183_v63 = vld [vmem:[%s6902_s1 + $0x18] sm:$0xff] }
 0x878   : > { %v5676_v1 = vpack.c.bf16 %v1183_v63, %v1182_v62 }
 0x879   : > { %v869_v2 = vsel %vm368_vm2, %v868_v0, -inf }
 0x87a   : > { %870 = vmax.xlane.f32.xlu1 %v869_v2 }
 0x907   : > { %v871_v6 = vpop.xlane.xlu1 %870 }
 0x908   : > { %v872_v7 = vsub.f32 %v868_v0, %v871_v6 }
 0x90a   : > { %v873_v9 = vmul.f32 1.442695, %v872_v7 }
 0x90c   : > { %5926 = vpow2.f32 %v873_v9 }
 0x916   : > { %v5927_v10 = vpop.eup %5926 }
 0x917   : > { %v875_v11 = vsel %vm368_vm2, %v5927_v10, 0.0 }
 0x918   : > { %876 = vadd.xlane.f32.xlu0 %v875_v11 }
 0x92e   : > { %880 = vrot.lane.b32.xlu0 %v6180_v8, %s6079_s20  ;;  %v962_v8 = vld [vmem:[%s6902_s1 + $0x28] sm:$0xff] }
 0x92f   : > { %v5668_v19 = vpack.c.bf16 %v962_v8, %v961_v17 }
 0x94c   : > { %1460 = vxpose.xlu0.b32.start.end [1/1] (short) (narrow) %v6166_v3, 16 }
 0x9a5   : > { %v877_v12 = vpop.xlane.xlu0 %876 }
 0x9a6   : > { %5928 = vrcp.f32 %v877_v12 }
 0x9a9   : > { %v881_v13 = vpop.permute.xlu0 %880 }
 0x9aa   : > { %5386 = vmatpush3.msra.mxu0 %v881_v13  ;;  %v5095_v13 = vld [vmem:[%s6902_s1 + $0x63] ss:$0 sm:$0xff] }
 0x9ab   : > { %5669 = vmatprep.subr.bf16.mxu0 %v5668_v19 }
 0x9b0   : > { %v5929_v14 = vpop.eup %5928 }
 0x9b1   : > { %v879_v15 = vmul.f32 %v5929_v14, %v5927_v10 }
 0x9b3   : > { %5388 = vmatmul.mubr.msk.f32.vlgmr.msra.gmra.mrb[16].mxu0 %vm368_vm2, %v879_v15  ;;  %v5096_v15 = vld [vmem:[%s6902_s1 + $0x64] ss:$0 sm:$0xff] }
 0x9b4   : > { %5394 = vmatprep.mubr.msk.f32.mxu0 %vm208_vm0, %v958_v16  ;;  %5671 = vmatpush3.bf16.msra.mxu0 %v5668_v19 }
 0x9b5   : > { %5677 = vmatprep.subr.bf16.mxu0 %v5676_v1 }
 0x9cc   : > { %v6261_v25 = vpop.trf.xlu0 }
 0x9d0   : > { %v6267_v28 = vpop.trf.xlu0 }
 0xa86   : > { %v952_v23 = vpop.f32.mrb[16].mxu0 }
 0xa87   : > { %956 = vst.msk [vmem:[#allocation2 + $0x18] sm:$0xff] %vm208_vm0, %v952_v23  ;;  %v5389_v24 = vpop.f32.mrb[17].mxu0 }
 0xa8e   : > { %v960_v26 = vld [vmem:[#allocation2 + $0x10] ss:$2 sm:$0xff]  ;;  %v1053_v27 = vld [vmem:[#allocation2 + $0x11] ss:$2 sm:$0xff] }
 0xa8f   : > { %5395 = vmatmul.mubr.msk.f32.vlgmr.msra.gmra.mrb[18].mxu0 %vm208_vm0, %v960_v26  ;;  %5402 = vmatmul.mubr.msk.f32.vlgmr.msra.gmra.mrb[0].mxu1 %vm208_vm0, %v1053_v27 }
 0xa90   : > { %5423 = vmatpush3.msra.mxu1 %v1525_v22  ;;  %5424 = vmatprep.mubr.msk.f32.mxu1 %vm368_vm2, %v6261_v25 }
 0xa91   : > { %5679 = vmatpush3.bf16.msra.mxu0 %v5676_v1 }
 0xa93   : > { %5425 = vmatmul.mubr.msk.f32.vlgmr.msra.gmra.mrb[2].mxu1 %vm368_vm2, %v6267_v28 }
 0xb62   : > { %v5396_v30 = vpop.f32.mrb[18].mxu0  ;;  %v5403_v31 = vpop.f32.mrb[0].mxu1 }
 0xb63   : > { %v1049_v32 = vadd.f32 %v5396_v30, %v5092_v29  ;;  %v1035_v33 = vpop.f32.mrb[19].mxu0  ;;  %v1128_v34 = vpop.f32.mrb[1].mxu1 }
 0xb64   : > { %v1048_v35 = vadd.f32 %v5092_v29, %v1035_v33 }
 0xb65   : > { %v1138_v37 = vadd.f32 %v5403_v31, %v1049_v32  ;;  %v1322_v31 = vld [vmem:[%s6902_s1 + $0x40] sm:$0xff]  ;;  %v1323_v32 = vld [vmem:[%s6902_s1 + $0x48] sm:$0xff] }
 0xb66   : > { %v1137_v38 = vadd.f32 %v1128_v34, %v1048_v35  ;;  %v5426_v39 = vpop.f32.mrb[2].mxu1  ;;  %v5680_v33 = vpack.c.bf16 %v1323_v32, %v1322_v31  ;;  %v1324_v34 = vld [vmem:[%s6902_s1 + $0x50] sm:$0xff]  ;;  %v1325_v35 = vld [vmem:[%s6902_s1 + $0x58] sm:$0xff] }
 0xb67   : > { %v6280_v40 = vadd.f32 %v5426_v39, %v6277_v36  ;;  %v1609_v41 = vpop.f32.mrb[3].mxu1  ;;  %v1140_v42 = vadd.f32 %v6168_v4, %v1138_v37  ;;  %v5684_v37 = vpack.c.bf16 %v1325_v35, %v1324_v34 }
 0xb68   : > { %v6284_v43 = vadd.f32 %v6277_v36, %v1609_v41  ;;  %v1139_v46 = vadd.f32 %v1137_v38, %v6166_v3  ;;  %5681 = vmatprep.subr.bf16.mxu0 %v5680_v33  ;;  %v5097_v38 = vld [vmem:[%s6902_s1 + $0x61] ss:$0 sm:$0xff] }
 0xb69   : > { %v1146_v44 = vsel %vm208_vm0, %v1140_v42, 0.0 }
 0xb6a   : > { %1147 = vadd.xlane.f32.xlu0 %v1146_v44  ;;  %v6289_v45 = vpack.i.bf16 %v6280_v40, %v6284_v43  ;;  %v1143_v47 = vsel %vm208_vm0, %v1139_v46, 0.0 }
 0xb6c   : > { %5875 = vrot.lane.b32.xlu1 %v6289_v45, %s6077_s13 }
 0xb90   : > { %1144 = vadd.xlane.f32.xlu1 %v1143_v47 }
 0xbc3   : > { %1493 = vxpose.xlu1.b32.start.end [1/1] (short) (narrow) %v6168_v4, 16 }
 0xbde   : > { %v5876_v48 = vpop.permute.xlu1 %5875 }
 0xbdf   : > { %v5878_v49 = vunpack.i.h.bf16 %v5876_v48  ;;  %v5877_v50 = vunpack.i.l.bf16 %v5876_v48 }
 0xbe1   : > { %v5688_v52 = vpack.c.bf16 %v5878_v49, %v5877_v50 }
 0xbe3   : > { %5690 = vmatprep.subr.msk.bf16.mxu1 %vm6298_vm3, %v5688_v52 }
 0xbe4   : > { %5693 = vmatpush3.bf16.xpose.msk.msra.mxu1 %vm6298_vm3, %v5688_v52 }
 0xbe5   : > { %5885 = vrot.lane.b32.xlu1 %v6289_v45, %s6078_s14 }
 0xbf7   : > { %v1148_v3 = vpop.xlane.xlu0 %1147 }
 0xbf8   : > { %v1151_v4 = vmul.f32 0.0625, %v1148_v3 }
 0xbfa   : > { %v1153_v55 = vsub.f32 %v1140_v42, %v1151_v4 }
 0xbfc   : > { %v1155_v59 = vmul.f32 %v1153_v55, %v1153_v55 }
 0xbfe   : > { %v1159_v60 = vsel %vm208_vm0, %v1155_v59, 0.0 }
 0xc1d   : > { %v1145_v53 = vpop.xlane.xlu1 %1144 }
 0xc1e   : > { %v1150_v54 = vmul.f32 0.0625, %v1145_v53 }
 0xc20   : > { %v1152_v56 = vsub.f32 %v1139_v46, %v1150_v54 }
 0xc22   : > { %v1154_v57 = vmul.f32 %v1152_v56, %v1152_v56 }
 0xc24   : > { %v1156_v58 = vsel %vm208_vm0, %v1154_v57, 0.0 }
 0xc25   : > { %1157 = vadd.xlane.f32.xlu0 %v1156_v58 }
 0xc29   : > { %1160 = vadd.xlane.f32.xlu0 %v1159_v60 }
 0xc43   : > { %v6310_v61 = vpop.trf.xlu1 }
 0xc44   : > { %5427 = vmatprep.mubr.msk.f32.mxu1 %vm368_vm2, %v6310_v61 }
 0xc47   : > { %v6320_v0 = vpop.trf.xlu1 }
 0xc48   : > { %5428 = vmatmul.mubr.msk.f32.gmra.mrb[4].mxu1 %vm368_vm2, %v6320_v0 }
 0xc49   : > { %5434 = vmatprep.mubr.msk.f32.mxu1 %vm208_vm0, %v6284_v43 }
 0xc4c   : > { %5435 = vmatmul.mubr.msk.f32.vlgmr.msra.gmra.mrb[6].mxu1 %vm208_vm0, %v6280_v40 }
 0xcb2   : > { %v1158_v2 = vpop.xlane.xlu0 %1157 }
 0xcb3   : > { %v1162_v6 = vmul.f32 0.0625, %v1158_v2 }
 0xcb5   : > { %v1164_v7 = vadd.f32 1e-05, %v1162_v6 }
 0xcb6   : > { %v1161_v9 = vpop.xlane.xlu0 %1160 }
 0xcb7   : > { %5930 = vrsqrt.f32 %v1164_v7  ;;  %v1163_v10 = vmul.f32 0.0625, %v1161_v9 }
 0xcb9   : > { %v1165_v11 = vadd.f32 1e-05, %v1163_v10 }
 0xcbb   : > { %5932 = vrsqrt.f32 %v1165_v11 }
 0xcc1   : > { %v5931_v12 = vpop.eup %5930 }
 0xcc2   : > { %v1168_v14 = vmul.f32 %v5931_v12, %v1152_v56 }
 0xcc4   : > { %v1174_v16 = vmul.f32 %v5095_v13, %v1168_v14 }
 0xcc5   : > { %v5933_v17 = vpop.eup %5932 }
 0xcc6   : > { %v1169_v8 = vmul.f32 %v5933_v17, %v1153_v55  ;;  %v6334_v18 = vadd.f32 %v5096_v15, %v1174_v16 }
 0xcc8   : > { %v1175_v19 = vmul.f32 %v5095_v13, %v1169_v8  ;;  %5408 = vmatprep.mubr.msk.f32.mxu0 %vm208_vm0, %v6334_v18 }
 0xcca   : > { %v6338_v20 = vadd.f32 %v5096_v15, %v1175_v19 }
 0xccc   : > { %5409 = vmatmul.mubr.msk.f32.vlgmr.msra.gmra.mrb[20].mxu0 %vm208_vm0, %v6338_v20 }
 0xccd   : > { %5683 = vmatpush3.bf16.msra.mxu0 %v5680_v33 }
 0xcce   : > { %5685 = vmatprep.subr.bf16.mxu0 %v5684_v37 }
 0xcd1   : > { %5687 = vmatpush3.bf16.msra.mxu0 %v5684_v37 }
 0xd1b   : > { %v6342_v21 = vpop.f32.mrb[4].mxu1 }
 0xd1c   : > { %v6344_v22 = vpop.f32.mrb[5].mxu1 }
 0xd1f   : > { %v5436_v23 = vpop.f32.mrb[6].mxu1 }
 0xd20   : > { %v1708_v24 = vpop.f32.mrb[7].mxu1  ;;  %v1718_v27 = vmul.f32 0.25, %v5436_v23 }
 0xd21   : > { %v1717_v26 = vmul.f32 0.25, %v1708_v24 }
 0xd22   : > { %v1722_v30 = vsel %vm208_vm0, %v1718_v27, -inf }
 0xd23   : > { %v1719_v29 = vsel %vm208_vm0, %v1717_v26, -inf }
 0xd24   : > { %1720 = vmax.xlane.f32.xlu0 %v1719_v29 }
 0xd28   : > { %1723 = vmax.xlane.f32.xlu0 %v1722_v30 }
 0xd3e   : > { %5880 = vrot.lane.b32.xlu0 %v6289_v45, %s6076_s12 }
 0xd9f   : > { %v5410_v39 = vpop.f32.mrb[20].mxu0 }
 0xda0   : > { %v6365_v41 = vadd.f32 %v5410_v39, %v5097_v38  ;;  %v1261_v42 = vpop.f32.mrb[21].mxu0 }
 0xda1   : > { %v6367_v44 = vadd.f32 %v5097_v38, %v1261_v42 }
 0xda2   : > { %v6370_v46 = vmul.f32 0.70710677, %v6365_v41 }
 0xda3   : > { %v6373_v47 = vmul.f32 0.70710677, %v6367_v44 }
 0xda4   : > { %v1275_v48 = vand.u32 2147483647, %v6370_v46  ;;  %vm1313_vm4 = vcmp.ge.f32.partialorder %v6370_v46, 0.0 }
 0xda5   : > { %v1274_v49 = vand.u32 2147483647, %v6373_v47  ;;  %vm1312_vm5 = vcmp.ge.f32.partialorder %v6373_v47, 0.0  ;;  %v6391_v47 = vadd.f32 %v6277_v36, %v6344_v22 }
 0xda6   : > { %v1277_v50 = vmul.f32 0.3275911, %v1275_v48  ;;  %v1301_v53 = vsub.f32 0.0, %v1275_v48 }
 0xda7   : > { %v1276_v52 = vmul.f32 0.3275911, %v1274_v49  ;;  %v1300_v54 = vsub.f32 0.0, %v1274_v49 }
 0xda8   : > { %v1279_v3 = vadd.f32 1.0, %v1277_v50  ;;  %v1303_v56 = vmul.f32 %v1301_v53, %v1275_v48 }
 0xda9   : > { %v1278_v4 = vadd.f32 1.0, %v1276_v52  ;;  %v1302_v62 = vmul.f32 %v1300_v54, %v1274_v49 }
 0xdaa   : > { %5934 = vrcp.f32 %v1279_v3  ;;  %v1306_v7 = vmul.f32 1.442695, %v1303_v56 }
 0xdab   : > { %5936 = vrcp.f32 %v1278_v4  ;;  %v1304_v13 = vmul.f32 1.442695, %v1302_v62 }
 0xdb1   : > { %v1721_v55 = vpop.xlane.xlu0 %1720 }
 0xdb2   : > { %v1725_v58 = vsub.f32 %v1717_v26, %v1721_v55  ;;  %v5886_v55 = vpop.permute.xlu1 %5885 }
 0xdb3   : > { %v5888_v62 = vunpack.i.h.bf16 %v5886_v55 }
 0xdb4   : > { %v5935_v57 = vpop.eup %5934  ;;  %v1727_v10 = vmul.f32 1.442695, %v1725_v58 }
 0xdb5   : > { %v5937_v59 = vpop.eup %5936  ;;  %v1283_v60 = vmul.f32 1.0614054, %v5935_v57  ;;  %v1724_v63 = vpop.xlane.xlu0 %1723 }
 0xdb6   : > { %v1282_v1 = vmul.f32 1.0614054, %v5937_v59  ;;  %v1726_v2 = vsub.f32 %v1718_v27, %v1724_v63  ;;  %v5887_v63 = vunpack.i.l.bf16 %v5886_v55 }
 0xdb7   : > { %v1285_v6 = vadd.f32 -1.4531521, %v1283_v60 }
 0xdb8   : > { %v1284_v9 = vadd.f32 -1.4531521, %v1282_v1  ;;  %v1729_v11 = vmul.f32 1.442695, %v1726_v2  ;;  %v1271_v1 = vmul.f32 0.5, %v6365_v41  ;;  %v5698_v46 = vpack.c.bf16 %v5888_v62, %v5887_v63 }
 0xdb9   : > { %v1287_v12 = vmul.f32 %v5935_v57, %v1285_v6  ;;  %v5881_v14 = vpop.permute.xlu0 %5880 }
 0xdba   : > { %v1286_v15 = vmul.f32 %v5937_v59, %v1284_v9  ;;  %5938 = vpow2.f32 %v1729_v11  ;;  %v5883_v16 = vunpack.i.h.bf16 %v5881_v14  ;;  %v5882_v17 = vunpack.i.l.bf16 %v5881_v14 }
 0xdbb   : > { %v1289_v8 = vadd.f32 1.4214138, %v1287_v12  ;;  %5940 = vpow2.f32 %v1306_v7 }
 0xdbc   : > { %v1288_v19 = vadd.f32 1.4214138, %v1286_v15  ;;  %5942 = vpow2.f32 %v1727_v10  ;;  %v5694_v23 = vpack.c.bf16 %v5883_v16, %v5882_v17 }
 0xdbd   : > { %v1291_v24 = vmul.f32 %v5935_v57, %v1289_v8  ;;  %5944 = vpow2.f32 %v1304_v13 }
 0xdbe   : > { %v1290_v26 = vmul.f32 %v5937_v59, %v1288_v19  ;;  %5695 = vmatprep.subr.bf16.mxu0 %v5694_v23 }
 0xdbf   : > { %v1293_v27 = vadd.f32 -0.28449672, %v1291_v24 }
 0xdc0   : > { %v1292_v29 = vadd.f32 -0.28449672, %v1290_v26 }
 0xdc1   : > { %v1295_v30 = vmul.f32 %v5935_v57, %v1293_v27 }
 0xdc2   : > { %v1294_v31 = vmul.f32 %v5937_v59, %v1292_v29 }
 0xdc3   : > { %v1297_v32 = vadd.f32 0.2548296, %v1295_v30 }
 0xdc4   : > { %v5939_v33 = vpop.eup %5938  ;;  %v1296_v34 = vadd.f32 0.2548296, %v1294_v31 }
 0xdc5   : > { %v5941_v35 = vpop.eup %5940  ;;  %v1299_v37 = vmul.f32 %v5935_v57, %v1297_v32  ;;  %v1734_v38 = vsel %vm208_vm0, %v5939_v33, 0.0 }
 0xdc6   : > { %v5943_v39 = vpop.eup %5942  ;;  %v1298_v42 = vmul.f32 %v5937_v59, %v1296_v34  ;;  %1735 = vadd.xlane.f32.xlu0 %v1734_v38  ;;  %v1270_v59 = vmul.f32 0.5, %v6367_v44  ;;  %v1625_v44 = vadd.f32 %v6342_v21, %v6277_v36 }
 0xdc7   : > { %v5945_v48 = vpop.eup %5944  ;;  %v1309_v49 = vmul.f32 %v5941_v35, %v1299_v37  ;;  %v1731_v3 = vsel %vm208_vm0, %v5943_v39, 0.0 }
 0xdc8   : > { %v1308_v50 = vmul.f32 %v5945_v48, %v1298_v42  ;;  %v6394_v41 = vpack.i.bf16 %v1625_v44, %v6391_v47 }
 0xdc9   : > { %v1311_v52 = vsub.f32 1.0, %v1309_v49 }
 0xdca   : > { %v1310_v4 = vsub.f32 1.0, %v1308_v50  ;;  %1732 = vadd.xlane.f32.xlu0 %v1731_v3 }
 0xdcb   : > { %v1315_v53 = vsub.f32 0.0, %v1311_v52 }
 0xdcc   : > { %v1314_v54 = vsub.f32 0.0, %v1310_v4 }
 0xdcd   : > { %v1317_v56 = vsel %vm1313_vm4, %v1311_v52, %v1315_v53 }
 0xdce   : > { %v1319_v57 = vadd.f32 1.0, %v1317_v56  ;;  %v1316_v58 = vsel %vm1312_vm5, %v1310_v4, %v1314_v54 }
 0xdcf   : > { %v1318_v60 = vadd.f32 1.0, %v1316_v58 }
 0xdd0   : > { %v1321_v6 = vmul.f32 %v1319_v57, %v1271_v1 }
 0xdd1   : > { %v1320_v2 = vmul.f32 %v1318_v60, %v1270_v59 }
 0xdd3   : > { %5419 = vmatprep.mubr.msk.f32.mxu0 %vm1326_vm6, %v1320_v2 }
 0xdd4   : > { %5420 = vmatmul.mubr.msk.f32.vlgmr.msra.gmra.mrb[22].mxu0 %vm1326_vm6, %v1321_v6 }
 0xdd5   : > { %5697 = vmatpush3.bf16.msra.mxu0 %v5694_v23 }
 0xdd6   : > { %5700 = vmatprep.subr.msk.bf16.mxu0 %vm6298_vm3, %v5698_v46 }
 0xde0   : > { %5890 = vrot.lane.b32.xlu0 %v6394_v41, %s6077_s13 }
 0xde4   : > { %1830 = vrot.lane.b32.xlu0 %v6284_v43, %s6080_s22 }
 0xde8   : > { %1832 = vrot.lane.b32.xlu0 %v6280_v40, %s6080_s22 }
 0xe53   : > { %v1736_v7 = vpop.xlane.xlu0 %1735 }
 0xe54   : > { %5946 = vrcp.f32 %v1736_v7 }
 0xe57   : > { %v1733_v9 = vpop.xlane.xlu0 %1732 }
 0xe58   : > { %5948 = vrcp.f32 %v1733_v9 }
 0xe5b   : > { %v5891_v21 = vpop.permute.xlu0 %5890 }
 0xe5c   : > { %v5893_v22 = vunpack.i.h.bf16 %v5891_v21  ;;  %v5892_v11 = vunpack.i.l.bf16 %v5891_v21 }
 0xe5e   : > { %v5947_v10 = vpop.eup %5946  ;;  %v5708_v14 = vpack.c.bf16 %v5893_v22, %v5892_v11 }
 0xe5f   : > { %v1740_v13 = vmul.f32 %v5947_v10, %v5939_v33  ;;  %v1831_v15 = vpop.permute.xlu0 %1830 }
 0xe62   : > { %v5949_v36 = vpop.eup %5948 }
 0xe63   : > { %v1739_v12 = vmul.f32 %v5949_v36, %v5943_v39  ;;  %v1833_v40 = vpop.permute.xlu0 %1832 }
 0xe65   : > { %5441 = vmatprep.mubr.msk.f32.mxu0 %vm208_vm0, %v1739_v12 }
 0xe66   : > { %5442 = vmatmul.mubr.msk.f32.vlgmr.msra.gmra.mrb[24].mxu0 %vm208_vm0, %v1740_v13 }
 0xe67   : > { %5703 = vmatpush3.bf16.xpose.msk.msra.mxu0 %vm6298_vm3, %v5698_v46  ;;  %5448 = vmatprep.mubr.msk.f32.mxu0 %vm208_vm0, %v1831_v15 }
 0xe68   : > { %5710 = vmatprep.subr.msk.bf16.mxu0 %vm6298_vm3, %v5708_v14 }
 0xe6e   : > { %5449 = vmatmul.mubr.msk.f32.vlgmr.msra.gmra.mrb[26].mxu0 %vm208_vm0, %v1833_v40 }
 0xe6f   : > { %5713 = vmatpush3.bf16.xpose.msk.msra.mxu0 %vm6298_vm3, %v5708_v14  ;;  %5462 = vmatprep.mubr.msk.f32.mxu0 %vm208_vm0, %v6391_v47 }
 0xe76   : > { %5463 = vmatmul.mubr.msk.f32.vlgmr.msra.gmra.mrb[28].mxu0 %vm208_vm0, %v1625_v44 }
 0xea7   : > { %v6415_v43 = vpop.f32.mrb[22].mxu0 }
 0xea8   : > { %v6417_v16 = vpop.f32.mrb[23].mxu0 }
 0xf39   : > { %v5443_v17 = vpop.f32.mrb[24].mxu0 }
 0xf3a   : > { %1829 = vst.msk [vmem:[#allocation2 + $0x8] sm:$0xff] %vm208_vm0, %v5443_v17  ;;  %v1819_v8 = vpop.f32.mrb[25].mxu0 }
 0xf3b   : > { %1828 = vst.msk [vmem:[#allocation2] sm:$0xff] %vm208_vm0, %v1819_v8 }
 0xf41   : > { %v5450_v19 = vpop.f32.mrb[26].mxu0 }
 0xf42   : > { %v1912_v23 = vpop.f32.mrb[27].mxu0  ;;  %v6426_v32 = vmul.f32 0.25, %v5450_v19  ;;  %v2441_v7 = vld [vmem:[#allocation2] ss:$2 sm:$0xff] }
 0xf43   : > { %v1921_v3 = vmul.f32 0.25, %v1912_v23 }
 0xf44   : > { %v1926_v33 = vsel %vm208_vm0, %v6426_v32, -inf }
 0xf45   : > { %v1923_v4 = vsel %vm208_vm0, %v1921_v3, -inf }
 0xf49   : > { %v5464_v24 = vpop.f32.mrb[28].mxu0 }
 0xf4a   : > { %v2124_v26 = vmul.f32 0.25, %v5464_v24  ;;  %v2114_v27 = vpop.f32.mrb[29].mxu0 }
 0xf4b   : > { %v2123_v29 = vmul.f32 0.25, %v2114_v27 }
 0xf4c   : > { %v2128_v30 = vsel %vm208_vm0, %v2124_v26, -inf }
 0xf4d   : > { %2129 = vmax.xlane.f32.xlu1 %v2128_v30  ;;  %v2125_v31 = vsel %vm208_vm0, %v2123_v29, -inf }
 0xf4e   : > { %2126 = vmax.xlane.f32.xlu0 %v2125_v31 }
 0xf5e   : > { %5900 = vrot.lane.b32.xlu1 %v6394_v41, %s6078_s14 }
 0xf62   : > { %2238 = vrot.lane.b32.xlu1 %v1625_v44, %s6080_s22 }
 0xf86   : > { %1927 = vmax.xlane.f32.xlu1 %v1926_v33 }
 0xfda   : > { %v2130_v34 = vpop.xlane.xlu1 %2129 }
 0xfdb   : > { %v2132_v35 = vsub.f32 %v2124_v26, %v2130_v34  ;;  %v2127_v37 = vpop.xlane.xlu0 %2126 }
 0xfdc   : > { %v2131_v38 = vsub.f32 %v2123_v29, %v2127_v37 }
 0xfdd   : > { %v2135_v39 = vmul.f32 1.442695, %v2132_v35 }
 0xfde   : > { %v2133_v42 = vmul.f32 1.442695, %v2131_v38  ;;  %v5901_v55 = vpop.permute.xlu1 %5900 }
 0xfdf   : > { %5950 = vpow2.f32 %v2135_v39  ;;  %v5903_v57 = vunpack.i.h.bf16 %v5901_v55  ;;  %v5902_v58 = vunpack.i.l.bf16 %v5901_v55 }
 0xfe0   : > { %5952 = vpow2.f32 %v2133_v42 }
 0xfe1   : > { %v5718_v63 = vpack.c.bf16 %v5903_v57, %v5902_v58 }
 0xfe9   : > { %v5951_v48 = vpop.eup %5950 }
 0xfea   : > { %v2140_v49 = vsel %vm208_vm0, %v5951_v48, 0.0  ;;  %v5953_v50 = vpop.eup %5952 }
 0xfeb   : > { %2141 = vadd.xlane.f32.xlu0 %v2140_v49  ;;  %v2137_v52 = vsel %vm208_vm0, %v5953_v50, 0.0 }
 0xfef   : > { %2138 = vadd.xlane.f32.xlu0 %v2137_v52 }
0x1005   : > { %5895 = vrot.lane.b32.xlu0 %v6394_v41, %s6076_s12  ;;  %s189_s12 = sand.u32 1, %s6064_s16  }
0x1006   : > { %s5071_s13 = sshll.u32 %s189_s12, 1  ;;  %s4995_s27 = scalar_lea.sflag [#allocation6], %s189_s12 }
0x1007   : > { %s191_s8 = scalar_lea.vmem [#allocation5], %s5071_s13 }
0x1008   : > { %s5008_s9 = sshll.u32 %s191_s8, 4  ;;  %s6861_s9 = int_to_ptr.vmem [resolvable:$true] %s5008_s9 }
0x1009   : > { %2236 = vrot.lane.b32.xlu0 %v6391_v47, %s6080_s22  ;;  %v2239_v47 = vpop.permute.xlu1 %2238  ;;  %s5184_s22 = sshll.u32 %s6129_s19, 5  ;;  %s6010_s28 = scalar_lea.vmem %s6861_s9, 32 }
0x100a   : > { %s6859_s23 = scalar_lea.hbm %s6905_s4, %s5184_s22  ;;  %p6011_p11 = scmp.ne.s32.totalorder %s6861_s9, %s6010_s28 }
0x100b   : > { %s6082_s19 = smov [#allocation5]  }
0x100c   : > { %p6012_p12 = pnand %p6011_p11, %p6146_p5  ;;  %s6014_s29 = sshll.u32 %s6082_s19, 4  ;;  %s6015_s29 = int_to_ptr.vmem [resolvable:$false] %s6014_s29 }
0x100d   : > { %s6016_s30 = scalar_lea.vmem %s6015_s29, 64  ;;  %p6017_p0 = scmp.lt.s32.totalorder %s6861_s9, %s6015_s29 }
0x100e   : > { %p6013_p13 = pneg %p6012_p12  ;;  %p6018_p1 = scmp.lt.s32.totalorder %s6016_s30, %s6010_s28 }
0x1010   : > { %p6019_p2 = por %p6018_p1, %p6017_p0 }
0x1012   : > { %p6020_p3 = pnand %p6019_p2, %p6013_p13 }
0x1013   : > { %v1928_v11 = vpop.xlane.xlu1 %1927 }
0x1014   : > { %v1930_v40 = vsub.f32 %v6426_v32, %v1928_v11 }
0x1016   : > { %v1933_v17 = vmul.f32 1.442695, %v1930_v40 }
0x1028   : > { %1924 = vmax.xlane.f32.xlu0 %v1923_v4 }
0x1078   : > { %v2142_v53 = vpop.xlane.xlu0 %2141 }
0x1079   : > { %5954 = vrcp.f32 %v2142_v53 }
0x107c   : > { %v2139_v54 = vpop.xlane.xlu0 %2138 }
0x107d   : > { %5956 = vrcp.f32 %v2139_v54 }
0x1080   : > { %v5896_v56 = vpop.permute.xlu0 %5895 }
0x1081   : > { %v5898_v59 = vunpack.i.h.bf16 %v5896_v56  ;;  %v5897_v60 = vunpack.i.l.bf16 %v5896_v56 }
0x1083   : > { %v5714_v62 = vpack.c.bf16 %v5898_v59, %v5897_v60  ;;  %v5955_v1 = vpop.eup %5954 }
0x1084   : > { %v2146_v46 = vmul.f32 %v5955_v1, %v5951_v48  ;;  %v2237_v44 = vpop.permute.xlu0 %2236  ;;  %v2447_v1 = vld [vmem:[%s6903_s2 + $0x10] sm:$0xff] }
0x1085   : > { %5715 = vmatprep.subr.bf16.mxu0 %v5714_v62 }
0x1086   : > { %5717 = vmatpush3.bf16.msra.mxu0 %v5714_v62 }
0x1087   : > { %v5957_v2 = vpop.eup %5956  ;;  %5720 = vmatprep.subr.msk.bf16.mxu0 %vm6298_vm3, %v5718_v63 }
0x1088   : > { %v2145_v6 = vmul.f32 %v5957_v2, %v5953_v50  ;;  %v2448_v2 = vld [vmem:[%s6903_s2 + $0x18] sm:$0xff] }
0x108a   : > { %5469 = vmatprep.mubr.msk.f32.mxu0 %vm208_vm0, %v2145_v6  ;;  %v5728_v6 = vpack.c.bf16 %v2448_v2, %v2447_v1 }
0x108b   : > { %5470 = vmatmul.mubr.msk.f32.vlgmr.msra.gmra.mrb[30].mxu0 %vm208_vm0, %v2146_v46  ;;  %v2560_v46 = vld [vmem:[%s6903_s2 + $0x20] sm:$0xff] }
0x108c   : > { %5476 = vmatprep.mubr.msk.f32.mxu0 %vm208_vm0, %v2237_v44  ;;  %v2561_v44 = vld [vmem:[%s6903_s2 + $0x28] sm:$0xff] }
0x108f   : > { %5723 = vmatpush3.bf16.xpose.msk.msra.mxu0 %vm6298_vm3, %v5718_v63 }
0x1090   : > { %5729 = vmatprep.subr.bf16.mxu0 %v5728_v6 }
0x1096   : > { %5477 = vmatmul.mubr.msk.f32.vlgmr.msra.gmra.mrb[32].mxu0 %vm208_vm0, %v2239_v47  ;;  %v5732_v47 = vpack.c.bf16 %v2561_v44, %v2560_v46 }
0x1097   : > { %5490 = vmatprep.mubr.msk.f32.mxu0 %vm208_vm0, %v2441_v7  ;;  %5731 = vmatpush3.bf16.msra.mxu0 %v5728_v6 }
0x1098   : > { %5733 = vmatprep.subr.bf16.mxu0 %v5732_v47 }
0x10b5   : > { %v1925_v9 = vpop.xlane.xlu0 %1924 }
0x10b6   : > { %v1929_v21 = vsub.f32 %v1921_v3, %v1925_v9 }
0x10b8   : > { %v1931_v10 = vmul.f32 1.442695, %v1929_v21 }
0x10ba   : > { %5958 = vpow2.f32 %v1931_v10 }
0x10c4   : > { %v5959_v36 = vpop.eup %5958 }
0x10c5   : > { %v1935_v22 = vsel %vm208_vm0, %v5959_v36, 0.0 }
0x10c6   : > { %1936 = vadd.xlane.f32.xlu1 %v1935_v22 }
0x1153   : > { %v1937_v12 = vpop.xlane.xlu1 %1936 }
0x1154   : > { %5960 = vrcp.f32 %v1937_v12  ;;  %v2554_v12 = vld [vmem:[#allocation2 + $0x1] ss:$2 sm:$0xff] }
0x1155   : > { %5962 = vpow2.f32 %v1933_v17 }
0x115e   : > { %v5961_v13 = vpop.eup %5960  ;;  %v5471_v51 = vpop.f32.mrb[30].mxu0 }
0x115f   : > { %2235 = vst.msk [vmem:[#allocation2 + $0x28] sm:$0xff] %vm208_vm0, %v5471_v51  ;;  %v2225_v14 = vpop.f32.mrb[31].mxu0  ;;  %v1943_v15 = vmul.f32 %v5961_v13, %v5959_v36  ;;  %v5963_v29 = vpop.eup %5962 }
0x1160   : > { %2234 = vst.msk [vmem:[#allocation2 + $0x20] sm:$0xff] %vm208_vm0, %v2225_v14  ;;  %v1938_v30 = vsel %vm208_vm0, %v5963_v29, 0.0 }
0x1161   : > { %5455 = vmatprep.mubr.msk.f32.mxu1 %vm208_vm0, %v1943_v15  ;;  %v5139_v15 = vld [vmem:[%s6903_s2 + $0x52] ss:$0 sm:$0xff] }
0x1167   : > { %v2444_v22 = vld [vmem:[#allocation2 + $0x20] ss:$2 sm:$0xff]  ;;  %v2557_v51 = vld [vmem:[#allocation2 + $0x21] ss:$2 sm:$0xff] }
0x1169   : > { %v5478_v8 = vpop.f32.mrb[32].mxu0 }
0x116a   : > { %v2318_v19 = vpop.f32.mrb[33].mxu0  ;;  %v2328_v24 = vmul.f32 0.25, %v5478_v8 }
0x116b   : > { %v2327_v23 = vmul.f32 0.25, %v2318_v19 }
0x116c   : > { %v2332_v27 = vsel %vm208_vm0, %v2328_v24, -inf }
0x116d   : > { %v2329_v26 = vsel %vm208_vm0, %v2327_v23, -inf }
0x116e   : > { %2330 = vmax.xlane.f32.xlu0 %v2329_v26 }
0x1172   : > { %2333 = vmax.xlane.f32.xlu0 %v2332_v27 }
0x1176   : > { %1939 = vadd.xlane.f32.xlu0 %v1938_v30 }
0x11fb   : > { %v2331_v31 = vpop.xlane.xlu0 %2330 }
0x11fc   : > { %v2335_v32 = vsub.f32 %v2327_v23, %v2331_v31 }
0x11fe   : > { %v2337_v33 = vmul.f32 1.442695, %v2335_v32 }
0x11ff   : > { %v2334_v34 = vpop.xlane.xlu0 %2333 }
0x1200   : > { %5964 = vpow2.f32 %v2337_v33  ;;  %v2336_v35 = vsub.f32 %v2328_v24, %v2334_v34 }
0x1202   : > { %v2339_v37 = vmul.f32 1.442695, %v2336_v35 }
0x1203   : > { %v1940_v49 = vpop.xlane.xlu0 %1939 }
0x1204   : > { %5966 = vpow2.f32 %v2339_v37 }
0x1205   : > { %5968 = vrcp.f32 %v1940_v49 }
0x120a   : > { %v5965_v38 = vpop.eup %5964 }
0x120b   : > { %v2341_v39 = vsel %vm208_vm0, %v5965_v38, 0.0 }
0x120c   : > { %2342 = vadd.xlane.f32.xlu1 %v2341_v39 }
0x120e   : > { %v5967_v42 = vpop.eup %5966 }
0x120f   : > { %v2344_v48 = vsel %vm208_vm0, %v5967_v42, 0.0  ;;  %v5969_v55 = vpop.eup %5968 }
0x1210   : > { %2345 = vadd.xlane.f32.xlu0 %v2344_v48  ;;  %v1944_v59 = vmul.f32 %v5969_v55, %v5963_v29  ;;  %v1408_v55 = vadd.f32 %v6417_v16, %v6334_v18 }
0x121d   : > { %5905 = vrot.lane.b32.xlu1 %v6289_v45, %s6079_s20 }
0x1226   : > { %5910 = vrot.lane.b32.xlu0 %v6394_v41, %s6079_s20 }
0x1299   : > { %v2343_v50 = vpop.xlane.xlu1 %2342 }
0x129a   : > { %5970 = vrcp.f32 %v2343_v50 }
0x129d   : > { %v5906_v52 = vpop.permute.xlu1 %5905  ;;  %v2346_v3 = vpop.xlane.xlu0 %2345 }
0x129e   : > { %v5908_v4 = vunpack.i.h.bf16 %v5906_v52  ;;  %v5907_v53 = vunpack.i.l.bf16 %v5906_v52  ;;  %5972 = vrcp.f32 %v2346_v3 }
0x12a0   : > { %v5704_v54 = vpack.c.bf16 %v5908_v4, %v5907_v53 }
0x12a1   : > { %v5911_v56 = vpop.permute.xlu0 %5910 }
0x12a2   : > { %v5913_v57 = vunpack.i.h.bf16 %v5911_v56  ;;  %v5912_v58 = vunpack.i.l.bf16 %v5911_v56  ;;  %5705 = vmatprep.subr.bf16.mxu1 %v5704_v54 }
0x12a3   : > { %5707 = vmatpush3.bf16.msra.mxu1 %v5704_v54 }
0x12a4   : > { %v5971_v45 = vpop.eup %5970  ;;  %v5724_v60 = vpack.c.bf16 %v5913_v57, %v5912_v58  ;;  %v5102_v58 = vld [vmem:[%s6902_s1 + $0x65] ss:$0 sm:$0xff] }
0x12a5   : > { %v2349_v41 = vmul.f32 %v5971_v45, %v5965_v38 }
0x12a6   : > { %5456 = vmatmul.mubr.msk.f32.vlgmr.msra.gmra.mrb[8].mxu1 %vm208_vm0, %v1944_v59  ;;  %5725 = vmatprep.subr.bf16.mxu1 %v5724_v60 }
0x12a7   : > { %5727 = vmatpush3.bf16.msra.mxu1 %v5724_v60  ;;  %5483 = vmatprep.mubr.msk.f32.mxu1 %vm208_vm0, %v2349_v41  ;;  %v6512_v41 = vadd.f32 %v5102_v58, %v1408_v55 }
0x12a8   : > { %v5973_v62 = vpop.eup %5972 }
0x12a9   : > { %v2350_v63 = vmul.f32 %v5973_v62, %v5967_v42  ;;  %v1419_v16 = vsel %vm208_vm0, %v6512_v41, 0.0  ;;  %v2738_v62 = vld [vmem:[%s6903_s2 + $0x8] sm:$0xff] }
0x12ab   : > { %5484 = vmatmul.mubr.msk.f32.vlgmr.msra.gmra.mrb[10].mxu1 %vm208_vm0, %v2350_v63 }
0x12ac   : > { %5532 = vmatprep.mubr.msk.f32.mxu1 %vm6075_vm1, %v6074_v5 }
0x1379   : > { %v5457_v7 = vpop.f32.mrb[8].mxu1 }
0x137a   : > { %2033 = vst.msk [vmem:[#allocation2 + $0x18] sm:$0xff] %vm208_vm0, %v5457_v7  ;;  %v2023_v9 = vpop.f32.mrb[9].mxu1 }
0x137b   : > { %2032 = vst.msk [vmem:[#allocation2 + $0x10] sm:$0xff] %vm208_vm0, %v2023_v9 }
0x137e   : > { %v5485_v21 = vpop.f32.mrb[10].mxu1 }
0x137f   : > { %2439 = vst.msk [vmem:[#allocation2 + $0x38] sm:$0xff] %vm208_vm0, %v5485_v21  ;;  %v2429_v10 = vpop.f32.mrb[11].mxu1 }
0x1380   : > { %2438 = vst.msk [vmem:[#allocation2 + $0x30] sm:$0xff] %vm208_vm0, %v2429_v10 }
0x1382   : > { %v2442_v36 = vld [vmem:[#allocation2 + $0x10] ss:$2 sm:$0xff]  ;;  %v2555_v13 = vld [vmem:[#allocation2 + $0x11] ss:$2 sm:$0xff] }
0x1383   : > { %5491 = vmatmul.mubr.msk.f32.vlgmr.msra.gmra.mrb[34].mxu0 %vm208_vm0, %v2442_v36 }
0x1384   : > { %5493 = vmatprep.mubr.msk.f32.mxu0 %vm208_vm0, %v2444_v22  ;;  %5735 = vmatpush3.bf16.msra.mxu0 %v5732_v47 }
0x1385   : > { %5506 = vmatprep.subr.mxu0 %v2738_v62 }
0x1387   : > { %v2446_v11 = vld [vmem:[#allocation2 + $0x30] ss:$2 sm:$0xff]  ;;  %v2559_v14 = vld [vmem:[#allocation2 + $0x31] ss:$2 sm:$0xff] }
0x1388   : > { %5494 = vmatmul.mubr.msk.f32.gmra.mrb[36].mxu0 %vm208_vm0, %v2446_v11  ;;  %v5144_v11 = vld [vmem:[%s6903_s2 + $0x53] ss:$0 sm:$0xff] }
0x1389   : > { %5500 = vmatprep.mubr.msk.f32.mxu0 %vm208_vm0, %v2554_v12 }
0x138c   : > { %5501 = vmatmul.mubr.msk.f32.vlgmr.msra.gmra.mrb[34].mxu0 %vm208_vm0, %v2555_v13 }
0x138d   : > { %5503 = vmatprep.mubr.msk.f32.mxu0 %vm208_vm0, %v2557_v51  ;;  %5507 = vmatpush3.msra.mxu0 %v2738_v62 }
0x1390   : > { %5504 = vmatmul.mubr.msk.f32.gmra.mrb[36].mxu0 %vm208_vm0, %v2559_v14  ;;  %v5145_v14 = vld [vmem:[%s6903_s2 + $0x54] ss:$0 sm:$0xff] }
0x145f   : > { %v5502_v40 = vpop.f32.mrb[34].mxu0 }
0x1460   : > { %v5772_v17 = vadd.f32 %v5502_v40, %v5139_v15  ;;  %v2640_v8 = vpop.f32.mrb[35].mxu0 }
0x1461   : > { %v5773_v19 = vadd.f32 %v5139_v15, %v2640_v8 }
0x1462   : > { %v2664_v23 = vadd.f32 %v5772_v17, %v6267_v28 }
0x1463   : > { %v5505_v24 = vpop.f32.mrb[36].mxu0  ;;  %v2663_v26 = vadd.f32 %v5773_v19, %v6261_v25 }
0x1464   : > { %v5774_v27 = vadd.f32 %v5505_v24, %v5139_v15  ;;  %v2650_v29 = vpop.f32.mrb[37].mxu0  ;;  %v2672_v30 = vsel %vm368_vm2, %v2664_v23, 0.0 }
0x1465   : > { %v5775_v31 = vadd.f32 %v5139_v15, %v2650_v29  ;;  %2673 = vadd.xlane.f32.xlu0 %v2672_v30  ;;  %v2669_v32 = vsel %vm368_vm2, %v2663_v26, 0.0 }
0x1466   : > { %2670 = vadd.xlane.f32.xlu1 %v2669_v32  ;;  %v2666_v33 = vadd.f32 %v5774_v27, %v6320_v0  ;;  %v2945_v32 = vld [vmem:[%s6903_s2 + $0x30] sm:$0xff] }
0x1467   : > { %v2665_v34 = vadd.f32 %v5775_v31, %v6310_v61  ;;  %v1409_v61 = vadd.f32 %v6415_v43, %v6338_v20 }
0x1468   : > { %v2678_v35 = vsel %vm368_vm2, %v2666_v33, 0.0 }
0x1469   : > { %2679 = vadd.xlane.f32.xlu0 %v2678_v35  ;;  %v2675_v28 = vsel %vm368_vm2, %v2665_v34, 0.0  ;;  %v6509_v20 = vadd.f32 %v5102_v58, %v1409_v61  ;;  %v2947_v35 = vld [vmem:[%s6903_s2 + $0x40] sm:$0xff] }
0x146a   : > { %2676 = vadd.xlane.f32.xlu1 %v2675_v28  ;;  %v2948_v28 = vld [vmem:[%s6903_s2 + $0x48] sm:$0xff] }
0x146b   : > { %v1422_v18 = vsel %vm208_vm0, %v6509_v20, 0.0 }
0x14f2   : > { %v2674_v25 = vpop.xlane.xlu0 %2673 }
0x14f3   : > { %v2683_v37 = vmul.f32 0.125, %v2674_v25  ;;  %v2671_v38 = vpop.xlane.xlu1 %2670  ;;  %v5740_v25 = vpack.c.bf16 %v2948_v28, %v2947_v35 }
0x14f4   : > { %v2682_v39 = vmul.f32 0.125, %v2671_v38 }
0x14f5   : > { %v2687_v42 = vsub.f32 %v2664_v23, %v2683_v37  ;;  %v5146_v37 = vld [vmem:[%s6903_s2 + $0x51] ss:$0 sm:$0xff] }
0x14f6   : > { %v2686_v48 = vsub.f32 %v2663_v26, %v2682_v39  ;;  %v2680_v49 = vpop.xlane.xlu0 %2679 }
0x14f7   : > { %v2685_v50 = vmul.f32 0.125, %v2680_v49  ;;  %v2677_v52 = vpop.xlane.xlu1 %2676  ;;  %v2691_v3 = vmul.f32 %v2687_v42, %v2687_v42 }
0x14f8   : > { %v2684_v4 = vmul.f32 0.125, %v2677_v52  ;;  %v2690_v0 = vmul.f32 %v2686_v48, %v2686_v48 }
0x14f9   : > { %v2689_v53 = vsub.f32 %v2666_v33, %v2685_v50  ;;  %v2697_v54 = vsel %vm368_vm2, %v2691_v3, 0.0  ;;  %v2946_v33 = vld [vmem:[%s6903_s2 + $0x38] sm:$0xff] }
0x14fa   : > { %v2688_v56 = vsub.f32 %v2665_v34, %v2684_v4  ;;  %2698 = vadd.xlane.f32.xlu0 %v2697_v54  ;;  %v2694_v57 = vsel %vm368_vm2, %v2690_v0, 0.0  ;;  %v5736_v34 = vpack.c.bf16 %v2946_v33, %v2945_v32 }
0x14fb   : > { %2695 = vadd.xlane.f32.xlu1 %v2694_v57  ;;  %v2693_v45 = vmul.f32 %v2689_v53, %v2689_v53 }
0x14fc   : > { %v2692_v59 = vmul.f32 %v2688_v56, %v2688_v56  ;;  %5737 = vmatprep.subr.bf16.mxu0 %v5736_v34 }
0x14fd   : > { %v2703_v60 = vsel %vm368_vm2, %v2693_v45, 0.0 }
0x14fe   : > { %2704 = vadd.xlane.f32.xlu0 %v2703_v60  ;;  %v2700_v43 = vsel %vm368_vm2, %v2692_v59, 0.0 }
0x14ff   : > { %2701 = vadd.xlane.f32.xlu1 %v2700_v43 }
0x1502   : > { %1423 = vadd.xlane.f32.xlu0 %v1422_v18 }
0x1503   : > { %1420 = vadd.xlane.f32.xlu1 %v1419_v16 }
0x1587   : > { %v2699_v63 = vpop.xlane.xlu0 %2698 }
0x1588   : > { %v2707_v1 = vmul.f32 0.125, %v2699_v63  ;;  %v2696_v2 = vpop.xlane.xlu1 %2695 }
0x1589   : > { %v2706_v6 = vmul.f32 0.125, %v2696_v2 }
0x158a   : > { %v2711_v46 = vadd.f32 1e-05, %v2707_v1 }
0x158b   : > { %v2710_v44 = vadd.f32 1e-05, %v2706_v6  ;;  %v2705_v47 = vpop.xlane.xlu0 %2704 }
0x158c   : > { %5974 = vrsqrt.f32 %v2711_v46  ;;  %v2709_v7 = vmul.f32 0.125, %v2705_v47  ;;  %v2702_v9 = vpop.xlane.xlu1 %2701 }
0x158d   : > { %5976 = vrsqrt.f32 %v2710_v44  ;;  %v2708_v21 = vmul.f32 0.125, %v2702_v9 }
0x158e   : > { %v2713_v10 = vadd.f32 1e-05, %v2709_v7 }
0x158f   : > { %v2712_v36 = vadd.f32 1e-05, %v2708_v21 }
0x1590   : > { %5978 = vrsqrt.f32 %v2713_v10 }
0x1591   : > { %5980 = vrsqrt.f32 %v2712_v36 }
0x1596   : > { %v5975_v22 = vpop.eup %5974 }
0x1597   : > { %v5977_v12 = vpop.eup %5976  ;;  %v2719_v13 = vmul.f32 %v5975_v22, %v2687_v42 }
0x1598   : > { %v2718_v51 = vmul.f32 %v5977_v12, %v2686_v48 }
0x1599   : > { %v2727_v15 = vmul.f32 %v5144_v11, %v2719_v13 }
0x159a   : > { %v5979_v40 = vpop.eup %5978  ;;  %v2726_v17 = vmul.f32 %v5144_v11, %v2718_v51 }
0x159b   : > { %v5981_v8 = vpop.eup %5980  ;;  %v2721_v19 = vmul.f32 %v5979_v40, %v2689_v53  ;;  %v6529_v26 = vadd.f32 %v5145_v14, %v2727_v15 }
0x159c   : > { %v6527_v23 = vadd.f32 %v5145_v14, %v2726_v17  ;;  %v2720_v24 = vmul.f32 %v5981_v8, %v2688_v56 }
0x159d   : > { %v2729_v27 = vmul.f32 %v5144_v11, %v2721_v19 }
0x159e   : > { %5508 = vmatprep.mubr.msk.f32.mxu0 %vm368_vm2, %v6527_v23  ;;  %v2728_v29 = vmul.f32 %v5144_v11, %v2720_v24 }
0x159f   : > { %5509 = vmatmul.mubr.msk.f32.vlgmr.msra.gmra.mrb[38].mxu0 %vm368_vm2, %v6529_v26  ;;  %v6537_v31 = vadd.f32 %v5145_v14, %v2729_v27 }
0x15a0   : > { %v6535_v30 = vadd.f32 %v5145_v14, %v2728_v29  ;;  %5739 = vmatpush3.bf16.msra.mxu0 %v5736_v34 }
0x15a1   : > { %5741 = vmatprep.subr.bf16.mxu0 %v5740_v25 }
0x15a2   : > { %5511 = vmatprep.mubr.msk.f32.mxu0 %vm368_vm2, %v6535_v30 }
0x15a3   : > { %5512 = vmatmul.mubr.msk.f32.gmra.mrb[40].mxu0 %vm368_vm2, %v6537_v31 }
0x15a4   : > { %5743 = vmatpush3.bf16.msra.mxu0 %v5740_v25 }
0x1672   : > { %v5510_v38 = vpop.f32.mrb[38].mxu0 }
0x1673   : > { %v6558_v39 = vadd.f32 %v5510_v38, %v5146_v37  ;;  %v2822_v42 = vpop.f32.mrb[39].mxu0 }
0x1674   : > { %v6560_v48 = vadd.f32 %v5146_v37, %v2822_v42 }
0x1675   : > { %v6563_v49 = vmul.f32 0.70710677, %v6558_v39 }
0x1676   : > { %v6566_v50 = vmul.f32 0.70710677, %v6560_v48  ;;  %v5513_v52 = vpop.f32.mrb[40].mxu0 }
0x1677   : > { %v2850_v3 = vand.u32 2147483647, %v6563_v49  ;;  %v6569_v4 = vadd.f32 %v5513_v52, %v5146_v37  ;;  %v2832_v0 = vpop.f32.mrb[41].mxu0  ;;  %vm2926_vm7 = vcmp.ge.f32.partialorder %v6563_v49, 0.0 }
0x1678   : > { %v2849_v61 = vand.u32 2147483647, %v6566_v50  ;;  %v6572_v53 = vadd.f32 %v5146_v37, %v2832_v0  ;;  %vm2925_vm8 = vcmp.ge.f32.partialorder %v6566_v50, 0.0 }
0x1679   : > { %v2854_v54 = vmul.f32 0.3275911, %v2850_v3  ;;  %v6575_v55 = vmul.f32 0.70710677, %v6569_v4  ;;  %v2902_v63 = vsub.f32 0.0, %v2850_v3 }
0x167a   : > { %v2853_v56 = vmul.f32 0.3275911, %v2849_v61  ;;  %v6578_v57 = vmul.f32 0.70710677, %v6572_v53  ;;  %v2901_v1 = vsub.f32 0.0, %v2849_v61 }
0x167b   : > { %v2858_v58 = vadd.f32 1.0, %v2854_v54  ;;  %v2852_v45 = vand.u32 2147483647, %v6575_v55  ;;  %v2906_v6 = vmul.f32 %v2902_v63, %v2850_v3  ;;  %vm2928_vm9 = vcmp.ge.f32.partialorder %v6575_v55, 0.0  ;;  %v1421_v55 = vpop.xlane.xlu1 %1420 }
0x167c   : > { %v2857_v59 = vadd.f32 1.0, %v2853_v56  ;;  %v2851_v60 = vand.u32 2147483647, %v6578_v57  ;;  %v2905_v7 = vmul.f32 %v2901_v1, %v2849_v61  ;;  %vm2927_vm10 = vcmp.ge.f32.partialorder %v6578_v57, 0.0  ;;  %v1424_v57 = vpop.xlane.xlu0 %1423 }
0x167d   : > { %5982 = vrcp.f32 %v2858_v58  ;;  %v2856_v43 = vmul.f32 0.3275911, %v2852_v45  ;;  %v2904_v46 = vsub.f32 0.0, %v2852_v45  ;;  %v2911_v22 = vmul.f32 1.442695, %v2906_v6 }
0x167e   : > { %5984 = vrcp.f32 %v2857_v59  ;;  %v2855_v18 = vmul.f32 0.3275911, %v2851_v60  ;;  %v2903_v9 = vsub.f32 0.0, %v2851_v60  ;;  %v2909_v14 = vmul.f32 1.442695, %v2905_v7 }
0x167f   : > { %v2860_v16 = vadd.f32 1.0, %v2856_v43  ;;  %v2908_v12 = vmul.f32 %v2904_v46, %v2852_v45 }
0x1680   : > { %v2859_v62 = vadd.f32 1.0, %v2855_v18  ;;  %v2907_v40 = vmul.f32 %v2903_v9, %v2851_v60 }
0x1681   : > { %5986 = vrcp.f32 %v2860_v16  ;;  %v2915_v29 = vmul.f32 1.442695, %v2908_v12 }
0x1682   : > { %5988 = vrcp.f32 %v2859_v62  ;;  %v2913_v35 = vmul.f32 1.442695, %v2907_v40 }
0x1683   : > { %5990 = vpow2.f32 %v2911_v22 }
0x1684   : > { %5992 = vpow2.f32 %v2909_v14 }
0x1685   : > { %5994 = vpow2.f32 %v2915_v29 }
0x1686   : > { %5996 = vpow2.f32 %v2913_v35 }
0x1687   : > { %v5983_v2 = vpop.eup %5982 }
0x1688   : > { %v5985_v44 = vpop.eup %5984  ;;  %v2866_v47 = vmul.f32 1.0614054, %v5983_v2 }
0x1689   : > { %v2865_v21 = vmul.f32 1.0614054, %v5985_v44 }
0x168a   : > { %v2870_v10 = vadd.f32 -1.4531521, %v2866_v47 }
0x168b   : > { %v5987_v36 = vpop.eup %5986  ;;  %v2869_v11 = vadd.f32 -1.4531521, %v2865_v21 }
0x168c   : > { %v5989_v13 = vpop.eup %5988  ;;  %v2874_v51 = vmul.f32 %v5983_v2, %v2870_v10  ;;  %v2868_v15 = vmul.f32 1.0614054, %v5987_v36 }
0x168d   : > { %v2873_v17 = vmul.f32 %v5985_v44, %v2869_v11  ;;  %v2867_v8 = vmul.f32 1.0614054, %v5989_v13  ;;  %v5991_v18 = vpop.eup %5990 }
0x168e   : > { %v2878_v19 = vadd.f32 1.4214138, %v2874_v51  ;;  %v2872_v24 = vadd.f32 -1.4531521, %v2868_v15  ;;  %v5993_v63 = vpop.eup %5992 }
0x168f   : > { %v2877_v27 = vadd.f32 1.4214138, %v2873_v17  ;;  %v2871_v32 = vadd.f32 -1.4531521, %v2867_v8  ;;  %v5995_v21 = vpop.eup %5994 }
0x1690   : > { %v2882_v33 = vmul.f32 %v5983_v2, %v2878_v19  ;;  %v2876_v34 = vmul.f32 %v5987_v36, %v2872_v24  ;;  %v5997_v11 = vpop.eup %5996  ;;  %v2841_v19 = vmul.f32 0.5, %v6560_v48  ;;  %v2844_v48 = vmul.f32 0.5, %v6569_v4 }
0x1691   : > { %v2881_v28 = vmul.f32 %v5985_v44, %v2877_v27  ;;  %v2875_v25 = vmul.f32 %v5989_v13, %v2871_v32 }
0x1692   : > { %v2886_v37 = vadd.f32 -0.28449672, %v2882_v33  ;;  %v2880_v38 = vadd.f32 1.4214138, %v2876_v34  ;;  %v2843_v34 = vmul.f32 0.5, %v6572_v53 }
0x1693   : > { %v2885_v42 = vadd.f32 -0.28449672, %v2881_v28  ;;  %v2879_v52 = vadd.f32 1.4214138, %v2875_v25  ;;  %v1425_v25 = vmul.f32 0.0625, %v1421_v55 }
0x1694   : > { %v2890_v3 = vmul.f32 %v5983_v2, %v2886_v37  ;;  %v2884_v0 = vmul.f32 %v5987_v36, %v2880_v38  ;;  %v1426_v38 = vmul.f32 0.0625, %v1424_v57  ;;  %v5155_v53 = vld [vmem:[%s6903_s2 + $0x55] ss:$0 sm:$0xff] }
0x1695   : > { %v2889_v61 = vmul.f32 %v5985_v44, %v2885_v42  ;;  %v2883_v54 = vmul.f32 %v5989_v13, %v2879_v52  ;;  %v6598_v4 = vsub.f32 %v6512_v41, %v1425_v25 }
0x1696   : > { %v2894_v56 = vadd.f32 0.2548296, %v2890_v3  ;;  %v2888_v58 = vadd.f32 -0.28449672, %v2884_v0 }
0x1697   : > { %v2893_v45 = vadd.f32 0.2548296, %v2889_v61  ;;  %v2887_v59 = vadd.f32 -0.28449672, %v2883_v54  ;;  %v6602_v61 = vsub.f32 %v6509_v20, %v1426_v38  ;;  %v3217_v38 = vld [vmem:[%s6904_s3 + $0x10] sm:$0xff] }
0x1698   : > { %v2898_v60 = vmul.f32 %v5983_v2, %v2894_v56  ;;  %v2892_v43 = vmul.f32 %v5987_v36, %v2888_v58 }
0x1699   : > { %v2897_v16 = vmul.f32 %v5985_v44, %v2893_v45  ;;  %v2891_v62 = vmul.f32 %v5989_v13, %v2887_v59  ;;  %v1429_v59 = vmul.f32 %v6598_v4, %v6598_v4 }
0x169a   : > { %v2918_v1 = vmul.f32 %v5991_v18, %v2898_v60  ;;  %v2896_v6 = vadd.f32 0.2548296, %v2892_v43 }
0x169b   : > { %v2917_v46 = vmul.f32 %v5993_v63, %v2897_v16  ;;  %v2895_v47 = vadd.f32 0.2548296, %v2891_v62  ;;  %v1431_v43 = vsel %vm208_vm0, %v1429_v59, 0.0  ;;  %v3136_v63 = vld [vmem:[%s6904_s3 + $0x8] sm:$0xff]  ;;  %v3451_v59 = vld [vmem:[%s6904_s3 + $0x40] sm:$0xff] }
0x169c   : > { %v2922_v7 = vsub.f32 1.0, %v2918_v1  ;;  %v2900_v9 = vmul.f32 %v5987_v36, %v2896_v6  ;;  %v6081_v1 = vmov 0.0|0.0  }
0x169d   : > { %v2921_v10 = vsub.f32 1.0, %v2917_v46  ;;  %v2899_v22 = vmul.f32 %v5989_v13, %v2895_v47  ;;  %v2842_v13 = vmul.f32 0.5, %v6558_v39  ;;  %5744 = vmatprep.subr.bf16.mxu1 %v6081_v1 }
0x169e   : > { %v2930_v12 = vsub.f32 0.0, %v2922_v7  ;;  %v2920_v51 = vmul.f32 %v5995_v21, %v2900_v9 }
0x169f   : > { %v2929_v2 = vsub.f32 0.0, %v2921_v10  ;;  %v2919_v14 = vmul.f32 %v5997_v11, %v2899_v22 }
0x16a0   : > { %v2934_v15 = vsel %vm2926_vm7, %v2922_v7, %v2930_v12  ;;  %v2924_v44 = vsub.f32 1.0, %v2920_v51 }
0x16a1   : > { %v2938_v40 = vadd.f32 1.0, %v2934_v15  ;;  %v2933_v17 = vsel %vm2925_vm8, %v2921_v10, %v2929_v2  ;;  %v2923_v8 = vsub.f32 1.0, %v2919_v14 }
0x16a2   : > { %v2937_v36 = vadd.f32 1.0, %v2933_v17  ;;  %v2932_v24 = vsub.f32 0.0, %v2924_v44 }
0x16a3   : > { %v2931_v27 = vsub.f32 0.0, %v2923_v8  ;;  %v2942_v32 = vmul.f32 %v2938_v40, %v2842_v13 }
0x16a4   : > { %v2941_v29 = vmul.f32 %v2937_v36, %v2841_v19  ;;  %v2936_v49 = vsel %vm2928_vm9, %v2924_v44, %v2932_v24 }
0x16a5   : > { %v2940_v33 = vadd.f32 1.0, %v2936_v49  ;;  %v2935_v50 = vsel %vm2927_vm10, %v2923_v8, %v2931_v27 }
0x16a6   : > { %v2939_v35 = vadd.f32 1.0, %v2935_v50  ;;  %5522 = vmatprep.mubr.msk.f32.mxu0 %vm1326_vm6, %v2941_v29  ;;  %v5103_v50 = vld [vmem:[%s6902_s1 + $0x66] ss:$0 sm:$0xff] }
0x16a7   : > { %5523 = vmatmul.mubr.msk.f32.vlgmr.msra.gmra.mrb[42].mxu0 %vm1326_vm6, %v2942_v32  ;;  %v2944_v28 = vmul.f32 %v2940_v33, %v2844_v48  ;;  %v5104_v48 = vld [vmem:[%s6902_s1 + $0x67] ss:$0 sm:$0xff] }
0x16a8   : > { %v2943_v39 = vmul.f32 %v2939_v35, %v2843_v34 }
0x16aa   : > { %5525 = vmatprep.mubr.msk.f32.mxu0 %vm1326_vm6, %v2943_v39 }
0x16ab   : > { %5526 = vmatmul.mubr.msk.f32.gmra.mrb[44].mxu0 %vm1326_vm6, %v2944_v28 }
0x177a   : > { %v5524_v37 = vpop.f32.mrb[42].mxu0 }
0x177b   : > { %v3027_v42 = vpop.f32.mrb[43].mxu0  ;;  %v3047_v56 = vadd.f32 %v5524_v37, %v6529_v26 }
0x177c   : > { %v3046_v52 = vadd.f32 %v3027_v42, %v6527_v23  ;;  %v1430_v23 = vmul.f32 %v6602_v61, %v6602_v61  ;;  %v3218_v42 = vld [vmem:[%s6904_s3 + $0x18] sm:$0xff] }
0x177d   : > { %v3056_v18 = vadd.f32 %v5155_v53, %v3047_v56  ;;  %v3374_v56 = vld [vmem:[%s6904_s3 + $0x38] sm:$0xff] }
0x177e   : > { %v5527_v3 = vpop.f32.mrb[44].mxu0  ;;  %v3055_v0 = vadd.f32 %v5155_v53, %v3046_v52  ;;  %v1434_v26 = vsel %vm208_vm0, %v1430_v23, 0.0  ;;  %v3295_v52 = vld [vmem:[%s6904_s3 + $0x20] sm:$0xff] }
0x177f   : > { %v3037_v54 = vpop.f32.mrb[45].mxu0  ;;  %v3049_v60 = vadd.f32 %v5527_v3, %v6537_v31  ;;  %v3135_v31 = vld [vmem:[%s6904_s3] sm:$0xff]  ;;  %v3296_v3 = vld [vmem:[%s6904_s3 + $0x28] sm:$0xff] }
0x1780   : > { %v3048_v58 = vadd.f32 %v3037_v54, %v6535_v30  ;;  %v3061_v45 = vsel %vm368_vm2, %v3055_v0, 0.0  ;;  %v3064_v30 = vsel %vm368_vm2, %v3056_v18, 0.0  ;;  %v5745_v6 = vpack.c.bf16 %v3136_v63, %v3135_v31  ;;  %v3373_v54 = vld [vmem:[%s6904_s3 + $0x30] sm:$0xff] }
0x1781   : > { %3062 = vadd.xlane.f32.xlu1 %v3061_v45  ;;  %v3058_v16 = vadd.f32 %v5155_v53, %v3049_v60  ;;  %v3685_v63 = vld [vmem:[%s6904_s3 + $0x70] sm:$0xff] }
0x1782   : > { %v3057_v41 = vadd.f32 %v5155_v53, %v3048_v58  ;;  %5746 = vmatpush3.bf16.msra.mxu1 %v5745_v6  ;;  %v5748_v53 = vpack.c.bf16 %v3218_v42, %v3217_v38  ;;  %v5754_v58 = vpack.c.bf16 %v3374_v56, %v3373_v54  ;;  %v3686_v6 = vld [vmem:[%s6904_s3 + $0x78] sm:$0xff] }
0x1783   : > { %v3070_v62 = vsel %vm368_vm2, %v3058_v16, 0.0  ;;  %5747 = vmatprep.subr.bf16.mxu1 %v6081_v1  ;;  %v3993_v42 = vld [vmem:[%s6904_s3 + $0x98] sm:$0xff] }
0x1784   : > { %v3067_v20 = vsel %vm368_vm2, %v3057_v41, 0.0  ;;  %v4301_v56 = vld [vmem:[%s6904_s3 + $0xb8] sm:$0xff] }
0x1785   : > { %3068 = vadd.xlane.f32.xlu0 %v3067_v20  ;;  %1432 = vadd.xlane.f32.xlu1 %v1431_v43  ;;  %v3529_v20 = vld [vmem:[%s6904_s3 + $0x50] sm:$0xff]  ;;  %v3530_v43 = vld [vmem:[%s6904_s3 + $0x58] sm:$0xff] }
0x1789   : > { %1435 = vadd.xlane.f32.xlu0 %v1434_v26  ;;  %3065 = vadd.xlane.f32.xlu1 %v3064_v30  ;;  %v3607_v30 = vld [vmem:[%s6904_s3 + $0x60] sm:$0xff] }
0x178d   : > { %3071 = vadd.xlane.f32.xlu0 %v3070_v62 }
0x180e   : > { %v3063_v46 = vpop.xlane.xlu1 %3062 }
0x180f   : > { %v3073_v47 = vmul.f32 0.125, %v3063_v46  ;;  %v5766_v46 = vpack.c.bf16 %v3686_v6, %v3685_v63  ;;  %v4917_v6 = vld [vmem:[%s6904_s3 + $0xf8] sm:$0xff] }
0x1811   : > { %v6625_v7 = vsub.f32 %v3055_v0, %v3073_v47  ;;  %v5751_v0 = vpack.c.bf16 %v3296_v3, %v3295_v52  ;;  %v4147_v3 = vld [vmem:[%s6904_s3 + $0xa8] sm:$0xff] }
0x1812   : > { %v3069_v9 = vpop.xlane.xlu0 %3068  ;;  %v1433_v21 = vpop.xlane.xlu1 %1432 }
0x1813   : > { %v3075_v10 = vmul.f32 0.125, %v3069_v9  ;;  %v1437_v22 = vmul.f32 0.0625, %v1433_v21  ;;  %v3081_v11 = vmul.f32 %v6625_v7, %v6625_v7 }
0x1815   : > { %v6629_v12 = vsub.f32 %v3057_v41, %v3075_v10  ;;  %v1439_v51 = vadd.f32 1e-05, %v1437_v22  ;;  %v3085_v2 = vsel %vm368_vm2, %v3081_v11, 0.0  ;;  %v3452_v41 = vld [vmem:[%s6904_s3 + $0x48] sm:$0xff] }
0x1816   : > { %v1436_v14 = vpop.xlane.xlu0 %1435  ;;  %3086 = vadd.xlane.f32.xlu1 %v3085_v2  ;;  %v3066_v15 = vpop.xlane.xlu1 %3065  ;;  %v5757_v23 = vpack.c.bf16 %v3452_v41, %v3451_v59  ;;  %v4455_v41 = vld [vmem:[%s6904_s3 + $0xc8] sm:$0xff] }
0x1817   : > { %5998 = vrsqrt.f32 %v1439_v51  ;;  %v1438_v44 = vmul.f32 0.0625, %v1436_v14  ;;  %v3074_v40 = vmul.f32 0.125, %v3066_v15  ;;  %v3083_v17 = vmul.f32 %v6629_v12, %v6629_v12 }
0x1819   : > { %v1440_v8 = vadd.f32 1e-05, %v1438_v44  ;;  %v6634_v19 = vsub.f32 %v3056_v18, %v3074_v40  ;;  %v3091_v36 = vsel %vm368_vm2, %v3083_v17, 0.0  ;;  %v5760_v18 = vpack.c.bf16 %v3530_v43, %v3529_v20  ;;  %v4609_v43 = vld [vmem:[%s6904_s3 + $0xd8] sm:$0xff] }
0x181a   : > { %3092 = vadd.xlane.f32.xlu0 %v3091_v36  ;;  %v3072_v24 = vpop.xlane.xlu0 %3071  ;;  %v5156_v36 = vld [vmem:[%s6903_s2 + $0x56] ss:$0 sm:$0xff] }
0x181b   : > { %6000 = vrsqrt.f32 %v1440_v8  ;;  %v3076_v13 = vmul.f32 0.125, %v3072_v24  ;;  %v3082_v27 = vmul.f32 %v6634_v19, %v6634_v19 }
0x181d   : > { %v6639_v29 = vsub.f32 %v3058_v16, %v3076_v13  ;;  %v3088_v49 = vsel %vm368_vm2, %v3082_v27, 0.0  ;;  %v3608_v16 = vld [vmem:[%s6904_s3 + $0x68] sm:$0xff]  ;;  %v5157_v27 = vld [vmem:[%s6903_s2 + $0x57] ss:$0 sm:$0xff] }
0x181e   : > { %3089 = vadd.xlane.f32.xlu1 %v3088_v49  ;;  %v5763_v62 = vpack.c.bf16 %v3608_v16, %v3607_v30  ;;  %v4763_v16 = vld [vmem:[%s6904_s3 + $0xe8] sm:$0xff] }
0x181f   : > { %v3084_v32 = vmul.f32 %v6639_v29, %v6639_v29 }
0x1821   : > { %v5999_v33 = vpop.eup %5998  ;;  %v3094_v34 = vsel %vm368_vm2, %v3084_v32, 0.0 }
0x1822   : > { %v1443_v35 = vmul.f32 %v5999_v33, %v6598_v4  ;;  %3095 = vadd.xlane.f32.xlu0 %v3094_v34 }
0x1824   : > { %v1449_v39 = vmul.f32 %v5103_v50, %v1443_v35 }
0x1825   : > { %v6001_v28 = vpop.eup %6000 }
0x1826   : > { %v1455_v55 = vadd.f32 %v5104_v48, %v1449_v39  ;;  %v1444_v57 = vmul.f32 %v6001_v28, %v6602_v61 }
0x1828   : > { %1457 = vst.msk [vmem:[#allocation3] sm:$0xff] %vm208_vm0, %v1455_v55  ;;  %v1450_v25 = vmul.f32 %v5103_v50, %v1444_v57 }
0x182a   : > { %v1456_v37 = vadd.f32 %v5104_v48, %v1450_v25 }
0x182c   : > { %1458 = vst.msk [vmem:[#allocation3 + $0x8] sm:$0xff] %vm208_vm0, %v1456_v37 }
0x1833   : > { %v3134_v4 = vld [vmem:[#allocation3] ss:$8 sm:$0x3]  ;;  %v3216_v61 = vld [vmem:[#allocation3 + $0x1] ss:$8 sm:$0x3] }
0x1834   : > { %5533 = vmatmul.mubr.msk.f32.vlgmr.msra.gmra.mrb[12].mxu1 %vm208_vm0, %v3134_v4  ;;  %v3294_v45 = vld [vmem:[#allocation3 + $0x2] ss:$8 sm:$0x3]  ;;  %v3372_v60 = vld [vmem:[#allocation3 + $0x3] ss:$8 sm:$0x3] }
0x1835   : > { %5749 = vmatpush3.bf16.msra.mxu1 %v5748_v53  ;;  %5539 = vmatprep.mubr.msk.f32.mxu1 %vm6075_vm1, %v6074_v5  ;;  %v3450_v26 = vld [vmem:[#allocation3 + $0x4] ss:$8 sm:$0x3]  ;;  %v3528_v31 = vld [vmem:[#allocation3 + $0x5] ss:$8 sm:$0x3] }
0x1836   : > { %5750 = vmatprep.subr.bf16.mxu1 %v6081_v1  ;;  %v3606_v47 = vld [vmem:[#allocation3 + $0x6] ss:$8 sm:$0x3]  ;;  %v3684_v9 = vld [vmem:[#allocation3 + $0x7] ss:$8 sm:$0x3] }
0x1837   : > { %v4070_v4 = vld [vmem:[%s6904_s3 + $0xa0] sm:$0xff] }
0x183c   : > { %5540 = vmatmul.mubr.msk.f32.vlgmr.msra.gmra.mrb[12].mxu1 %vm208_vm0, %v3216_v61  ;;  %v4224_v61 = vld [vmem:[%s6904_s3 + $0xb0] sm:$0xff] }
0x183d   : > { %5752 = vmatpush3.bf16.msra.mxu1 %v5751_v0  ;;  %5546 = vmatprep.mubr.msk.f32.mxu1 %vm6075_vm1, %v6074_v5 }
0x183e   : > { %5753 = vmatprep.subr.bf16.mxu1 %v6081_v1 }
0x1844   : > { %5547 = vmatmul.mubr.msk.f32.vlgmr.msra.gmra.mrb[12].mxu1 %vm208_vm0, %v3294_v45  ;;  %v4378_v45 = vld [vmem:[%s6904_s3 + $0xc0] sm:$0xff] }
0x1845   : > { %5755 = vmatpush3.bf16.msra.mxu1 %v5754_v58  ;;  %5553 = vmatprep.mubr.msk.f32.mxu1 %vm6075_vm1, %v6074_v5 }
0x1846   : > { %5756 = vmatprep.subr.bf16.mxu1 %v6081_v1 }
0x184c   : > { %5554 = vmatmul.mubr.msk.f32.vlgmr.msra.gmra.mrb[12].mxu1 %vm208_vm0, %v3372_v60  ;;  %v4532_v60 = vld [vmem:[%s6904_s3 + $0xd0] sm:$0xff] }
0x184d   : > { %5758 = vmatpush3.bf16.msra.mxu1 %v5757_v23  ;;  %5560 = vmatprep.mubr.msk.f32.mxu1 %vm6075_vm1, %v6074_v5 }
0x184e   : > { %5759 = vmatprep.subr.bf16.mxu1 %v6081_v1 }
0x1854   : > { %5561 = vmatmul.mubr.msk.f32.vlgmr.msra.gmra.mrb[12].mxu1 %vm208_vm0, %v3450_v26  ;;  %v4686_v26 = vld [vmem:[%s6904_s3 + $0xe0] sm:$0xff] }
0x1855   : > { %5761 = vmatpush3.bf16.msra.mxu1 %v5760_v18  ;;  %5567 = vmatprep.mubr.msk.f32.mxu1 %vm6075_vm1, %v6074_v5 }
0x1856   : > { %5762 = vmatprep.subr.bf16.mxu1 %v6081_v1 }
0x185c   : > { %5568 = vmatmul.mubr.msk.f32.vlgmr.msra.gmra.mrb[12].mxu1 %vm208_vm0, %v3528_v31  ;;  %v4840_v31 = vld [vmem:[%s6904_s3 + $0xf0] sm:$0xff] }
0x185d   : > { %5764 = vmatpush3.bf16.msra.mxu1 %v5763_v62  ;;  %5574 = vmatprep.mubr.msk.f32.mxu1 %vm6075_vm1, %v6074_v5 }
0x185e   : > { %5765 = vmatprep.subr.bf16.mxu1 %v6081_v1  ;;  %v3762_v1 = vld [vmem:[%s6904_s3 + $0x80] sm:$0xff] }
0x1864   : > { %5575 = vmatmul.mubr.msk.f32.vlgmr.msra.gmra.mrb[12].mxu1 %vm208_vm0, %v3606_v47 }
0x1865   : > { %5767 = vmatpush3.bf16.msra.mxu1 %v5766_v46  ;;  %5581 = vmatprep.mubr.msk.f32.mxu1 %vm6075_vm1, %v6074_v5 }
0x1866   : > { %5584 = vmatprep.subr.mxu1 %v6074_v5 }
0x186c   : > { %5582 = vmatmul.mubr.msk.f32.vlgmr.msra.gmra.mrb[12].mxu1 %vm208_vm0, %v3684_v9 }
0x186d   : > { %5585 = vmatpush3.msra.mxu1 %v3762_v1  ;;  %5586 = vmatprep.mubr.msk.f32.mxu1 %vm6075_vm1, %v6074_v5  ;;  %v5159_v1 = vld [vmem:[%s6904_s3 + $0x100] ss:$0 sm:$0xff] }
0x186e   : > { %5589 = vmatprep.subr.mxu1 %v6074_v5 }
0x18a3   : > { %v3087_v21 = vpop.xlane.xlu1 %3086 }
0x18a4   : > { %v3097_v10 = vmul.f32 0.125, %v3087_v21 }
0x18a6   : > { %v3101_v22 = vadd.f32 1e-05, %v3097_v10 }
0x18a7   : > { %v3093_v11 = vpop.xlane.xlu0 %3092 }
0x18a8   : > { %6002 = vrsqrt.f32 %v3101_v22  ;;  %v3099_v51 = vmul.f32 0.125, %v3093_v11 }
0x18aa   : > { %v3103_v2 = vadd.f32 1e-05, %v3099_v51 }
0x18ab   : > { %v3090_v14 = vpop.xlane.xlu1 %3089 }
0x18ac   : > { %6004 = vrsqrt.f32 %v3103_v2  ;;  %v3098_v15 = vmul.f32 0.125, %v3090_v14 }
0x18ae   : > { %v3102_v44 = vadd.f32 1e-05, %v3098_v15 }
0x18af   : > { %v3096_v40 = vpop.xlane.xlu0 %3095 }
0x18b0   : > { %6006 = vrsqrt.f32 %v3102_v44  ;;  %v3100_v17 = vmul.f32 0.125, %v3096_v40 }
0x18b2   : > { %v6003_v8 = vpop.eup %6002  ;;  %v3104_v24 = vadd.f32 1e-05, %v3100_v17 }
0x18b3   : > { %v3109_v13 = vmul.f32 %v6003_v8, %v6625_v7 }
0x18b4   : > { %6008 = vrsqrt.f32 %v3104_v24 }
0x18b5   : > { %v3117_v49 = vmul.f32 %v5156_v36, %v3109_v13 }
0x18b6   : > { %v6005_v32 = vpop.eup %6004 }
0x18b7   : > { %v3125_v33 = vadd.f32 %v5157_v27, %v3117_v49  ;;  %v3111_v50 = vmul.f32 %v6005_v32, %v6629_v12  ;;  %v3839_v12 = vld [vmem:[%s6904_s3 + $0x88] sm:$0xff] }
0x18b9   : > { %3129 = vst.msk [vmem:[#allocation4] sm:$0xff] %vm368_vm2, %v3125_v33  ;;  %v3119_v34 = vmul.f32 %v5156_v36, %v3111_v50 }
0x18ba   : > { %v6007_v35 = vpop.eup %6006 }
0x18bb   : > { %v3127_v48 = vadd.f32 %v5157_v27, %v3119_v34  ;;  %v3110_v39 = vmul.f32 %v6007_v35, %v6634_v19  ;;  %v3916_v19 = vld [vmem:[%s6904_s3 + $0x90] sm:$0xff] }
0x18bd   : > { %3131 = vst.msk [vmem:[#allocation4 + $0x10] sm:$0xff] %vm368_vm2, %v3127_v48  ;;  %v3118_v7 = vmul.f32 %v5156_v36, %v3110_v39 }
0x18be   : > { %v6009_v28 = vpop.eup %6008 }
0x18bf   : > { %v3126_v55 = vadd.f32 %v5157_v27, %v3118_v7  ;;  %v3112_v57 = vmul.f32 %v6009_v28, %v6639_v29 }
0x18c1   : > { %3130 = vst.msk [vmem:[#allocation4 + $0x8] sm:$0xff] %vm368_vm2, %v3126_v55  ;;  %v3120_v25 = vmul.f32 %v5156_v36, %v3112_v57 }
0x18c3   : > { %v3128_v37 = vadd.f32 %v5157_v27, %v3120_v25 }
0x18c4   : > { %v3761_v38 = vld [vmem:[#allocation4] ss:$16 sm:$0x3]  ;;  %v3838_v29 = vld [vmem:[#allocation4 + $0x1] ss:$16 sm:$0x3] }
0x18c5   : > { %3132 = vst.msk [vmem:[#allocation4 + $0x18] sm:$0xff] %vm368_vm2, %v3128_v37  ;;  %5587 = vmatmul.mubr.msk.f32.vlgmr.msra.gmra.mrb[12].mxu1 %vm368_vm2, %v3761_v38  ;;  %v3915_v53 = vld [vmem:[#allocation4 + $0x2] ss:$16 sm:$0x3] }
0x18c6   : > { %5590 = vmatpush3.msra.mxu1 %v3839_v12  ;;  %5591 = vmatprep.mubr.msk.f32.mxu1 %vm6075_vm1, %v6074_v5  ;;  %v3992_v52 = vld [vmem:[#allocation4 + $0x3] ss:$16 sm:$0x3]  ;;  %v4069_v0 = vld [vmem:[#allocation4 + $0x4] ss:$16 sm:$0x3] }
0x18c7   : > { %5594 = vmatprep.subr.mxu1 %v6074_v5  ;;  %v4146_v54 = vld [vmem:[#allocation4 + $0x5] ss:$16 sm:$0x3]  ;;  %v4223_v58 = vld [vmem:[#allocation4 + $0x6] ss:$16 sm:$0x3] }
0x18c8   : > { %v4300_v59 = vld [vmem:[#allocation4 + $0x7] ss:$16 sm:$0x3] }
0x18cc   : > { %v4377_v23 = vld [vmem:[#allocation4 + $0x8] ss:$16 sm:$0x3]  ;;  %v4454_v20 = vld [vmem:[#allocation4 + $0x9] ss:$16 sm:$0x3] }
0x18cd   : > { %5592 = vmatmul.mubr.msk.f32.vlgmr.msra.gmra.mrb[12].mxu1 %vm368_vm2, %v3838_v29  ;;  %v4531_v18 = vld [vmem:[#allocation4 + $0xa] ss:$16 sm:$0x3]  ;;  %v4608_v30 = vld [vmem:[#allocation4 + $0xb] ss:$16 sm:$0x3] }
0x18ce   : > { %5595 = vmatpush3.msra.mxu1 %v3916_v19  ;;  %5596 = vmatprep.mubr.msk.f32.mxu1 %vm6075_vm1, %v6074_v5  ;;  %v4685_v62 = vld [vmem:[#allocation4 + $0xc] ss:$16 sm:$0x3]  ;;  %v4762_v63 = vld [vmem:[#allocation4 + $0xd] ss:$16 sm:$0x3] }
0x18cf   : > { %5599 = vmatprep.subr.mxu1 %v6074_v5  ;;  %v4839_v46 = vld [vmem:[#allocation4 + $0xe] ss:$16 sm:$0x3]  ;;  %v4916_v47 = vld [vmem:[#allocation4 + $0xf] ss:$16 sm:$0x3] }
0x18d5   : > { %5597 = vmatmul.mubr.msk.f32.vlgmr.msra.gmra.mrb[12].mxu1 %vm368_vm2, %v3915_v53 }
0x18d6   : > { %5600 = vmatpush3.msra.mxu1 %v3993_v42  ;;  %5601 = vmatprep.mubr.msk.f32.mxu1 %vm6075_vm1, %v6074_v5 }
0x18d7   : > { %5604 = vmatprep.subr.mxu1 %v6074_v5 }
0x18dd   : > { %5602 = vmatmul.mubr.msk.f32.vlgmr.msra.gmra.mrb[12].mxu1 %vm368_vm2, %v3992_v52 }
0x18de   : > { %5605 = vmatpush3.msra.mxu1 %v4070_v4  ;;  %5606 = vmatprep.mubr.msk.f32.mxu1 %vm6075_vm1, %v6074_v5 }
0x18df   : > { %5609 = vmatprep.subr.mxu1 %v6074_v5 }
0x18e5   : > { %5607 = vmatmul.mubr.msk.f32.vlgmr.msra.gmra.mrb[12].mxu1 %vm368_vm2, %v4069_v0 }
0x18e6   : > { %5610 = vmatpush3.msra.mxu1 %v4147_v3  ;;  %5611 = vmatprep.mubr.msk.f32.mxu1 %vm6075_vm1, %v6074_v5 }
0x18e7   : > { %5614 = vmatprep.subr.mxu1 %v6074_v5 }
0x18ed   : > { %5612 = vmatmul.mubr.msk.f32.vlgmr.msra.gmra.mrb[12].mxu1 %vm368_vm2, %v4146_v54 }
0x18ee   : > { %5615 = vmatpush3.msra.mxu1 %v4224_v61  ;;  %5616 = vmatprep.mubr.msk.f32.mxu1 %vm6075_vm1, %v6074_v5 }
0x18ef   : > { %5619 = vmatprep.subr.mxu1 %v6074_v5 }
0x18f5   : > { %5617 = vmatmul.mubr.msk.f32.vlgmr.msra.gmra.mrb[12].mxu1 %vm368_vm2, %v4223_v58 }
0x18f6   : > { %5620 = vmatpush3.msra.mxu1 %v4301_v56  ;;  %5621 = vmatprep.mubr.msk.f32.mxu1 %vm6075_vm1, %v6074_v5 }
0x18f7   : > { %5624 = vmatprep.subr.mxu1 %v6074_v5 }
0x18fd   : > { %5622 = vmatmul.mubr.msk.f32.vlgmr.msra.gmra.mrb[12].mxu1 %vm368_vm2, %v4300_v59 }
0x18fe   : > { %5625 = vmatpush3.msra.mxu1 %v4378_v45  ;;  %5626 = vmatprep.mubr.msk.f32.mxu1 %vm6075_vm1, %v6074_v5 }
0x18ff   : > { %5629 = vmatprep.subr.mxu1 %v6074_v5 }
0x1905   : > { %5627 = vmatmul.mubr.msk.f32.vlgmr.msra.gmra.mrb[12].mxu1 %vm368_vm2, %v4377_v23 }
0x1906   : > { %5630 = vmatpush3.msra.mxu1 %v4455_v41  ;;  %5631 = vmatprep.mubr.msk.f32.mxu1 %vm6075_vm1, %v6074_v5 }
0x1907   : > { %5634 = vmatprep.subr.mxu1 %v6074_v5 }
0x190d   : > { %5632 = vmatmul.mubr.msk.f32.vlgmr.msra.gmra.mrb[12].mxu1 %vm368_vm2, %v4454_v20 }
0x190e   : > { %5635 = vmatpush3.msra.mxu1 %v4532_v60  ;;  %5636 = vmatprep.mubr.msk.f32.mxu1 %vm6075_vm1, %v6074_v5 }
0x190f   : > { %5639 = vmatprep.subr.mxu1 %v6074_v5 }
0x1915   : > { %5637 = vmatmul.mubr.msk.f32.vlgmr.msra.gmra.mrb[12].mxu1 %vm368_vm2, %v4531_v18 }
0x1916   : > { %5640 = vmatpush3.msra.mxu1 %v4609_v43  ;;  %5641 = vmatprep.mubr.msk.f32.mxu1 %vm6075_vm1, %v6074_v5 }
0x1917   : > { %5644 = vmatprep.subr.mxu1 %v6074_v5 }
0x191d   : > { %5642 = vmatmul.mubr.msk.f32.vlgmr.msra.gmra.mrb[12].mxu1 %vm368_vm2, %v4608_v30 }
0x191e   : > { %5645 = vmatpush3.msra.mxu1 %v4686_v26  ;;  %5646 = vmatprep.mubr.msk.f32.mxu1 %vm6075_vm1, %v6074_v5 }
0x191f   : > { %5649 = vmatprep.subr.mxu1 %v6074_v5 }
0x1925   : > { %5647 = vmatmul.mubr.msk.f32.vlgmr.msra.gmra.mrb[12].mxu1 %vm368_vm2, %v4685_v62 }
0x1926   : > { %5650 = vmatpush3.msra.mxu1 %v4763_v16  ;;  %5651 = vmatprep.mubr.msk.f32.mxu1 %vm6075_vm1, %v6074_v5 }
0x1927   : > { %5654 = vmatprep.subr.mxu1 %v6074_v5 }
0x192d   : > { %5652 = vmatmul.mubr.msk.f32.vlgmr.msra.gmra.mrb[12].mxu1 %vm368_vm2, %v4762_v63 }
0x192e   : > { %5655 = vmatpush3.msra.mxu1 %v4840_v31  ;;  %5656 = vmatprep.mubr.msk.f32.mxu1 %vm6075_vm1, %v6074_v5 }
0x192f   : > { %5659 = vmatprep.subr.mxu1 %v6074_v5 }
0x1935   : > { %5657 = vmatmul.mubr.msk.f32.vlgmr.msra.gmra.mrb[12].mxu1 %vm368_vm2, %v4839_v46 }
0x1936   : > { %5660 = vmatpush3.msra.mxu1 %v4917_v6  ;;  %5661 = vmatprep.mubr.msk.f32.mxu1 %vm6075_vm1, %v6074_v5 }
0x193d   : > { %5662 = vmatmul.mubr.msk.f32.vlgmr.msra.gmra.mrb[12].mxu1 %vm368_vm2, %v4916_v47 }
0x1a10   : > { %v4987_v9 = vpop.f32.mrb[12].mxu1 }
0x1a11   : > { %v5776_v21 = vadd.f32 %v5159_v1, %v4987_v9  ;;  %v5663_v10 = vpop.f32.mrb[13].mxu1 }
0x1a13   : > { %4993 = vst.msk [vmem:[%s191_s8] sm:$0x3] %vm4992_vm11, %v5776_v21 }
0x1a14   : > { %6023 = shalt.err (!%p6020_p3)
}
0x1a15   : > { %s6024_s5 = scalar_lea.hbm %s6859_s23, 32  ;;  %s6028_s12 = scalar_lea.hbm %s6905_s4, 64 }
0x1a16   : > { %p6025_p4 = scmp.ne.s32.totalorder %s6859_s23, %s6024_s5  ;;  %p6029_p9 = scmp.lt.u32.totalorder %s6859_s23, %s6905_s4 }
0x1a17   : > { %p6030_p10 = scmp.lt.u32.totalorder %s6028_s12, %s6024_s5  ;;  %p6032_p12 = scmp.lt.u32.totalorder %s6024_s5, %s6859_s23 }
0x1a18   : > { %p6026_p7 = pnand %p6025_p4, %p6146_p5 }
0x1a19   : > { %p6031_p11 = por %p6030_p10, %p6029_p9 }
0x1a1a   : > { %p6027_p8 = pneg %p6026_p7 }
0x1a1b   : > { %p6033_p13 = por %p6032_p12, %p6031_p11 }
0x1a1d   : > { %p6034_p0 = pnand %p6033_p13, %p6027_p8 }
0x1a1f   : > { %6037 = shalt.err (!%p6034_p0)
}
0x1a20   : > { %5827 = dma.vmem_to_hbm [thread:$0]  (%p6146_p5), %s6861_s9, 32, %s6859_s23, %s4995_s27  }
0x1a21 PF: > { %p5833_p1 = scmp.ge.s32.totalorder %s6072_s18, 2  ;;  %s5020_s20 = sand.u32 1, %s6060_s15  }
0x1a22   : > { %s5021_s22 = scalar_lea.sflag [#allocation6], %s5020_s20 }
0x1a23   : > { %p5830_p2 = pnand %p5833_p1, %p6150_p6 }
0x1a25   : > { %6055 = dma.done.wait (!%p5830_p2), %s5021_s22, 32  }
0x1a26   : > { %6057 = vsyncadd (!%p5830_p2), %s5021_s22, 4294967264  ;;  %p14_p3 = scmp.ge.s32.totalorder %s6133_s21, 4   ;;  %s6910_s15 = smov %s6064_s16 }
0x1a27   : > { %s6911_s16 = smov %s6068_s17  ;;  %s6912_s17 = smov %s6144_s24 }
0x1a28   : > { %s6913_s18 = smov %s6133_s21  ;;  %16 = sbr.rel (!%p14_p3) target bundleno = 3 (0x3), region = 101 }
0x1a2f   :  { %5026 = vsyncpa [#allocation6], 1 }
0x1a30   :  { %5028 = vsyncpa [#allocation6 + $0x1], 1 }

</bundles_post_ra>
